<compile_context>
chip_gen: v5e
topology: v5e:2x2
jax: 0.10.0
libtpu: 0.0.40
codegen_flags: <defaults>
</compile_context>

<pallas_src>
import math

import jax
import jax.numpy as jnp
from jax import lax
from jax.experimental import pallas as pl
from jax.experimental.pallas import tpu as pltpu

LANE = 128                      # TPU lane width; channel axes padded to this
VMEM_LIMIT = 32 * 1024 * 1024   # explicit scoped-VMEM limit (safe v5e/v6e/v7x)


def _ceil_to(v, m):
    return (v + m - 1) // m * m


def _pad_last(a, to):
    pad = to - a.shape[-1]
    if pad == 0:
        return a
    return jnp.pad(a, [(0, 0)] * (a.ndim - 1) + [(0, pad)])


def _cparams(sem):
    return pltpu.CompilerParams(dimension_semantics=sem,
                                vmem_limit_bytes=VMEM_LIMIT)


def _swish_f32(y, approx):
    denom = 1.0 + jnp.exp(-y)
    if approx:
        return y * pl.reciprocal(denom, approx=True)   # divide -> EUP slot
    return y / denom


def _prep_bn(bn, coutp):
    """Eval-mode BatchNorm -> per-channel (scale, bias), lane-padded to coutp."""
    scale = bn["gamma"] / jnp.sqrt(bn["var"] + bn["eps"])
    bias = bn["beta"] - bn["mean"] * scale
    scale = _pad_last(scale.reshape(1, -1), coutp).astype(jnp.float32)
    bias = _pad_last(bias.reshape(1, -1), coutp).astype(jnp.float32)
    return scale, bias


def _prep_w3x3(w_oihw, cinp, coutp, dt):
    """(Cout, Cin, 3, 3) torch layout -> (9, cinp, coutp) tap matrices."""
    cout, cin, _, _ = w_oihw.shape
    w9 = jnp.transpose(w_oihw, (2, 3, 1, 0)).reshape(9, cin, cout)
    w9 = jnp.pad(w9, ((0, 0), (0, cinp - cin), (0, coutp - cout)))
    return w9.astype(dt)


# ---------------------------------------------------------------------------
# Front-end conv (7x7, stride 2): im2col matmul + folded BN + Swish
# ---------------------------------------------------------------------------
def _make_matmul_kernel(approx_swish):
    def kernel(p_ref, w_ref, s_ref, b_ref, o_ref):
        y = jnp.dot(p_ref[...], w_ref[...], preferred_element_type=jnp.float32)
        y = y * s_ref[...] + b_ref[...]                 # folded BatchNorm
        y = _swish_f32(y, approx_swish)
        o_ref[...] = y.astype(o_ref.dtype)
    return kernel


def conv_im2col_bn_swish(x, wmat, scale, bias, *, K, stride, padding,
                         approx_swish):
    """x: (N,H,W,Cin);  wmat: (KCp, Coutp) lane-padded;  scale/bias: (1,Coutp)."""
    N, H, W, Cin = x.shape
    KCp, Coutp = wmat.shape
    Ho = (H + 2 * padding - K) // stride + 1
    Wo = (W + 2 * padding - K) // stride + 1

    xp = jnp.pad(x, ((0, 0), (padding, padding), (padding, padding), (0, 0)))
    taps = [xp[:, di:di + (Ho - 1) * stride + 1:stride,
               dj:dj + (Wo - 1) * stride + 1:stride, :]
            for di in range(K) for dj in range(K)]
    patches = jnp.concatenate(taps, axis=-1).reshape(N * Ho * Wo, K * K * Cin)
    patches = _pad_last(patches, KCp)                   # lane-dense contraction

    M = patches.shape[0]
    TM = 512
    if M < TM:                                          # tiny-problem fallback
        Mp = _ceil_to(M, 8)
        patches = jnp.pad(patches, ((0, Mp - M), (0, 0)))
        TM = Mp
    Mrows = patches.shape[0]
    TN = 256 if Coutp % 256 == 0 else 128

    out = pl.pallas_call(
        _make_matmul_kernel(approx_swish),
        out_shape=jax.ShapeDtypeStruct((Mrows, Coutp), x.dtype),
        grid=(pl.cdiv(Mrows, TM), Coutp // TN),         # ragged tail rows OK
        in_specs=[pl.BlockSpec((TM, KCp), lambda i, j: (i, 0)),
                  pl.BlockSpec((KCp, TN), lambda i, j: (0, j)),
                  pl.BlockSpec((1, TN), lambda i, j: (0, j)),
                  pl.BlockSpec((1, TN), lambda i, j: (0, j))],
        out_specs=pl.BlockSpec((TM, TN), lambda i, j: (i, j)),
        compiler_params=_cparams(("parallel", "parallel")),
    )(patches, wmat, scale, bias)
    return out[:N * Ho * Wo].reshape(N, Ho, Wo, Coutp)


# ---------------------------------------------------------------------------
# 3x3 conv + folded BN (+ residual or fused 1x1-conv residual) + Swish
# ---------------------------------------------------------------------------
def _make_conv3x3_kernel(stride, res_mode, approx_swish, act):
    def kernel(*refs):
        x_ref, w_ref, s_ref, b_ref = refs[:4]
        nxt = 4
        r_ref = rx_ref = rw_ref = rs_ref = rb_ref = None
        if res_mode == "add":
            r_ref = refs[nxt]; nxt += 1
        elif res_mode == "conv":
            rx_ref, rw_ref, rs_ref, rb_ref = refs[nxt:nxt + 4]; nxt += 4
        o_ref = refs[nxt]

        NB, Ho, Wo, TN = o_ref.shape
        Cin = x_ref.shape[-1]
        rows = NB * Ho * Wo

        acc = jnp.zeros((rows, TN), jnp.float32)
        for di in range(3):                             # 9-tap accumulation
            for dj in range(3):
                if stride == 1:
                    patch = x_ref[:, di:di + Ho, dj:dj + Wo, :]
                else:  # stride 2: phase-decomposed input, contiguous reads
                    p = (di % 2) * 2 + (dj % 2)
                    patch = x_ref[:, p,
                                  di // 2:di // 2 + Ho,
                                  dj // 2:dj // 2 + Wo, :]
                acc = acc + jnp.dot(patch.reshape(rows, Cin),
                                    w_ref[di * 3 + dj],
                                    preferred_element_type=jnp.float32)

        y = acc * s_ref[...] + b_ref[...]               # folded BatchNorm
        if res_mode == "add":
            y = y + r_ref[...].reshape(rows, TN).astype(jnp.float32)
        elif res_mode == "conv":                        # fused 1x1 downsample
            idn = jnp.dot(rx_ref[...].reshape(rows, rx_ref.shape[-1]),
                          rw_ref[...], preferred_element_type=jnp.float32)
            y = y + (idn * rs_ref[...] + rb_ref[...])
        if act == "swish":
            y = _swish_f32(y, approx_swish)
        o_ref[...] = y.reshape(NB, Ho, Wo, TN).astype(o_ref.dtype)
    return kernel


def conv3x3_bn_act(x, w9, scale, bias, *, stride=1, act="swish",
                   residual=None, res_conv=None, approx_swish=True):
    """x: (N,H,W,Cinp) lane-padded channels-last.  w9: (9, Cinp, Coutp).

    residual : (N,Ho,Wo,Coutp) added before the final Swish.
    res_conv : dict(x=(N,Ho,Wo,Crx), w=(Crx,Coutp), scale, bias) -> identity
               computed in-kernel (fused 1x1 downsample conv + BN).
    """
    N, H, W, Cin = x.shape
    _, cin_w, Coutp = w9.shape
    assert cin_w == Cin and Coutp % LANE == 0
    Ho = (H + 2 - 3) // stride + 1
    Wo = (W + 2 - 3) // stride + 1
    TN = 256 if Coutp % 256 == 0 else 128
    itemsize = jnp.dtype(x.dtype).itemsize

    xp = jnp.pad(x, ((0, 0), (1, 1), (1, 1), (0, 0)))
    if stride == 1:
        x_in = xp
        xblk = (H + 2, W + 2, Cin)
        x_index = lambda n, j: (n, 0, 0, 0)
    else:
        assert stride == 2
        Hph = (H + 3) // 2
        Wph = (W + 3) // 2
        phases = []
        for a in (0, 1):
            for b in (0, 1):
                ph = xp[:, a::2, b::2, :]
                ph = jnp.pad(ph, ((0, 0), (0, Hph - ph.shape[1]),
                                  (0, Wph - ph.shape[2]), (0, 0)))
                phases.append(ph)
        x_in = jnp.stack(phases, axis=1)                # (N, 4, Hph, Wph, Cin)
        xblk = (4, Hph, Wph, Cin)
        x_index = lambda n, j: (n, 0, 0, 0, 0)

    per_img = (math.prod(xblk) + Ho * Wo * TN) * itemsize
    if residual is not None:
        per_img += Ho * Wo * TN * itemsize
    if res_conv is not None:
        per_img += Ho * Wo * res_conv["x"].shape[-1] * itemsize
    NB = int(max(1, min(N, (4 << 20) // max(per_img, 1))))

    args = [x_in, w9, scale, bias]
    in_specs = [pl.BlockSpec((NB,) + xblk, x_index),
                pl.BlockSpec((9, Cin, TN), lambda n, j: (0, 0, j)),
                pl.BlockSpec((1, TN), lambda n, j: (0, j)),
                pl.BlockSpec((1, TN), lambda n, j: (0, j))]
    res_mode = None
    if residual is not None:
        res_mode = "add"
        args.append(residual)
        in_specs.append(pl.BlockSpec((NB, Ho, Wo, TN), lambda n, j: (n, 0, 0, j)))
    elif res_conv is not None:
        res_mode = "conv"
        crx = res_conv["x"].shape[-1]
        args += [res_conv["x"], res_conv["w"], res_conv["scale"], res_conv["bias"]]
        in_specs += [pl.BlockSpec((NB, Ho, Wo, crx), lambda n, j: (n, 0, 0, 0)),
                     pl.BlockSpec((crx, TN), lambda n, j: (0, j)),
                     pl.BlockSpec((1, TN), lambda n, j: (0, j)),
                     pl.BlockSpec((1, TN), lambda n, j: (0, j))]

    return pl.pallas_call(
        _make_conv3x3_kernel(stride, res_mode, approx_swish, act),
        out_shape=jax.ShapeDtypeStruct((N, Ho, Wo, Coutp), x.dtype),
        grid=(pl.cdiv(N, NB), Coutp // TN),
        in_specs=in_specs,
        out_specs=pl.BlockSpec((NB, Ho, Wo, TN), lambda n, j: (n, 0, 0, j)),
        compiler_params=_cparams(("parallel", "parallel")),
    )(*args)


# ---------------------------------------------------------------------------
# MaxPool2d(3, stride=2, padding=1)  (== MaxPool3d (1,3,3)/(1,2,2)/(0,1,1))
# ---------------------------------------------------------------------------
def maxpool2d_3x3_s2(x):
    N, H, W, C = x.shape
    Ho = (H - 1) // 2 + 1
    Wo = (W - 1) // 2 + 1
    xpad = jnp.pad(x, ((0, 0), (1, 1), (1, 1), (0, 0)),
                   constant_values=-jnp.inf)
    Hph = (H + 3) // 2
    Wph = (W + 3) // 2
    phases = []
    for a in (0, 1):
        for b in (0, 1):
            p = xpad[:, a::2, b::2, :]
            p = jnp.pad(p, ((0, 0), (0, Hph - p.shape[1]),
                            (0, Wph - p.shape[2]), (0, 0)),
                        constant_values=-jnp.inf)
            phases.append(p)
    xph = jnp.stack(phases, axis=1)                     # (N, 4, Hph, Wph, C)

    def kernel(x_ref, o_ref):
        m = jnp.full(o_ref.shape, -jnp.inf, jnp.float32)
        for di in range(3):
            for dj in range(3):
                p = (di % 2) * 2 + (dj % 2)
                m = jnp.maximum(
                    m, x_ref[:, p, di // 2:di // 2 + Ho,
                             dj // 2:dj // 2 + Wo, :].astype(jnp.float32))
        o_ref[...] = m.astype(o_ref.dtype)

    itemsize = jnp.dtype(x.dtype).itemsize
    per_img = (4 * Hph * Wph * C + Ho * Wo * C) * itemsize
    NB = int(max(1, min(N, (4 << 20) // max(per_img, 1))))
    return pl.pallas_call(
        kernel,
        out_shape=jax.ShapeDtypeStruct((N, Ho, Wo, C), x.dtype),
        grid=(pl.cdiv(N, NB),),
        in_specs=[pl.BlockSpec((NB, 4, Hph, Wph, C), lambda n: (n, 0, 0, 0, 0))],
        out_specs=pl.BlockSpec((NB, Ho, Wo, C), lambda n: (n, 0, 0, 0)),
        compiler_params=_cparams(("parallel",)),
    )(xph)


# ---------------------------------------------------------------------------
# AdaptiveAvgPool2d((1,1))  (global average over H, W)
# ---------------------------------------------------------------------------
def global_avg_pool(x):
    N, H, W, C = x.shape
    inv = 1.0 / (H * W)

    def kernel(x_ref, o_ref):
        s = jnp.sum(x_ref[...].astype(jnp.float32), axis=(1, 2), keepdims=True)
        o_ref[...] = (s * inv).astype(o_ref.dtype)

    itemsize = jnp.dtype(x.dtype).itemsize
    per_img = H * W * C * itemsize + C * 4
    NB = int(max(1, min(N, (4 << 20) // max(per_img, 1))))
    out = pl.pallas_call(
        kernel,
        out_shape=jax.ShapeDtypeStruct((N, 1, 1, C), jnp.float32),
        grid=(pl.cdiv(N, NB),),
        in_specs=[pl.BlockSpec((NB, H, W, C), lambda n: (n, 0, 0, 0))],
        out_specs=pl.BlockSpec((NB, 1, 1, C), lambda n: (n, 0, 0, 0)),
        compiler_params=_cparams(("parallel",)),
    )(x)
    return out.reshape(N, C)


# ---------------------------------------------------------------------------
# ResNet3D forward (Pallas path)
# ---------------------------------------------------------------------------
def resnet3d_forward(x, params, storage_dtype=jnp.bfloat16):
    """x: (B, length, C, H, W) -> (B, length, code_size)."""
    B, T, C, H, W = x.shape
    ws = params["window_size"]
    pt = ws // 2
    approx_swish = storage_dtype != jnp.float32

    # ---- front_end: Conv3d folded to a 2-D conv via temporal window stacking
    xt = jnp.pad(x, ((0, 0), (pt, pt), (0, 0), (0, 0), (0, 0)))
    xstack = jnp.concatenate([xt[:, dt:dt + T] for dt in range(ws)], axis=2)
    xf = jnp.transpose(xstack.reshape(B * T, ws * C, H, W), (0, 2, 3, 1))
    xf = xf.astype(storage_dtype)

    w3 = params["front"]["w"]                            # (F0, C, ws, 7, 7)
    F0 = w3.shape[0]
    F0p = _ceil_to(F0, LANE)
    K = 7
    w2d = jnp.transpose(w3, (0, 2, 1, 3, 4)).reshape(F0, ws * C, K, K)
    wmat = jnp.transpose(w2d, (2, 3, 1, 0)).reshape(K * K * ws * C, F0)
    KCp = _ceil_to(wmat.shape[0], LANE)
    wmat = jnp.pad(wmat, ((0, KCp - wmat.shape[0]),
                          (0, F0p - F0))).astype(storage_dtype)
    sf, bf = _prep_bn(params["front"]["bn"], F0p)
    h = conv_im2col_bn_swish(xf, wmat, sf, bf, K=K, stride=2, padding=3,
                             approx_swish=approx_swish)
    h = maxpool2d_3x3_s2(h)

    # ---- ResNet blocks (lane-padded NHWC activations throughout)
    for layer in params["layers"]:
        for blk in layer:
            stride = blk["stride"]
            cout, cin = blk["w1"].shape[0], blk["w1"].shape[1]
            cinp = h.shape[-1]
            coutp = _ceil_to(cout, LANE)
            w1 = _prep_w3x3(blk["w1"], cinp, coutp, storage_dtype)
            w2 = _prep_w3x3(blk["w2"], coutp, coutp, storage_dtype)
            s1, b1 = _prep_bn(blk["bn1"], coutp)
            s2, b2 = _prep_bn(blk["bn2"], coutp)

            mid = conv3x3_bn_act(h, w1, s1, b1, stride=stride,
                                 approx_swish=approx_swish)
            if blk["down"] is not None:
                wd = blk["down"]["w"][:, :, 0, 0].T      # (cin, cout)
                wd = jnp.pad(wd, ((0, cinp - cin),
                                  (0, coutp - cout))).astype(storage_dtype)
                sd, bd = _prep_bn(blk["down"]["bn"], coutp)
                x_ds = h[:, ::stride, ::stride, :] if stride > 1 else h
                h = conv3x3_bn_act(mid, w2, s2, b2, stride=1,
                                   res_conv=dict(x=x_ds, w=wd, scale=sd, bias=bd),
                                   approx_swish=approx_swish)
            else:
                h = conv3x3_bn_act(mid, w2, s2, b2, stride=1, residual=h,
                                   approx_swish=approx_swish)

    # ---- AdaptiveAvgPool2d((1,1)) + view(-1, length, code_size)
    code = global_avg_pool(h)[:, :params["code_size"]]
    return code.reshape(B, T, params["code_size"]).astype(jnp.float32)


# ---------------------------------------------------------------------------
# Pure-JAX (XLA) reference
# ---------------------------------------------------------------------------
def _bn_ref(x, bn, axis=1):
    shp = [1] * x.ndim
    shp[axis] = -1
    return ((x - bn["mean"].reshape(shp))
            / jnp.sqrt(bn["var"].reshape(shp) + bn["eps"])
            * bn["gamma"].reshape(shp) + bn["beta"].reshape(shp))


def _swish(x):
    return x * jax.nn.sigmoid(x)


def _conv2d_ref(x, w, stride, padding):
    return lax.conv_general_dilated(
        x, w, (stride, stride), [(padding, padding)] * 2,
        dimension_numbers=("NCHW", "OIHW", "NCHW"))


def resnet3d_ref(x, params):
    B, T, C, H, W = x.shape
    ws = params["window_size"]
    h = jnp.transpose(x, (0, 2, 1, 3, 4))                # (B, C, T, H, W)
    h = lax.conv_general_dilated(
        h, params["front"]["w"], (1, 2, 2),
        [(ws // 2, ws // 2), (3, 3), (3, 3)],
        dimension_numbers=("NCDHW", "OIDHW", "NCDHW"))
    h = _swish(_bn_ref(h, params["front"]["bn"], axis=1))
    h = lax.reduce_window(h, -jnp.inf, lax.max, (1, 1, 1, 3, 3), (1, 1, 1, 2, 2),
                          [(0, 0), (0, 0), (0, 0), (1, 1), (1, 1)])
    F0 = params["front"]["w"].shape[0]
    h = jnp.transpose(h, (0, 2, 1, 3, 4)).reshape(B * T, F0, h.shape[3], h.shape[4])
    for layer in params["layers"]:
        for blk in layer:
            identity = h
            out = _swish(_bn_ref(_conv2d_ref(h, blk["w1"], blk["stride"], 1),
                                 blk["bn1"]))
            out = _bn_ref(_conv2d_ref(out, blk["w2"], 1, 1), blk["bn2"])
            if blk["down"] is not None:
                identity = _bn_ref(
                    _conv2d_ref(h, blk["down"]["w"], blk["stride"], 0),
                    blk["down"]["bn"])
            h = _swish(out + identity)
    code = jnp.mean(h, axis=(2, 3))                      # AdaptiveAvgPool2d
    return code.reshape(B, T, -1)


# ---------------------------------------------------------------------------
# Parameter construction mirroring ResNet3D.__init__ / _make_layer
# ---------------------------------------------------------------------------
def _make_bn(key, c):
    k1, k2, k3, k4 = jax.random.split(key, 4)
    return dict(
        gamma=jax.random.uniform(k1, (c,), jnp.float32, 0.5, 1.5),
        beta=0.1 * jax.random.normal(k2, (c,), jnp.float32),
        mean=0.1 * jax.random.normal(k3, (c,), jnp.float32),
        var=jax.random.uniform(k4, (c,), jnp.float32, 0.5, 1.5),
        eps=1e-5,
    )


def _conv_w(key, cout, cin, k):
    return (jax.random.normal(key, (cout, cin, k, k), jnp.float32)
            * (2.0 / (cin * k * k)) ** 0.5)


def build_params(key, *, code_size, layers, channels, feature_maps, window_size):
    layers = list(layers) + [2]                          # layers += [2]
    feature_maps = list(feature_maps) + [code_size]      # feature_maps += [code_size]
    keys = iter(jax.random.split(key, 128))

    f0 = feature_maps[0]
    fan_in = channels * window_size * 7 * 7
    front = dict(
        w=jax.random.normal(next(keys), (f0, channels, window_size, 7, 7),
                            jnp.float32) * (2.0 / fan_in) ** 0.5,
        bn=_make_bn(next(keys), f0),
    )

    inplanes = f0
    layer_params = []
    for i, nblocks in enumerate(layers):
        layer_stride = 1 if i == 0 else 2
        planes = feature_maps[i]
        blocks = []
        for b in range(nblocks):
            stride = layer_stride if b == 0 else 1
            down = None
            if b == 0 and (stride != 1 or inplanes != planes):
                down = dict(w=_conv_w(next(keys), planes, inplanes, 1),
                            bn=_make_bn(next(keys), planes))
            blocks.append(dict(
                w1=_conv_w(next(keys), planes, inplanes, 3),
                bn1=_make_bn(next(keys), planes),
                w2=_conv_w(next(keys), planes, planes, 3),
                bn2=_make_bn(next(keys), planes),
                down=down, stride=stride))
            inplanes = planes
        layer_params.append(blocks)
    return dict(front=front, layers=layer_params, window_size=window_size,
                code_size=code_size)


if __name__ == "__main__":
    key = jax.random.PRNGKey(0)
    kp, kx = jax.random.split(key)

    # Small ResNet3D: code_size=8, layers=[1,1], channels=3, feature_maps=[8,16],
    # window_size=3; input video (B=2, length=4, 3, 32, 32).
    B, T, C, H, W = 2, 4, 3, 32, 32
    code_size = 8
    params = build_params(kp, code_size=code_size, layers=[1, 1], channels=C,
                          feature_maps=[8, 16], window_size=3)
    x = jax.random.normal(kx, (B, T, C, H, W), jnp.float32)

    ref = resnet3d_ref(x, params)

    # f32-storage path: tight numerical verification against the XLA reference.
    out32 = jax.block_until_ready(
        resnet3d_forward(x, params, storage_dtype=jnp.float32))
    assert out32.shape == (B, T, code_size), out32.shape
    err32 = float(jnp.max(jnp.abs(out32 - ref)))
    assert err32 < 2e-3, f"f32 max abs err {err32}"

    # bf16-storage path (production default): looser tolerance for bf16 HBM
    # storage + approx-reciprocal Swish, per the performance review.
    out16 = jax.block_until_ready(
        resnet3d_forward(x, params, storage_dtype=jnp.bfloat16))
    assert out16.shape == (B, T, code_size), out16.shape
    scale = float(jnp.max(jnp.abs(ref)))
    err16 = float(jnp.max(jnp.abs(out16 - ref)))
    assert err16 < 7e-2 * max(1.0, scale), \
        f"bf16 max abs err {err16} (ref scale {scale})"

    print("KERNEL_OK")
</pallas_src>

<mosaic_0001>
module attributes {stable_mosaic.version = 11 : i64} {
  func.func @kernel(%arg0: i32, %arg1: i32, %arg2: memref<512x512xf32, #tpu.memory_space<vmem>>, %arg3: memref<512x128xf32, #tpu.memory_space<vmem>>, %arg4: memref<1x128xf32, #tpu.memory_space<vmem>>, %arg5: memref<1x128xf32, #tpu.memory_space<vmem>>, %arg6: memref<512x128xf32, #tpu.memory_space<vmem>>) attributes {dimension_semantics = [#tpu.dimension_semantics<parallel>, #tpu.dimension_semantics<parallel>], iteration_bounds = array<i64: 4, 1>, scalar_prefetch = 0 : i64, scratch_operands = 0 : i64, tpu.core_type = #tpu.core_type<tc>, window_params = [{transform_indices = @transform_0, window_bounds = array<i64: 512, 512>}, {transform_indices = @transform_1, window_bounds = array<i64: 512, 128>}, {transform_indices = @transform_2, window_bounds = array<i64: 1, 128>}, {transform_indices = @transform_3, window_bounds = array<i64: 1, 128>}, {transform_indices = @transform_4, window_bounds = array<i64: 512, 128>}]} {
    %c0 = arith.constant 0 : index
    %c0_0 = arith.constant 0 : index
    %0 = vector.load %arg2[%c0, %c0_0] : memref<512x512xf32, #tpu.memory_space<vmem>>, vector<512x512xf32>
    %c0_1 = arith.constant 0 : index
    %c0_2 = arith.constant 0 : index
    %1 = vector.load %arg3[%c0_1, %c0_2] : memref<512x128xf32, #tpu.memory_space<vmem>>, vector<512x128xf32>
    %cst = arith.constant dense<0.000000e+00> : vector<512x128xf32>
    %2 = tpu.matmul %0, %1, %cst {dimension_numbers = #tpu.dot_dimension_numbers<[1], [0], [0], [1], [0, 0, 1, 1], [], []>} : vector<512x512xf32>, vector<512x128xf32>, vector<512x128xf32> -> vector<512x128xf32>
    %c0_3 = arith.constant 0 : index
    %c0_4 = arith.constant 0 : index
    %3 = vector.load %arg4[%c0_3, %c0_4] : memref<1x128xf32, #tpu.memory_space<vmem>>, vector<1x128xf32>
    %4 = vector.broadcast %3 : vector<1x128xf32> to vector<512x128xf32>
    %5 = arith.mulf %2, %4 : vector<512x128xf32>
    %c0_5 = arith.constant 0 : index
    %c0_6 = arith.constant 0 : index
    %6 = vector.load %arg5[%c0_5, %c0_6] : memref<1x128xf32, #tpu.memory_space<vmem>>, vector<1x128xf32>
    %7 = vector.broadcast %6 : vector<1x128xf32> to vector<512x128xf32>
    %8 = arith.addf %5, %7 : vector<512x128xf32>
    %cst_7 = arith.constant 0.000000e+00 : f32
    %9 = vector.broadcast %cst_7 : f32 to vector<512x128xf32>
    %10 = arith.subf %9, %8 : vector<512x128xf32>
    %11 = math.exp %10 : vector<512x128xf32>
    %cst_8 = arith.constant 1.000000e+00 : f32
    %12 = vector.broadcast %cst_8 : f32 to vector<512x128xf32>
    %13 = arith.addf %12, %11 : vector<512x128xf32>
    %14 = arith.divf %8, %13 : vector<512x128xf32>
    %c0_9 = arith.constant 0 : index
    %c0_10 = arith.constant 0 : index
    %15 = vector.load %arg6[%c0_9, %c0_10] : memref<512x128xf32, #tpu.memory_space<vmem>>, vector<512x128xf32>
    tpu.vector_store %arg6[%c0_9, %c0_10], %14 {strides = array<i32>} : memref<512x128xf32, #tpu.memory_space<vmem>>, vector<512x128xf32>,
    return
  }
  func.func @transform_0(%arg0: i32, %arg1: i32) -> (i32, i32) {
    %c0_i32 = arith.constant 0 : i32
    %c0_i32_0 = arith.constant 0 : i32
    return %arg0, %c0_i32 : i32, i32
  }
  func.func @transform_1(%arg0: i32, %arg1: i32) -> (i32, i32) {
    %c0_i32 = arith.constant 0 : i32
    %c0_i32_0 = arith.constant 0 : i32
    return %c0_i32, %arg1 : i32, i32
  }
  func.func @transform_2(%arg0: i32, %arg1: i32) -> (i32, i32) {
    %c0_i32 = arith.constant 0 : i32
    %c0_i32_0 = arith.constant 0 : i32
    return %c0_i32, %arg1 : i32, i32
  }
  func.func @transform_3(%arg0: i32, %arg1: i32) -> (i32, i32) {
    %c0_i32 = arith.constant 0 : i32
    %c0_i32_0 = arith.constant 0 : i32
    return %c0_i32, %arg1 : i32, i32
  }
  func.func @transform_4(%arg0: i32, %arg1: i32) -> (i32, i32) {
    %c0_i32 = arith.constant 0 : i32
    return %arg0, %arg1 : i32, i32
  }
}

</mosaic_0001>

<bundles_post_ra>
// kernel: tpu_custom_call.1
= control target key start
LH: loop header
LB: loop body
LE: loop exit
PB: predicated region body
PF: predicated region fallthrough
CT: control target
= control target key end

     0   :  { %s4990_s0 = inlined_call_operand.hbm [shape: f32[2048,512], index: 0, kind: input, shape index: {}]   ;;  %s4991_s1 = inlined_call_operand.hbm [shape: f32[512,128], index: 1, kind: input, shape index: {}]   ;;  %s4992_s2 = inlined_call_operand.hbm [shape: f32[1,128], index: 2, kind: input, shape index: {}]   ;;  %s4993_s3 = inlined_call_operand.hbm [shape: f32[1,128], index: 3, kind: input, shape index: {}]   ;;  %s4994_s4 = inlined_call_operand.hbm [shape: f32[2048,128], index: 4, kind: output, shape index: {}]  }
   0x1   :  { %4995 = sst [smem:[#allocation15_spill]] %s4991_s1 }
   0x2   :  { %4996 = sst [smem:[#allocation16_spill]] %s4992_s2 }
   0x3   :  { %9 = vsyncpa [#allocation3], 0 }
   0x4   :  { %11 = vsyncpa [#allocation3 + $0x1], 0 }
   0x5   :  { %12 = vsyncpa [#allocation6], 0 }
   0x6   :  { %13 = vsyncpa [#allocation9], 0 }
   0x7   :  { %14 = vsyncpa [#allocation4], 0 }
   0x8   :  { %16 = vsyncpa [#allocation4 + $0x1], 0  ;;  %s3641_s15 = smov 0   ;;  %s3643_s16 = smov 0  }
   0x9   :  { %s3645_s17 = smov 0   ;;  %s3647_s18 = smov 0  }
   0xa   :  { %s3649_s19 = smov 0   ;;  %s3651_s20 = smov 0  }
   0xb LB: > { %s3005_s21 = sadd.s32 4294967295, %s3605_s20   ;;  %s3006_s22 = sadd.s32 4294967294, %s3605_s20   ;;  %s3605_s20 = sphi %s3651_s20, %s22_s20   ;;  %s3601_s19 = sphi %s3649_s19, %s5013_s19   ;;  %s3597_s18 = sphi %s3647_s18, %s5012_s18   ;;  %s3593_s17 = sphi %s3645_s17, %s5011_s17   ;;  %s3589_s16 = sphi %s3643_s16, %s5010_s16   ;;  %s3585_s15 = sphi %s3641_s15, %s5009_s15  }
   0xc   : > { %p54_p0 = scmp.ne.s32.totalorder %s3589_s16, %s3585_s15  ;;  %p3675_p1 = scmp.eq.s32.totalorder %s3005_s21, 0 }
   0xd   : > { %p3679_p2 = scmp.eq.s32.totalorder %s3005_s21, 3  ;;  %p164_p3 = scmp.eq.s32.totalorder %s3006_s22, 3 }
   0xe   : > { %p3685_p4 = por %p3675_p1, %p54_p0  ;;  %p3007_p5 = scmp.ge.s32.totalorder %s3605_s20, 1 }
   0xf   : > { %p3690_p6 = por %p164_p3, %p54_p0  ;;  %p171_p7 = scmp.lt.s32.totalorder %s3605_s20, 5 }
  0x10   : > { %s5001_s1 = sld [smem:[#allocation15_spill]]  ;;  %s3607_s5 = smov [#allocation5]  }
  0x11   : > { %p3698_p8 = pnand %p3007_p5, %p171_p7  ;;  %s186_s6 = sshll.u32 %s3607_s5, 4  ;;  %s187_s6 = int_to_ptr.vmem [resolvable:$true] %s186_s6 }
  0x12   : > { %s5004_s2 = sld [smem:[#allocation16_spill]]  ;;  %s3608_s11 = smov 128  }
  0x13   : > { %p3046_p9 = pneg %p3698_p8  ;;  %s3609_s12 = smov 8  }
  0x14   : > { %s3610_s13 = smov [#allocation7]   ;;  %s213_s27 = sshll.u32 %s4993_s3, 4  ;;  %s214_s27 = int_to_ptr.hbm [resolvable:$true] %s213_s27 }
  0x15   : > { %p3706_p10 = pnand %p3046_p9, %p3675_p1  ;;  %s202_s14 = sshll.u32 %s3610_s13, 4  ;;  %s203_s14 = int_to_ptr.vmem [resolvable:$true] %s202_s14 }
  0x16   : > { %s184_s29 = sshll.u32 %s5001_s1, 4  ;;  %s3611_s28 = smov [#allocation8]   ;;  %s185_s29 = int_to_ptr.hbm [resolvable:$true] %s184_s29 }
  0x17   : > { %3049 = dma.hbm_to_vmem [thread:$0]  (!%p3706_p10), %s185_s29, 8192, %s187_s6, [#allocation6], %s3608_s11, %s3608_s11, %s3609_s12  }
  0x18   : > { %s200_s10 = sshll.u32 %s5004_s2, 4  ;;  %s215_s5 = sshll.u32 %s3611_s28, 4  ;;  %s201_s10 = int_to_ptr.hbm [resolvable:$true] %s200_s10  ;;  %s216_s5 = int_to_ptr.vmem [resolvable:$true] %s215_s5 }
  0x19   : > { %3052 = dma.hbm_to_vmem [thread:$0]  (!%p3706_p10), %s201_s10, 16, %s203_s14, [#allocation6]  }
  0x1a   : > { %3055 = dma.hbm_to_vmem [thread:$0]  (!%p3706_p10), %s214_s27, 16, %s216_s5, [#allocation9]  }
  0x1b   : > { %s34_s29 = sadd.s32 1, %s3601_s19  ;;  %s41_s6 = sadd.s32 1, %s3593_s17 }
  0x1c   : > { %p36_p11 = scmp.ge.s32.totalorder %s34_s29, 4  ;;  %p48_p12 = scmp.ne.s32.totalorder %s3593_s17, %s3589_s16 }
  0x1d   : > { %p49_p13 = scmp.eq.s32.totalorder %s3605_s20, 0  ;;  %p3067_p5 = scmp.lt.s32.totalorder %s3605_s20, 4 }
  0x1e   : > { %s5015_s29 = smov (%p36_p11, %s34_s29), 0  ;;  %p3735_p3 = por %p3679_p2, %p48_p12 }
  0x1f   : > { %p3729_p0 = por %p49_p13, %p48_p12  ;;  %s38_s7 = ssub.s32 %s3601_s19, %s5015_s29 }
  0x20   : > { %p39_p7 = scmp.eq.s32.totalorder %s38_s7, 0  ;;  %s226_s10 = sand.u32 1, %s3593_s17  }
  0x21   : > { %s3012_s11 = sshll.u32 %s226_s10, 11  ;;  %s3028_s13 = sshll.u32 %s3601_s19, 11 }
  0x22   : > { %s3744_s12 = scalar_select %p39_p7, %s3593_s17, %s41_s6  }
  0x23   : > { %s236_s22 = scalar_lea.hbm %s4990_s0, %s3028_s13  ;;  %s230_s27 = scalar_lea.vmem [#allocation2], %s3012_s11 }
  0x24   : > { %s239_s28 = sshll.u32 %s230_s27, 4  ;;  %s237_s24 = sshll.u32 %s236_s22, 4  ;;  %s240_s28 = int_to_ptr.vmem [resolvable:$true] %s239_s28  ;;  %s238_s24 = int_to_ptr.hbm [resolvable:$true] %s237_s24 }
  0x25   : > { %p3057_p2 = pnand %p3067_p5, %p3729_p0  ;;  %s227_s5 = scalar_lea.sflag [#allocation3], %s226_s10 }
  0x26   : > { %s3612_s1 = smov 512   ;;  %s3613_s2 = smov 32  }
  0x27   : > { %3059 = dma.hbm_to_vmem [thread:$0]  (!%p3057_p2), %s238_s24, 32768, %s240_s28, %s227_s5, %s3612_s1, %s3612_s1, %s3613_s2  }
  0x28   : > { %251 = sbr.rel (%p3698_p8) target bundleno = 763 (0x2fb), region = 36  ;;  %s3755_s6 = sand.u32 (!%p3698_p8), 1, %s3589_s16  }
  0x29   : > { %s3017_s7 = sshll.u32 (!%p3698_p8), %s3755_s6, 11  ;;  %s254_s11 = scalar_lea.sflag (!%p3698_p8), [#allocation3], %s3755_s6 }
  0x2a   : > { %s3759_s13 = scalar_lea.vmem (!%p3698_p8), [#allocation2], %s3017_s7 }
  0x2d   : > { %3568 = dma.done.wait (%p3685_p4), %s254_s11, 32768  }
  0x2e   : > { %3570 = vsyncadd (%p3685_p4), %s254_s11, 4294934528 }
  0x2f   : > { %3572 = dma.done.wait (%p3675_p1), [#allocation6], 8208  }
  0x30   : > { %3574 = vsyncadd (%p3675_p1), [#allocation6], 4294959088 }
  0x31   : > { %3576 = dma.done.wait (%p3675_p1), [#allocation9], 16  }
  0x32   : > { %3578 = vsyncadd (%p3675_p1), [#allocation9], 4294967280  ;;  %v603_v0 = vld [vmem:[#allocation5 + $0x178] sm:$0xff]  ;;  %v602_v1 = vld [vmem:[#allocation5 + $0x170] sm:$0xff]  ;;  %s3021_s1 = sshll.u32 %s3755_s6, 9  ;;  %s3029_s23 = sshll.u32 %s3597_s18, 9 }
  0x33   : > { %v619_v2 = vld [vmem:[#allocation5 + $0x1f8] sm:$0xff]  ;;  %1038 = vmatpush.msra.mxu2 %v603_v0  ;;  %v601_v5 = vld [vmem:[#allocation5 + $0x168] sm:$0xff]  ;;  %v618_v6 = vld [vmem:[#allocation5 + $0x1f0] sm:$0xff]  ;;  %s3903_s2 = scalar_lea.vmem [#allocation10], %s3021_s1  ;;  %s2885_s8 = scalar_lea.hbm %s4994_s4, %s3029_s23 }
  0x34   : > { %1247 = vmatpush.msra.mxu3 %v619_v2  ;;  %v571_v3 = vld [vmem:[#allocation5 + $0x78] sm:$0xff]  ;;  %v570_v7 = vld [vmem:[#allocation5 + $0x70] sm:$0xff]  ;;  %v617_v9 = vld [vmem:[#allocation5 + $0x1e8] sm:$0xff]  ;;  %s2886_s18 = sshll.u32 %s3903_s2, 4  ;;  %s2888_s10 = sshll.u32 %s2885_s8, 4  ;;  %s2887_s18 = int_to_ptr.vmem [resolvable:$true] %s2886_s18  ;;  %s2889_s10 = int_to_ptr.hbm [resolvable:$true] %s2888_s10 }
  0x35   : > { %v587_v4 = vld [vmem:[#allocation5 + $0xf8] sm:$0xff]  ;;  %620 = vmatpush.msra.mxu0 %v571_v3  ;;  %v586_v8 = vld [vmem:[#allocation5 + $0xf0] sm:$0xff]  ;;  %1039 = vmatpush.msra.mxu2 %v602_v1  ;;  %v569_v10 = vld [vmem:[#allocation5 + $0x68] sm:$0xff]  ;;  %s2873_s14 = scalar_lea.sflag [#allocation4], %s3755_s6  ;;  %s3529_s21 = sshra.s32 %s2889_s10, 4  ;;  %s3530_s21 = int_to_ptr.hbm [resolvable:$true] %s3529_s21 }
  0x36   : > { %829 = vmatpush.msra.mxu1 %v587_v4  ;;  %1248 = vmatpush.msra.mxu3 %v618_v6  ;;  %v600_v11 = vld [vmem:[#allocation5 + $0x160] sm:$0xff]  ;;  %v585_v12 = vld [vmem:[#allocation5 + $0xe8] sm:$0xff]  ;;  %v599_v16 = vld [vmem:[#allocation5 + $0x158] sm:$0xff]  ;;  %s3531_s22 = scalar_lea.hbm %s3530_s21, 512  ;;  %s3535_s24 = scalar_lea.hbm %s4994_s4, 2048 }
  0x37   : > { %621 = vmatpush.msra.mxu0 %v570_v7  ;;  %v616_v13 = vld [vmem:[#allocation5 + $0x1e0] sm:$0xff]  ;;  %1040 = vmatpush.msra.mxu2 %v601_v5  ;;  %v615_v17 = vld [vmem:[#allocation5 + $0x1d8] sm:$0xff]  ;;  %v598_v20 = vld [vmem:[#allocation5 + $0x150] sm:$0xff]  ;;  %p3532_p1 = scmp.ne.s32.totalorder %s3530_s21, %s3531_s22  ;;  %p3536_p9 = scmp.lt.s32.totalorder %s3530_s21, %s4994_s4 }
  0x38   : > { %830 = vmatpush.msra.mxu1 %v586_v8  ;;  %1249 = vmatpush.msra.mxu3 %v617_v9  ;;  %v568_v14 = vld [vmem:[#allocation5 + $0x60] sm:$0xff]  ;;  %v567_v18 = vld [vmem:[#allocation5 + $0x58] sm:$0xff]  ;;  %v614_v21 = vld [vmem:[#allocation5 + $0x1d0] sm:$0xff]  ;;  %p3537_p10 = scmp.lt.s32.totalorder %s3535_s24, %s3531_s22 }
  0x39   : > { %v584_v15 = vld [vmem:[#allocation5 + $0xe0] sm:$0xff]  ;;  %622 = vmatpush.msra.mxu0 %v569_v10  ;;  %1041 = vmatpush.msra.mxu2 %v600_v11  ;;  %v583_v19 = vld [vmem:[#allocation5 + $0xd8] sm:$0xff]  ;;  %v566_v22 = vld [vmem:[#allocation5 + $0x50] sm:$0xff]  ;;  %p3533_p4 = pnand %p3532_p1, %p3735_p3 }
  0x3a   : > { %831 = vmatpush.msra.mxu1 %v585_v12  ;;  %1250 = vmatpush.msra.mxu3 %v616_v13  ;;  %v582_v23 = vld [vmem:[#allocation5 + $0xd0] sm:$0xff]  ;;  %v597_v24 = vld [vmem:[#allocation5 + $0x148] sm:$0xff]  ;;  %v596_v28 = vld [vmem:[#allocation5 + $0x140] sm:$0xff]  ;;  %p3538_p11 = por %p3537_p10, %p3536_p9 }
  0x3b   : > { %623 = vmatpush.msra.mxu0 %v568_v14  ;;  %1042 = vmatpush.msra.mxu2 %v599_v16  ;;  %v613_v25 = vld [vmem:[#allocation5 + $0x1c8] sm:$0xff]  ;;  %v612_v29 = vld [vmem:[#allocation5 + $0x1c0] sm:$0xff]  ;;  %v595_v32 = vld [vmem:[#allocation5 + $0x138] sm:$0xff]  ;;  %p3534_p8 = pneg %p3533_p4 }
  0x3c   : > { %832 = vmatpush.msra.mxu1 %v584_v15  ;;  %1251 = vmatpush.msra.mxu3 %v615_v17  ;;  %v565_v26 = vld [vmem:[#allocation5 + $0x48] sm:$0xff]  ;;  %v564_v30 = vld [vmem:[#allocation5 + $0x40] sm:$0xff]  ;;  %v611_v33 = vld [vmem:[#allocation5 + $0x1b8] sm:$0xff] }
  0x3d   : > { %624 = vmatpush.msra.mxu0 %v567_v18  ;;  %1043 = vmatpush.msra.mxu2 %v598_v20  ;;  %v581_v27 = vld [vmem:[#allocation5 + $0xc8] sm:$0xff]  ;;  %v580_v31 = vld [vmem:[#allocation5 + $0xc0] sm:$0xff]  ;;  %v563_v34 = vld [vmem:[#allocation5 + $0x38] sm:$0xff]  ;;  %p3539_p12 = pnand %p3538_p11, %p3534_p8 }
  0x3e   : > { %833 = vmatpush.msra.mxu1 %v583_v19  ;;  %1252 = vmatpush.msra.mxu3 %v614_v21  ;;  %v579_v35 = vld [vmem:[#allocation5 + $0xb8] sm:$0xff]  ;;  %v594_v36 = vld [vmem:[#allocation5 + $0x130] sm:$0xff]  ;;  %v593_v40 = vld [vmem:[#allocation5 + $0x128] sm:$0xff] }
  0x3f   : > { %625 = vmatpush.msra.mxu0 %v566_v22  ;;  %1044 = vmatpush.msra.mxu2 %v597_v24  ;;  %v610_v37 = vld [vmem:[#allocation5 + $0x1b0] sm:$0xff]  ;;  %v609_v41 = vld [vmem:[#allocation5 + $0x1a8] sm:$0xff]  ;;  %v592_v44 = vld [vmem:[#allocation5 + $0x120] sm:$0xff] }
  0x40   : > { %834 = vmatpush.msra.mxu1 %v582_v23  ;;  %1253 = vmatpush.msra.mxu3 %v613_v25  ;;  %v562_v38 = vld [vmem:[#allocation5 + $0x30] sm:$0xff]  ;;  %v561_v42 = vld [vmem:[#allocation5 + $0x28] sm:$0xff]  ;;  %v608_v45 = vld [vmem:[#allocation5 + $0x1a0] sm:$0xff] }
  0x41   : > { %626 = vmatpush.msra.mxu0 %v565_v26  ;;  %1045 = vmatpush.msra.mxu2 %v596_v28  ;;  %v578_v39 = vld [vmem:[#allocation5 + $0xb0] sm:$0xff]  ;;  %v577_v43 = vld [vmem:[#allocation5 + $0xa8] sm:$0xff]  ;;  %v560_v46 = vld [vmem:[#allocation5 + $0x20] sm:$0xff] }
  0x42   : > { %835 = vmatpush.msra.mxu1 %v581_v27  ;;  %1254 = vmatpush.msra.mxu3 %v612_v29  ;;  %v576_v47 = vld [vmem:[#allocation5 + $0xa0] sm:$0xff]  ;;  %v591_v48 = vld [vmem:[#allocation5 + $0x118] sm:$0xff]  ;;  %v590_v52 = vld [vmem:[#allocation5 + $0x110] sm:$0xff] }
  0x43   : > { %627 = vmatpush.msra.mxu0 %v564_v30  ;;  %1046 = vmatpush.msra.mxu2 %v595_v32  ;;  %v607_v49 = vld [vmem:[#allocation5 + $0x198] sm:$0xff]  ;;  %v606_v53 = vld [vmem:[#allocation5 + $0x190] sm:$0xff]  ;;  %v589_v56 = vld [vmem:[#allocation5 + $0x108] sm:$0xff] }
  0x44   : > { %836 = vmatpush.msra.mxu1 %v580_v31  ;;  %1255 = vmatpush.msra.mxu3 %v611_v33  ;;  %v559_v50 = vld [vmem:[#allocation5 + $0x18] sm:$0xff]  ;;  %v558_v54 = vld [vmem:[#allocation5 + $0x10] sm:$0xff]  ;;  %v605_v57 = vld [vmem:[#allocation5 + $0x188] sm:$0xff] }
  0x45   : > { %628 = vmatpush.msra.mxu0 %v563_v34  ;;  %1047 = vmatpush.msra.mxu2 %v594_v36  ;;  %v575_v51 = vld [vmem:[#allocation5 + $0x98] sm:$0xff]  ;;  %v574_v55 = vld [vmem:[#allocation5 + $0x90] sm:$0xff]  ;;  %v557_v58 = vld [vmem:[#allocation5 + $0x8] sm:$0xff] }
  0x46   : > { %837 = vmatpush.msra.mxu1 %v579_v35  ;;  %1256 = vmatpush.msra.mxu3 %v610_v37  ;;  %v573_v59 = vld [vmem:[#allocation5 + $0x88] sm:$0xff]  ;;  %v588_v60 = vld [vmem:[#allocation5 + $0x100] sm:$0xff]  ;;  %v302_v62 = vld [vmem:[%s3759_s13 + $0x10] sm:$0xff] }
  0x47   : > { %629 = vmatpush.msra.mxu0 %v562_v38  ;;  %1048 = vmatpush.msra.mxu2 %v593_v40  ;;  %v604_v61 = vld [vmem:[#allocation5 + $0x180] sm:$0xff]  ;;  %v303_v63 = vld [vmem:[%s3759_s13 + $0x18] sm:$0xff]  ;;  %v301_v3 = vld [vmem:[%s3759_s13 + $0x8] sm:$0xff] }
  0x48   : > { %838 = vmatpush.msra.mxu1 %v578_v39  ;;  %1257 = vmatpush.msra.mxu3 %v609_v41  ;;  %v556_v0 = vld [vmem:[#allocation5] sm:$0xff]  ;;  %v306_v4 = vld [vmem:[%s3759_s13 + $0x30] sm:$0xff]  ;;  %v307_v5 = vld [vmem:[%s3759_s13 + $0x38] sm:$0xff] }
  0x49   : > { %630 = vmatpush.msra.mxu0 %v561_v42  ;;  %1049 = vmatpush.msra.mxu2 %v592_v44  ;;  %v572_v1 = vld [vmem:[#allocation5 + $0x80] sm:$0xff]  ;;  %v305_v7 = vld [vmem:[%s3759_s13 + $0x28] sm:$0xff]  ;;  %v310_v8 = vld [vmem:[%s3759_s13 + $0x50] sm:$0xff] }
  0x4a   : > { %839 = vmatpush.msra.mxu1 %v577_v43  ;;  %1258 = vmatpush.msra.mxu3 %v608_v45  ;;  %v300_v2 = vld [vmem:[%s3759_s13] sm:$0xff]  ;;  %v311_v9 = vld [vmem:[%s3759_s13 + $0x58] sm:$0xff]  ;;  %v309_v11 = vld [vmem:[%s3759_s13 + $0x48] sm:$0xff] }
  0x4b   : > { %631 = vmatpush.msra.mxu0 %v560_v46  ;;  %1050 = vmatpush.msra.mxu2 %v591_v48  ;;  %v304_v6 = vld [vmem:[%s3759_s13 + $0x20] sm:$0xff]  ;;  %v314_v12 = vld [vmem:[%s3759_s13 + $0x70] sm:$0xff]  ;;  %v315_v13 = vld [vmem:[%s3759_s13 + $0x78] sm:$0xff] }
  0x4c   : > { %840 = vmatpush.msra.mxu1 %v576_v47  ;;  %1259 = vmatpush.msra.mxu3 %v607_v49  ;;  %v308_v10 = vld [vmem:[%s3759_s13 + $0x40] sm:$0xff]  ;;  %v313_v15 = vld [vmem:[%s3759_s13 + $0x68] sm:$0xff]  ;;  %v318_v16 = vld [vmem:[%s3759_s13 + $0x90] sm:$0xff] }
  0x4d   : > { %632 = vmatpush.msra.mxu0 %v559_v50  ;;  %1051 = vmatpush.msra.mxu2 %v590_v52  ;;  %v312_v14 = vld [vmem:[%s3759_s13 + $0x60] sm:$0xff]  ;;  %v319_v17 = vld [vmem:[%s3759_s13 + $0x98] sm:$0xff]  ;;  %v317_v19 = vld [vmem:[%s3759_s13 + $0x88] sm:$0xff] }
  0x4e   : > { %841 = vmatpush.msra.mxu1 %v575_v51  ;;  %1260 = vmatpush.msra.mxu3 %v606_v53  ;;  %v316_v18 = vld [vmem:[%s3759_s13 + $0x80] sm:$0xff]  ;;  %v322_v20 = vld [vmem:[%s3759_s13 + $0xb0] sm:$0xff]  ;;  %v323_v21 = vld [vmem:[%s3759_s13 + $0xb8] sm:$0xff] }
  0x4f   : > { %633 = vmatpush.msra.mxu0 %v558_v54  ;;  %1052 = vmatpush.msra.mxu2 %v589_v56  ;;  %v320_v22 = vld [vmem:[%s3759_s13 + $0xa0] sm:$0xff]  ;;  %v321_v23 = vld [vmem:[%s3759_s13 + $0xa8] sm:$0xff]  ;;  %v326_v24 = vld [vmem:[%s3759_s13 + $0xd0] sm:$0xff] }
  0x50   : > { %842 = vmatpush.msra.mxu1 %v574_v55  ;;  %1261 = vmatpush.msra.mxu3 %v605_v57  ;;  %v327_v25 = vld [vmem:[%s3759_s13 + $0xd8] sm:$0xff]  ;;  %v324_v26 = vld [vmem:[%s3759_s13 + $0xc0] sm:$0xff]  ;;  %v325_v27 = vld [vmem:[%s3759_s13 + $0xc8] sm:$0xff] }
  0x51   : > { %634 = vmatpush.msra.mxu0 %v557_v58  ;;  %1053 = vmatpush.msra.mxu2 %v588_v60  ;;  %v330_v28 = vld [vmem:[%s3759_s13 + $0xf0] sm:$0xff]  ;;  %v331_v29 = vld [vmem:[%s3759_s13 + $0xf8] sm:$0xff]  ;;  %v328_v30 = vld [vmem:[%s3759_s13 + $0xe0] sm:$0xff] }
  0x52   : > { %843 = vmatpush.msra.mxu1 %v573_v59  ;;  %1262 = vmatpush.msra.mxu3 %v604_v61  ;;  %v329_v31 = vld [vmem:[%s3759_s13 + $0xe8] sm:$0xff]  ;;  %v334_v32 = vld [vmem:[%s3759_s13 + $0x110] sm:$0xff]  ;;  %v335_v33 = vld [vmem:[%s3759_s13 + $0x118] sm:$0xff] }
  0x53   : > { %1054 = vmatmul.f32.vlgmr.msra.gmra.mxu2 %v302_v62  ;;  %1263 = vmatmul.f32.vlgmr.msra.gmra.mxu3 %v303_v63  ;;  %v332_v34 = vld [vmem:[%s3759_s13 + $0x100] sm:$0xff]  ;;  %v333_v35 = vld [vmem:[%s3759_s13 + $0x108] sm:$0xff]  ;;  %v338_v36 = vld [vmem:[%s3759_s13 + $0x130] sm:$0xff] }
  0x54   : > { %635 = vmatpush.msra.mxu0 %v556_v0  ;;  %844 = vmatpush.msra.mxu1 %v572_v1  ;;  %v339_v37 = vld [vmem:[%s3759_s13 + $0x138] sm:$0xff]  ;;  %v336_v38 = vld [vmem:[%s3759_s13 + $0x120] sm:$0xff]  ;;  %v337_v39 = vld [vmem:[%s3759_s13 + $0x128] sm:$0xff] }
  0x55   : > { %636 = vmatmul.f32.vlgmr.msra.gmra.mxu0 %v300_v2  ;;  %845 = vmatmul.f32.vlgmr.msra.gmra.mxu1 %v301_v3  ;;  %v342_v40 = vld [vmem:[%s3759_s13 + $0x150] sm:$0xff]  ;;  %v343_v41 = vld [vmem:[%s3759_s13 + $0x158] sm:$0xff]  ;;  %v340_v42 = vld [vmem:[%s3759_s13 + $0x140] sm:$0xff] }
  0x56   : > { %v341_v43 = vld [vmem:[%s3759_s13 + $0x148] sm:$0xff]  ;;  %v346_v44 = vld [vmem:[%s3759_s13 + $0x170] sm:$0xff]  ;;  %v347_v45 = vld [vmem:[%s3759_s13 + $0x178] sm:$0xff] }
  0x57   : > { %v344_v46 = vld [vmem:[%s3759_s13 + $0x160] sm:$0xff]  ;;  %v345_v47 = vld [vmem:[%s3759_s13 + $0x168] sm:$0xff]  ;;  %v350_v48 = vld [vmem:[%s3759_s13 + $0x190] sm:$0xff] }
  0x58   : > { %v351_v49 = vld [vmem:[%s3759_s13 + $0x198] sm:$0xff]  ;;  %v348_v50 = vld [vmem:[%s3759_s13 + $0x180] sm:$0xff]  ;;  %v349_v51 = vld [vmem:[%s3759_s13 + $0x188] sm:$0xff] }
  0x59   : > { %v354_v52 = vld [vmem:[%s3759_s13 + $0x1b0] sm:$0xff]  ;;  %v355_v53 = vld [vmem:[%s3759_s13 + $0x1b8] sm:$0xff]  ;;  %v352_v54 = vld [vmem:[%s3759_s13 + $0x1a0] sm:$0xff] }
  0x5a   : > { %v353_v55 = vld [vmem:[%s3759_s13 + $0x1a8] sm:$0xff]  ;;  %v358_v56 = vld [vmem:[%s3759_s13 + $0x1d0] sm:$0xff]  ;;  %v359_v57 = vld [vmem:[%s3759_s13 + $0x1d8] sm:$0xff] }
  0x5b   : > { %1057 = vmatmul.f32.gmra.mxu2 %v306_v4  ;;  %1266 = vmatmul.f32.gmra.mxu3 %v307_v5  ;;  %v356_v58 = vld [vmem:[%s3759_s13 + $0x1c0] sm:$0xff]  ;;  %v357_v59 = vld [vmem:[%s3759_s13 + $0x1c8] sm:$0xff]  ;;  %v362_v60 = vld [vmem:[%s3759_s13 + $0x1f0] sm:$0xff] }
  0x5c   : > { %v363_v61 = vld [vmem:[%s3759_s13 + $0x1f8] sm:$0xff]  ;;  %v360_v62 = vld [vmem:[%s3759_s13 + $0x1e0] sm:$0xff]  ;;  %v361_v63 = vld [vmem:[%s3759_s13 + $0x1e8] sm:$0xff] }
  0x5d   : > { %639 = vmatmul.f32.gmra.mxu0 %v304_v6  ;;  %848 = vmatmul.f32.gmra.mxu1 %v305_v7  ;;  %v366_v0 = vld [vmem:[%s3759_s13 + $0x210] sm:$0xff]  ;;  %v367_v1 = vld [vmem:[%s3759_s13 + $0x218] sm:$0xff]  ;;  %v364_v4 = vld [vmem:[%s3759_s13 + $0x200] sm:$0xff] }
  0x5e   : > { %v365_v5 = vld [vmem:[%s3759_s13 + $0x208] sm:$0xff] }
  0x63   : > { %1060 = vmatmul.f32.gmra.mxu2 %v310_v8  ;;  %1269 = vmatmul.f32.gmra.mxu3 %v311_v9 }
  0x65   : > { %642 = vmatmul.f32.gmra.mxu0 %v308_v10  ;;  %851 = vmatmul.f32.gmra.mxu1 %v309_v11  ;;  %v3841_v10 = vld [vmem:[#allocation7] ss:$0 sm:$0xff]  ;;  %v370_v11 = vld [vmem:[%s3759_s13 + $0x230] sm:$0xff] }
  0x6b   : > { %1063 = vmatmul.f32.gmra.mxu2 %v314_v12  ;;  %1272 = vmatmul.f32.gmra.mxu3 %v315_v13  ;;  %v371_v12 = vld [vmem:[%s3759_s13 + $0x238] sm:$0xff] }
  0x6d   : > { %645 = vmatmul.f32.gmra.mxu0 %v312_v14  ;;  %854 = vmatmul.f32.gmra.mxu1 %v313_v15  ;;  %v3845_v14 = vld [vmem:[#allocation8] ss:$0 sm:$0xff] }
  0x73   : > { %1066 = vmatmul.f32.gmra.mxu2 %v318_v16  ;;  %1275 = vmatmul.f32.gmra.mxu3 %v319_v17  ;;  %v368_v17 = vld [vmem:[%s3759_s13 + $0x220] sm:$0xff] }
  0x75   : > { %648 = vmatmul.f32.gmra.mxu0 %v316_v18  ;;  %857 = vmatmul.f32.gmra.mxu1 %v317_v19  ;;  %v369_v18 = vld [vmem:[%s3759_s13 + $0x228] sm:$0xff] }
  0x7b   : > { %1069 = vmatmul.f32.gmra.mxu2 %v322_v20  ;;  %1278 = vmatmul.f32.gmra.mxu3 %v323_v21 }
  0x7d   : > { %651 = vmatmul.f32.gmra.mxu0 %v320_v22  ;;  %860 = vmatmul.f32.gmra.mxu1 %v321_v23 }
  0x83   : > { %1072 = vmatmul.f32.gmra.mxu2 %v326_v24  ;;  %1281 = vmatmul.f32.gmra.mxu3 %v327_v25 }
  0x85   : > { %654 = vmatmul.f32.gmra.mxu0 %v324_v26  ;;  %863 = vmatmul.f32.gmra.mxu1 %v325_v27  ;;  %v374_v26 = vld [vmem:[%s3759_s13 + $0x250] sm:$0xff]  ;;  %v375_v27 = vld [vmem:[%s3759_s13 + $0x258] sm:$0xff] }
  0x8b   : > { %1075 = vmatmul.f32.gmra.mxu2 %v330_v28  ;;  %1284 = vmatmul.f32.gmra.mxu3 %v331_v29 }
  0x8d   : > { %657 = vmatmul.f32.gmra.mxu0 %v328_v30  ;;  %866 = vmatmul.f32.gmra.mxu1 %v329_v31 }
  0x93   : > { %1078 = vmatmul.f32.gmra.mxu2 %v334_v32  ;;  %1287 = vmatmul.f32.gmra.mxu3 %v335_v33  ;;  %v372_v32 = vld [vmem:[%s3759_s13 + $0x240] sm:$0xff]  ;;  %v373_v33 = vld [vmem:[%s3759_s13 + $0x248] sm:$0xff] }
  0x95   : > { %660 = vmatmul.f32.gmra.mxu0 %v332_v34  ;;  %869 = vmatmul.f32.gmra.mxu1 %v333_v35 }
  0x9b   : > { %1081 = vmatmul.f32.gmra.mxu2 %v338_v36  ;;  %1290 = vmatmul.f32.gmra.mxu3 %v339_v37 }
  0x9d   : > { %663 = vmatmul.f32.gmra.mxu0 %v336_v38  ;;  %872 = vmatmul.f32.gmra.mxu1 %v337_v39 }
  0xa3   : > { %1084 = vmatmul.f32.gmra.mxu2 %v342_v40  ;;  %1293 = vmatmul.f32.gmra.mxu3 %v343_v41  ;;  %v378_v41 = vld [vmem:[%s3759_s13 + $0x270] sm:$0xff] }
  0xa5   : > { %666 = vmatmul.f32.gmra.mxu0 %v340_v42  ;;  %875 = vmatmul.f32.gmra.mxu1 %v341_v43  ;;  %v379_v42 = vld [vmem:[%s3759_s13 + $0x278] sm:$0xff] }
  0xab   : > { %1087 = vmatmul.f32.gmra.mxu2 %v346_v44  ;;  %1296 = vmatmul.f32.gmra.mxu3 %v347_v45 }
  0xad   : > { %669 = vmatmul.f32.gmra.mxu0 %v344_v46  ;;  %878 = vmatmul.f32.gmra.mxu1 %v345_v47 }
  0xb3   : > { %1090 = vmatmul.f32.gmra.mxu2 %v350_v48  ;;  %1299 = vmatmul.f32.gmra.mxu3 %v351_v49  ;;  %v376_v49 = vld [vmem:[%s3759_s13 + $0x260] sm:$0xff] }
  0xb5   : > { %672 = vmatmul.f32.gmra.mxu0 %v348_v50  ;;  %881 = vmatmul.f32.gmra.mxu1 %v349_v51  ;;  %v377_v50 = vld [vmem:[%s3759_s13 + $0x268] sm:$0xff] }
  0xbb   : > { %1093 = vmatmul.f32.gmra.mxu2 %v354_v52  ;;  %1302 = vmatmul.f32.gmra.mxu3 %v355_v53 }
  0xbd   : > { %675 = vmatmul.f32.gmra.mxu0 %v352_v54  ;;  %884 = vmatmul.f32.gmra.mxu1 %v353_v55 }
  0xc3   : > { %1096 = vmatmul.f32.gmra.mxu2 %v358_v56  ;;  %1305 = vmatmul.f32.gmra.mxu3 %v359_v57 }
  0xc5   : > { %678 = vmatmul.f32.gmra.mxu0 %v356_v58  ;;  %887 = vmatmul.f32.gmra.mxu1 %v357_v59  ;;  %v382_v58 = vld [vmem:[%s3759_s13 + $0x290] sm:$0xff]  ;;  %v383_v59 = vld [vmem:[%s3759_s13 + $0x298] sm:$0xff] }
  0xcb   : > { %1099 = vmatmul.f32.gmra.mxu2 %v362_v60  ;;  %1308 = vmatmul.f32.gmra.mxu3 %v363_v61 }
  0xcd   : > { %681 = vmatmul.f32.gmra.mxu0 %v360_v62  ;;  %890 = vmatmul.f32.gmra.mxu1 %v361_v63 }
  0xd2   : > { %v637_v2 = vpop.f32.mrf.mxu0  ;;  %v846_v3 = vpop.f32.mrf.mxu1 }
  0xd3   : > { %1102 = vmatmul.f32.gmra.mxu2 %v366_v0  ;;  %v847_v6 = vadd.f32 %v846_v3, %v637_v2  ;;  %1311 = vmatmul.f32.gmra.mxu3 %v367_v1  ;;  %v380_v3 = vld [vmem:[%s3759_s13 + $0x280] sm:$0xff] }
  0xd5   : > { %684 = vmatmul.f32.gmra.mxu0 %v364_v4  ;;  %893 = vmatmul.f32.gmra.mxu1 %v365_v5  ;;  %v381_v4 = vld [vmem:[%s3759_s13 + $0x288] sm:$0xff] }
  0xd6   : > { %v1055_v7 = vpop.f32.mrf.mxu2  ;;  %v1264_v8 = vpop.f32.mrf.mxu3 }
  0xd7   : > { %v1056_v9 = vadd.f32 %v1055_v7, %v847_v6 }
  0xd9   : > { %v1265_v13 = vadd.f32 %v1264_v8, %v1056_v9 }
  0xda   : > { %v640_v15 = vpop.f32.mrf.mxu0  ;;  %v849_v16 = vpop.f32.mrf.mxu1 }
  0xdb   : > { %v1460_v19 = vmul.f32 %v3841_v10, %v1265_v13  ;;  %1105 = vmatmul.f32.gmra.mxu2 %v370_v11  ;;  %v850_v20 = vadd.f32 %v849_v16, %v640_v15  ;;  %1314 = vmatmul.f32.gmra.mxu3 %v371_v12 }
  0xdd   : > { %v3851_v21 = vadd.f32 %v3845_v14, %v1460_v19  ;;  %687 = vmatmul.f32.gmra.mxu0 %v368_v17  ;;  %896 = vmatmul.f32.gmra.mxu1 %v369_v18  ;;  %v386_v19 = vld [vmem:[%s3759_s13 + $0x2b0] sm:$0xff] }
  0xde   : > { %v1058_v22 = vpop.f32.mrf.mxu2  ;;  %v1267_v23 = vpop.f32.mrf.mxu3 }
  0xdf   : > { %v1592_v24 = vsub.f32 0.0, %v3851_v21  ;;  %v1059_v25 = vadd.f32 %v1058_v22, %v850_v20  ;;  %v387_v20 = vld [vmem:[%s3759_s13 + $0x2b8] sm:$0xff] }
  0xe1   : > { %v1656_v28 = vmul.f32 1.442695, %v1592_v24  ;;  %v1268_v29 = vadd.f32 %v1267_v23, %v1059_v25 }
  0xe2   : > { %v643_v30 = vpop.f32.mrf.mxu0  ;;  %v852_v31 = vpop.f32.mrf.mxu1 }
  0xe3   : > { %3131 = vpow2.f32 %v1656_v28  ;;  %v1461_v34 = vmul.f32 %v3841_v10, %v1268_v29  ;;  %1108 = vmatmul.f32.gmra.mxu2 %v374_v26  ;;  %v853_v35 = vadd.f32 %v852_v31, %v643_v30  ;;  %1317 = vmatmul.f32.gmra.mxu3 %v375_v27  ;;  %v384_v31 = vld [vmem:[%s3759_s13 + $0x2a0] sm:$0xff] }
  0xe5   : > { %v3860_v36 = vadd.f32 %v3845_v14, %v1461_v34  ;;  %690 = vmatmul.f32.gmra.mxu0 %v372_v32  ;;  %899 = vmatmul.f32.gmra.mxu1 %v373_v33  ;;  %v385_v32 = vld [vmem:[%s3759_s13 + $0x2a8] sm:$0xff] }
  0xe6   : > { %v1061_v37 = vpop.f32.mrf.mxu2  ;;  %v1270_v38 = vpop.f32.mrf.mxu3 }
  0xe7   : > { %v1593_v39 = vsub.f32 0.0, %v3860_v36  ;;  %v1062_v40 = vadd.f32 %v1061_v37, %v853_v35 }
  0xe9   : > { %v3132_v43 = vpop.eup %3131  ;;  %v1658_v44 = vmul.f32 1.442695, %v1593_v39  ;;  %v1271_v45 = vadd.f32 %v1270_v38, %v1062_v40 }
  0xea   : > { %v3865_v46 = vadd.f32 1.0, %v3132_v43  ;;  %v646_v47 = vpop.f32.mrf.mxu0  ;;  %v855_v48 = vpop.f32.mrf.mxu1 }
  0xeb   : > { %3133 = vpow2.f32 %v1658_v44  ;;  %v1462_v51 = vmul.f32 %v3841_v10, %v1271_v45  ;;  %1111 = vmatmul.f32.gmra.mxu2 %v378_v41  ;;  %v856_v52 = vadd.f32 %v855_v48, %v646_v47  ;;  %1320 = vmatmul.f32.gmra.mxu3 %v379_v42  ;;  %v390_v47 = vld [vmem:[%s3759_s13 + $0x2d0] sm:$0xff]  ;;  %v391_v48 = vld [vmem:[%s3759_s13 + $0x2d8] sm:$0xff] }
  0xec   : > { %3135 = vrcp.f32 %v3865_v46  ;;  %v1857_v11 = vand.u32 2147483647, %v3865_v46  ;;  %v1859_v12 = vand.u32 2147483648, %v3865_v46  ;;  %vm1853_vm1 = vweird.f32 %v3865_v46 }
  0xed   : > { %v3872_v53 = vadd.f32 %v3845_v14, %v1462_v51  ;;  %693 = vmatmul.f32.gmra.mxu0 %v376_v49  ;;  %902 = vmatmul.f32.gmra.mxu1 %v377_v50 }
  0xee   : > { %v1064_v54 = vpop.f32.mrf.mxu2  ;;  %v1273_v55 = vpop.f32.mrf.mxu3  ;;  %v1860_v27 = vor.u32 1.1754944e-38, %v1859_v12  ;;  %vm1858_vm3 = vcmp.eq.f32.partialorder %v1857_v11, 8.507059e+37 }
  0xef   : > { %v1594_v56 = vsub.f32 0.0, %v3872_v53  ;;  %v1065_v57 = vadd.f32 %v1064_v54, %v856_v52 }
  0xf1   : > { %v3134_v60 = vpop.eup %3133  ;;  %v1660_v61 = vmul.f32 1.442695, %v1594_v56  ;;  %v1274_v62 = vadd.f32 %v1273_v55, %v1065_v57 }
  0xf2   : > { %v3136_v63 = vpop.eup %3135  ;;  %v3877_v0 = vadd.f32 1.0, %v3134_v60  ;;  %v649_v1 = vpop.f32.mrf.mxu0  ;;  %v389_v60 = vld [vmem:[%s3759_s13 + $0x2c8] sm:$0xff] }
  0xf3   : > { %v858_v2 = vpop.f32.mrf.mxu1  ;;  %v1849_v5 = vmul.f32 %v3136_v63, %v3865_v46  ;;  %3137 = vpow2.f32 %v1660_v61  ;;  %v1463_v6 = vmul.f32 %v3841_v10, %v1274_v62  ;;  %1114 = vmatmul.f32.gmra.mxu2 %v382_v58  ;;  %1323 = vmatmul.f32.gmra.mxu3 %v383_v59  ;;  %vm1854_vm0 = vweird.f32 %v3136_v63  ;;  %v388_v59 = vld [vmem:[%s3759_s13 + $0x2c0] sm:$0xff] }
  0xf4   : > { %3139 = vrcp.f32 %v3877_v0  ;;  %v859_v9 = vadd.f32 %v858_v2, %v649_v1  ;;  %vm1855_vm2 = vmor %vm1853_vm1, %vm1854_vm0  ;;  %v1874_v40 = vand.u32 2147483648, %v3877_v0  ;;  %vm1868_vm5 = vweird.f32 %v3877_v0 }
  0xf5   : > { %v1850_v7 = vsub.f32 1.0, %v1849_v5  ;;  %v3885_v8 = vadd.f32 %v3845_v14, %v1463_v6  ;;  %696 = vmatmul.f32.gmra.mxu0 %v380_v3  ;;  %905 = vmatmul.f32.gmra.mxu1 %v381_v4 }
  0xf6   : > { %v1067_v13 = vpop.f32.mrf.mxu2  ;;  %v1276_v15 = vpop.f32.mrf.mxu3  ;;  %v1875_v54 = vor.u32 1.1754944e-38, %v1874_v40 }
  0xf7   : > { %v1851_v16 = vmul.f32 %v3136_v63, %v1850_v7  ;;  %v1595_v17 = vsub.f32 0.0, %v3885_v8  ;;  %v1068_v18 = vadd.f32 %v1067_v13, %v859_v9  ;;  %v394_v13 = vld [vmem:[%s3759_s13 + $0x2f0] sm:$0xff] }
  0xf9   : > { %v3138_v22 = vpop.eup %3137  ;;  %v1852_v23 = vadd.f32 %v3136_v63, %v1851_v16  ;;  %v1662_v24 = vmul.f32 1.442695, %v1595_v17  ;;  %v1277_v25 = vadd.f32 %v1276_v15, %v1068_v18  ;;  %v395_v15 = vld [vmem:[%s3759_s13 + $0x2f8] sm:$0xff]  ;;  %v401_v18 = vld [vmem:[%s3759_s13 + $0x328] sm:$0xff] }
  0xfa   : > { %v3140_v26 = vpop.eup %3139  ;;  %v3894_v28 = vadd.f32 1.0, %v3138_v22  ;;  %v652_v29 = vpop.f32.mrf.mxu0 }
  0xfb   : > { %v861_v30 = vpop.f32.mrf.mxu1  ;;  %v1856_v33 = vsel %vm1855_vm2, %v3136_v63, %v1852_v23  ;;  %v1864_v34 = vmul.f32 %v3140_v26, %v3877_v0  ;;  %3141 = vpow2.f32 %v1662_v24  ;;  %1117 = vmatmul.f32.gmra.mxu2 %v386_v19  ;;  %1326 = vmatmul.f32.gmra.mxu3 %v387_v20  ;;  %v1464_v39 = vmul.f32 %v3841_v10, %v1277_v25  ;;  %v392_v25 = vld [vmem:[%s3759_s13 + $0x2e0] sm:$0xff] }
  0xfc   : > { %v1861_v35 = vsel %vm1858_vm3, %v1860_v27, %v1856_v33  ;;  %3143 = vrcp.f32 %v3894_v28  ;;  %v862_v41 = vadd.f32 %v861_v30, %v652_v29  ;;  %vm1869_vm4 = vweird.f32 %v3140_v26 }
  0xfd   : > { %v1862_v37 = vmul.f32 %v1861_v35, %v3851_v21  ;;  %v1865_v38 = vsub.f32 1.0, %v1864_v34  ;;  %699 = vmatmul.f32.gmra.mxu0 %v384_v31  ;;  %908 = vmatmul.f32.gmra.mxu1 %v385_v32  ;;  %v1872_v21 = vand.u32 2147483647, %v3877_v0  ;;  %v3908_v45 = vadd.f32 %v3845_v14, %v1464_v39  ;;  %vm1870_vm6 = vmor %vm1868_vm5, %vm1869_vm4 }
  0xfe   : > { %v1070_v42 = vpop.f32.mrf.mxu2  ;;  %v1279_v43 = vpop.f32.mrf.mxu3  ;;  %v1889_v3 = vand.u32 2147483648, %v3894_v28  ;;  %vm1883_vm9 = vweird.f32 %v3894_v28 }
  0xff   : > { %2808 = vst [vmem:[%s3903_s2] sm:$0xff] %v1862_v37  ;;  %v1866_v44 = vmul.f32 %v3140_v26, %v1865_v38  ;;  %v1071_v46 = vadd.f32 %v1070_v42, %v862_v41  ;;  %v1596_v51 = vsub.f32 0.0, %v3908_v45  ;;  %vm1873_vm7 = vcmp.eq.f32.partialorder %v1872_v21, 8.507059e+37  ;;  %v399_v21 = vld [vmem:[%s3759_s13 + $0x318] sm:$0xff] }
 0x100   : > { %v1890_v19 = vor.u32 1.1754944e-38, %v1889_v3 }
 0x101   : > { %v3142_v49 = vpop.eup %3141  ;;  %v1867_v50 = vadd.f32 %v3140_v26, %v1866_v44  ;;  %v1280_v56 = vadd.f32 %v1279_v43, %v1071_v46  ;;  %v1664_v63 = vmul.f32 1.442695, %v1596_v51  ;;  %v398_v44 = vld [vmem:[%s3759_s13 + $0x310] sm:$0xff] }
 0x102   : > { %v3144_v52 = vpop.eup %3143  ;;  %v3914_v55 = vadd.f32 1.0, %v3142_v49  ;;  %v655_v57 = vpop.f32.mrf.mxu0 }
 0x103   : > { %v864_v58 = vpop.f32.mrf.mxu1  ;;  %v1871_v61 = vsel %vm1870_vm6, %v3140_v26, %v1867_v50  ;;  %v1879_v62 = vmul.f32 %v3144_v52, %v3894_v28  ;;  %1120 = vmatmul.f32.gmra.mxu2 %v390_v47  ;;  %1329 = vmatmul.f32.gmra.mxu3 %v391_v48  ;;  %v1465_v4 = vmul.f32 %v3841_v10, %v1280_v56  ;;  %vm1884_vm8 = vweird.f32 %v3144_v52  ;;  %v393_v26 = vld [vmem:[%s3759_s13 + $0x2e8] sm:$0xff] }
 0x104   : > { %v1876_v0 = vsel %vm1873_vm7, %v1875_v54, %v1871_v61  ;;  %3145 = vrcp.f32 %v3914_v55  ;;  %v865_v5 = vadd.f32 %v864_v58, %v655_v57  ;;  %vm3931_vm10 = vmor %vm1883_vm9, %vm1884_vm8  ;;  %v1902_v38 = vand.u32 2147483647, %v3914_v55  ;;  %v397_v54 = vld [vmem:[%s3759_s13 + $0x308] sm:$0xff] }
 0x105   : > { %v1877_v1 = vmul.f32 %v1876_v0, %v3860_v36  ;;  %v1880_v2 = vsub.f32 1.0, %v1879_v62  ;;  %3147 = vpow2.f32 %v1664_v63  ;;  %702 = vmatmul.f32.gmra.mxu0 %v388_v59  ;;  %911 = vmatmul.f32.gmra.mxu1 %v389_v60  ;;  %v1887_v36 = vand.u32 2147483647, %v3894_v28 }
 0x106   : > { %v1073_v6 = vpop.f32.mrf.mxu2  ;;  %v1282_v7 = vpop.f32.mrf.mxu3  ;;  %v3926_v11 = vadd.f32 %v3845_v14, %v1465_v4  ;;  %v1904_v39 = vand.u32 2147483648, %v3914_v55  ;;  %vm1898_vm13 = vweird.f32 %v3914_v55  ;;  %vm1903_vm15 = vcmp.eq.f32.partialorder %v1902_v38, 8.507059e+37  ;;  %v406_v38 = vld [vmem:[%s3759_s13 + $0x350] sm:$0xff] }
 0x107   : > { %2809 = vst [vmem:[%s3903_s2 + $0x8] sm:$0xff] %v1877_v1  ;;  %v1881_v9 = vmul.f32 %v3144_v52, %v1880_v2  ;;  %v1074_v12 = vadd.f32 %v1073_v6, %v865_v5  ;;  %vm1888_vm11 = vcmp.eq.f32.partialorder %v1887_v36, 8.507059e+37 }
 0x108   : > { %v1597_v20 = vsub.f32 0.0, %v3926_v11  ;;  %v1905_v49 = vor.u32 1.1754944e-38, %v1904_v39  ;;  %v407_v39 = vld [vmem:[%s3759_s13 + $0x358] sm:$0xff] }
 0x109   : > { %v1882_v16 = vadd.f32 %v3144_v52, %v1881_v9  ;;  %v1283_v22 = vadd.f32 %v1282_v7, %v1074_v12  ;;  %v402_v7 = vld [vmem:[%s3759_s13 + $0x330] sm:$0xff]  ;;  %v403_v9 = vld [vmem:[%s3759_s13 + $0x338] sm:$0xff] }
 0x10a   : > { %v3146_v17 = vpop.eup %3145  ;;  %v658_v23 = vpop.f32.mrf.mxu0  ;;  %v1666_v33 = vmul.f32 1.442695, %v1597_v20 }
 0x10b   : > { %v867_v24 = vpop.f32.mrf.mxu1  ;;  %v3148_v27 = vpop.eup %3147  ;;  %v1886_v29 = vsel %vm3931_vm10, %v3144_v52, %v1882_v16  ;;  %v1894_v28 = vmul.f32 %v3146_v17, %v3914_v55  ;;  %1123 = vmatmul.f32.gmra.mxu2 %v394_v13  ;;  %1332 = vmatmul.f32.gmra.mxu3 %v395_v15  ;;  %v1466_v34 = vmul.f32 %v3841_v10, %v1283_v22  ;;  %vm1899_vm12 = vweird.f32 %v3146_v17  ;;  %v396_v52 = vld [vmem:[%s3759_s13 + $0x300] sm:$0xff] }
 0x10c   : > { %v868_v30 = vadd.f32 %v867_v24, %v658_v23  ;;  %v1891_v31 = vsel %vm1888_vm11, %v1890_v19, %v1886_v29  ;;  %v3941_v32 = vadd.f32 1.0, %v3148_v27  ;;  %vm1900_vm14 = vmor %vm1898_vm13, %vm1899_vm12 }
 0x10d   : > { %v1892_v35 = vmul.f32 %v1891_v31, %v3872_v53  ;;  %v1895_v37 = vsub.f32 1.0, %v1894_v28  ;;  %705 = vmatmul.f32.gmra.mxu0 %v392_v25  ;;  %914 = vmatmul.f32.gmra.mxu1 %v393_v26  ;;  %v3950_v53 = vadd.f32 %v3845_v14, %v1466_v34 }
 0x10e   : > { %3149 = vrcp.f32 %v3941_v32  ;;  %v1076_v40 = vpop.f32.mrf.mxu2  ;;  %v1285_v41 = vpop.f32.mrf.mxu3  ;;  %v1919_v6 = vand.u32 2147483648, %v3941_v32  ;;  %vm1913_vm1 = vweird.f32 %v3941_v32 }
 0x10f   : > { %2810 = vst [vmem:[%s3903_s2 + $0x10] sm:$0xff] %v1892_v35  ;;  %v1896_v42 = vmul.f32 %v3146_v17, %v1895_v37  ;;  %3151 = vpow2.f32 %v1666_v33  ;;  %v1077_v43 = vadd.f32 %v1076_v40, %v868_v30  ;;  %v1598_v47 = vsub.f32 0.0, %v3950_v53 }
 0x110   : > { %v1920_v24 = vor.u32 1.1754944e-38, %v1919_v6 }
 0x111   : > { %v1897_v46 = vadd.f32 %v3146_v17, %v1896_v42  ;;  %v1286_v48 = vadd.f32 %v1285_v41, %v1077_v43  ;;  %v1668_v57 = vmul.f32 1.442695, %v1598_v47  ;;  %v404_v41 = vld [vmem:[%s3759_s13 + $0x340] sm:$0xff] }
 0x112   : > { %v661_v50 = vpop.f32.mrf.mxu0 }
 0x113   : > { %v870_v51 = vpop.f32.mrf.mxu1  ;;  %v1901_v56 = vsel %vm1900_vm14, %v3146_v17, %v1897_v46  ;;  %v1467_v58 = vmul.f32 %v3841_v10, %v1286_v48  ;;  %1126 = vmatmul.f32.gmra.mxu2 %v398_v44  ;;  %1335 = vmatmul.f32.gmra.mxu3 %v399_v21  ;;  %3153 = vpow2.f32 %v1668_v57  ;;  %v400_v17 = vld [vmem:[%s3759_s13 + $0x320] sm:$0xff]  ;;  %v405_v48 = vld [vmem:[%s3759_s13 + $0x348] sm:$0xff] }
 0x114   : > { %v871_v59 = vadd.f32 %v870_v51, %v661_v50  ;;  %v3150_v55 = vpop.eup %3149  ;;  %v1906_v60 = vsel %vm1903_vm15, %v1905_v49, %v1901_v56 }
 0x115   : > { %v3152_v61 = vpop.eup %3151  ;;  %v1907_v62 = vmul.f32 %v1906_v60, %v3885_v8  ;;  %v1909_v63 = vmul.f32 %v3150_v55, %v3941_v32  ;;  %708 = vmatmul.f32.gmra.mxu0 %v396_v52  ;;  %917 = vmatmul.f32.gmra.mxu1 %v397_v54  ;;  %v3965_v1 = vadd.f32 %v3845_v14, %v1467_v58  ;;  %v1917_v8 = vand.u32 2147483647, %v3941_v32 }
 0x116   : > { %v3962_v0 = vadd.f32 1.0, %v3152_v61  ;;  %v1079_v2 = vpop.f32.mrf.mxu2  ;;  %v1288_v3 = vpop.f32.mrf.mxu3  ;;  %vm1914_vm0 = vweird.f32 %v3150_v55 }
 0x117   : > { %2811 = vst [vmem:[%s3903_s2 + $0x18] sm:$0xff] %v1907_v62  ;;  %v1910_v4 = vsub.f32 1.0, %v1909_v63  ;;  %v1080_v5 = vadd.f32 %v1079_v2, %v871_v59  ;;  %v1599_v12 = vsub.f32 0.0, %v3965_v1  ;;  %vm1915_vm2 = vmor %vm1913_vm1, %vm1914_vm0  ;;  %vm1918_vm3 = vcmp.eq.f32.partialorder %v1917_v8, 8.507059e+37 }
 0x118   : > { %3155 = vrcp.f32 %v3962_v0  ;;  %v1932_v42 = vand.u32 2147483647, %v3962_v0  ;;  %v1934_v43 = vand.u32 2147483648, %v3962_v0  ;;  %vm1928_vm5 = vweird.f32 %v3962_v0 }
 0x119   : > { %v1911_v36 = vmul.f32 %v3150_v55, %v1910_v4  ;;  %v1289_v13 = vadd.f32 %v1288_v3, %v1080_v5  ;;  %v3154_v19 = vpop.eup %3153  ;;  %v1670_v22 = vmul.f32 1.442695, %v1599_v12  ;;  %v410_v4 = vld [vmem:[%s3759_s13 + $0x370] sm:$0xff]  ;;  %v411_v5 = vld [vmem:[%s3759_s13 + $0x378] sm:$0xff] }
 0x11a   : > { %v664_v15 = vpop.f32.mrf.mxu0  ;;  %v3978_v25 = vadd.f32 1.0, %v3154_v19  ;;  %vm1933_vm7 = vcmp.eq.f32.partialorder %v1932_v42, 8.507059e+37  ;;  %v1935_v58 = vor.u32 1.1754944e-38, %v1934_v43  ;;  %v412_v43 = vld [vmem:[%s3759_s13 + $0x380] sm:$0xff] }
 0x11b   : > { %v873_v16 = vpop.f32.mrf.mxu1  ;;  %v1912_v20 = vadd.f32 %v3150_v55, %v1911_v36  ;;  %v1468_v23 = vmul.f32 %v3841_v10, %v1289_v13  ;;  %1129 = vmatmul.f32.gmra.mxu2 %v402_v7  ;;  %1338 = vmatmul.f32.gmra.mxu3 %v403_v9  ;;  %3157 = vpow2.f32 %v1670_v22 }
 0x11c   : > { %v874_v26 = vadd.f32 %v873_v16, %v664_v15  ;;  %3159 = vrcp.f32 %v3978_v25  ;;  %v1947_v2 = vand.u32 2147483647, %v3978_v25  ;;  %v1949_v3 = vand.u32 2147483648, %v3978_v25  ;;  %v408_v15 = vld [vmem:[%s3759_s13 + $0x360] sm:$0xff]  ;;  %v409_v16 = vld [vmem:[%s3759_s13 + $0x368] sm:$0xff] }
 0x11d   : > { %v1916_v27 = vsel %vm1915_vm2, %v3150_v55, %v1912_v20  ;;  %v3981_v29 = vadd.f32 %v3845_v14, %v1468_v23  ;;  %711 = vmatmul.f32.gmra.mxu0 %v400_v17  ;;  %920 = vmatmul.f32.gmra.mxu1 %v401_v18  ;;  %vm1943_vm9 = vweird.f32 %v3978_v25 }
 0x11e   : > { %v3156_v28 = vpop.eup %3155  ;;  %v1921_v30 = vsel %vm1918_vm3, %v1920_v24, %v1916_v27  ;;  %v1082_v31 = vpop.f32.mrf.mxu2  ;;  %v1950_v22 = vor.u32 1.1754944e-38, %v1949_v3  ;;  %vm1948_vm11 = vcmp.eq.f32.partialorder %v1947_v2, 8.507059e+37  ;;  %v418_v3 = vld [vmem:[%s3759_s13 + $0x3b0] sm:$0xff] }
 0x11f   : > { %v1291_v32 = vpop.f32.mrf.mxu3  ;;  %v1922_v33 = vmul.f32 %v1921_v30, %v3908_v45  ;;  %v1924_v34 = vmul.f32 %v3156_v28, %v3962_v0  ;;  %v1600_v35 = vsub.f32 0.0, %v3981_v29  ;;  %v1083_v37 = vadd.f32 %v1082_v31, %v874_v26 }
 0x120   : > { %vm1929_vm4 = vweird.f32 %v3156_v28 }
 0x121   : > { %2812 = vst [vmem:[%s3903_s2 + $0x20] sm:$0xff] %v1922_v33  ;;  %v1925_v40 = vsub.f32 1.0, %v1924_v34  ;;  %v1672_v44 = vmul.f32 1.442695, %v1600_v35  ;;  %v1292_v21 = vadd.f32 %v1291_v32, %v1083_v37  ;;  %v3158_v45 = vpop.eup %3157  ;;  %vm1930_vm6 = vmor %vm1928_vm5, %vm1929_vm4  ;;  %v414_v35 = vld [vmem:[%s3759_s13 + $0x390] sm:$0xff]  ;;  %v415_v37 = vld [vmem:[%s3759_s13 + $0x398] sm:$0xff] }
 0x122   : > { %v667_v46 = vpop.f32.mrf.mxu0  ;;  %v3160_v51 = vpop.eup %3159  ;;  %v3994_v52 = vadd.f32 1.0, %v3158_v45 }
 0x123   : > { %v876_v47 = vpop.f32.mrf.mxu1  ;;  %v1926_v49 = vmul.f32 %v3156_v28, %v1925_v40  ;;  %1132 = vmatmul.f32.gmra.mxu2 %v406_v38  ;;  %1341 = vmatmul.f32.gmra.mxu3 %v407_v39  ;;  %3161 = vpow2.f32 %v1672_v44  ;;  %v1469_v54 = vmul.f32 %v3841_v10, %v1292_v21  ;;  %v1939_v57 = vmul.f32 %v3160_v51, %v3978_v25  ;;  %v413_v44 = vld [vmem:[%s3759_s13 + $0x388] sm:$0xff] }
 0x124   : > { %v877_v50 = vadd.f32 %v876_v47, %v667_v46  ;;  %3163 = vrcp.f32 %v3994_v52  ;;  %vm1944_vm8 = vweird.f32 %v3160_v51  ;;  %v1964_v33 = vand.u32 2147483648, %v3994_v52 }
 0x125   : > { %v1927_v56 = vadd.f32 %v3156_v28, %v1926_v49  ;;  %714 = vmatmul.f32.gmra.mxu0 %v404_v41  ;;  %923 = vmatmul.f32.gmra.mxu1 %v405_v48  ;;  %v1940_v61 = vsub.f32 1.0, %v1939_v57  ;;  %v4001_v62 = vadd.f32 %v3845_v14, %v1469_v54  ;;  %vm1945_vm10 = vmor %vm1943_vm9, %vm1944_vm8  ;;  %v1962_v39 = vand.u32 2147483647, %v3994_v52 }
 0x126   : > { %v1085_v59 = vpop.f32.mrf.mxu2  ;;  %vm1958_vm13 = vweird.f32 %v3994_v52  ;;  %v1965_v45 = vor.u32 1.1754944e-38, %v1964_v33 }
 0x127   : > { %v1294_v55 = vpop.f32.mrf.mxu3  ;;  %v1931_v60 = vsel %vm1930_vm6, %v3156_v28, %v1927_v56  ;;  %v1086_v63 = vadd.f32 %v1085_v59, %v877_v50  ;;  %v1941_v6 = vmul.f32 %v3160_v51, %v1940_v61  ;;  %v1601_v7 = vsub.f32 0.0, %v4001_v62 }
 0x128   : > { %v1936_v0 = vsel %vm1933_vm7, %v1935_v58, %v1931_v60  ;;  %vm1963_vm15 = vcmp.eq.f32.partialorder %v1962_v39, 8.507059e+37 }
 0x129   : > { %v1937_v8 = vmul.f32 %v1936_v0, %v3926_v11  ;;  %v1295_v9 = vadd.f32 %v1294_v55, %v1086_v63  ;;  %v3162_v36 = vpop.eup %3161  ;;  %v1942_v17 = vadd.f32 %v3160_v51, %v1941_v6  ;;  %v1674_v19 = vmul.f32 1.442695, %v1601_v7 }
 0x12a   : > { %v670_v12 = vpop.f32.mrf.mxu0  ;;  %v4013_v18 = vadd.f32 1.0, %v3162_v36  ;;  %v3164_v11 = vpop.eup %3163  ;;  %v417_v36 = vld [vmem:[%s3759_s13 + $0x3a8] sm:$0xff] }
 0x12b   : > { %v879_v13 = vpop.f32.mrf.mxu1  ;;  %2813 = vst [vmem:[%s3903_s2 + $0x28] sm:$0xff] %v1937_v8  ;;  %v1470_v20 = vmul.f32 %v3841_v10, %v1295_v9  ;;  %1135 = vmatmul.f32.gmra.mxu2 %v410_v4  ;;  %1344 = vmatmul.f32.gmra.mxu3 %v411_v5  ;;  %v1946_v24 = vsel %vm1945_vm10, %v3160_v51, %v1942_v17  ;;  %vm1959_vm12 = vweird.f32 %v3164_v11  ;;  %v419_v4 = vld [vmem:[%s3759_s13 + $0x3b8] sm:$0xff]  ;;  %v416_v9 = vld [vmem:[%s3759_s13 + $0x3a0] sm:$0xff] }
 0x12c   : > { %v880_v23 = vadd.f32 %v879_v13, %v670_v12  ;;  %v1954_v25 = vmul.f32 %v3164_v11, %v3994_v52  ;;  %3165 = vrcp.f32 %v4013_v18  ;;  %v1951_v26 = vsel %vm1948_vm11, %v1950_v22, %v1946_v24  ;;  %vm1960_vm14 = vmor %vm1958_vm13, %vm1959_vm12 }
 0x12d   : > { %717 = vmatmul.f32.gmra.mxu0 %v408_v15  ;;  %926 = vmatmul.f32.gmra.mxu1 %v409_v16  ;;  %v1952_v30 = vmul.f32 %v1951_v26, %v3950_v53  ;;  %3167 = vpow2.f32 %v1674_v19  ;;  %v4021_v32 = vadd.f32 %v3845_v14, %v1470_v20  ;;  %v1979_v61 = vand.u32 2147483648, %v4013_v18 }
 0x12e   : > { %v1088_v27 = vpop.f32.mrf.mxu2  ;;  %v1955_v31 = vsub.f32 1.0, %v1954_v25  ;;  %v1977_v2 = vand.u32 2147483647, %v4013_v18  ;;  %vm1973_vm1 = vweird.f32 %v4013_v18 }
 0x12f   : > { %v1297_v28 = vpop.f32.mrf.mxu3  ;;  %v1089_v34 = vadd.f32 %v1088_v27, %v880_v23  ;;  %2814 = vst [vmem:[%s3903_s2 + $0x30] sm:$0xff] %v1952_v30  ;;  %v1602_v40 = vsub.f32 0.0, %v4021_v32  ;;  %v1980_v13 = vor.u32 1.1754944e-38, %v1979_v61  ;;  %v422_v30 = vld [vmem:[%s3759_s13 + $0x3d0] sm:$0xff] }
 0x130   : > { %v1956_v38 = vmul.f32 %v3164_v11, %v1955_v31  ;;  %vm1978_vm3 = vcmp.eq.f32.partialorder %v1977_v2, 8.507059e+37  ;;  %v423_v31 = vld [vmem:[%s3759_s13 + $0x3d8] sm:$0xff] }
 0x131   : > { %v1298_v53 = vadd.f32 %v1297_v28, %v1089_v34  ;;  %v1676_v47 = vmul.f32 1.442695, %v1602_v40  ;;  %v420_v40 = vld [vmem:[%s3759_s13 + $0x3c0] sm:$0xff] }
 0x132   : > { %v673_v41 = vpop.f32.mrf.mxu0  ;;  %v3166_v21 = vpop.eup %3165  ;;  %v1957_v46 = vadd.f32 %v3164_v11, %v1956_v38 }
 0x133   : > { %v882_v42 = vpop.f32.mrf.mxu1  ;;  %1138 = vmatmul.f32.gmra.mxu2 %v414_v35  ;;  %1347 = vmatmul.f32.gmra.mxu3 %v415_v37  ;;  %v1969_v49 = vmul.f32 %v3166_v21, %v4013_v18  ;;  %v1471_v50 = vmul.f32 %v3841_v10, %v1298_v53  ;;  %v3168_v51 = vpop.eup %3167  ;;  %3169 = vpow2.f32 %v1676_v47  ;;  %vm1974_vm0 = vweird.f32 %v3166_v21  ;;  %v421_v53 = vld [vmem:[%s3759_s13 + $0x3c8] sm:$0xff] }
 0x134   : > { %v883_v48 = vadd.f32 %v882_v42, %v673_v41  ;;  %v1961_v54 = vsel %vm1960_vm14, %v3164_v11, %v1957_v46  ;;  %v4035_v57 = vadd.f32 1.0, %v3168_v51  ;;  %vm1975_vm2 = vmor %vm1973_vm1, %vm1974_vm0 }
 0x135   : > { %720 = vmatmul.f32.gmra.mxu0 %v412_v43  ;;  %929 = vmatmul.f32.gmra.mxu1 %v413_v44  ;;  %v1966_v52 = vsel %vm1963_vm15, %v1965_v45, %v1961_v54  ;;  %v1970_v56 = vsub.f32 1.0, %v1969_v49  ;;  %v4038_v58 = vadd.f32 %v3845_v14, %v1471_v50 }
 0x136   : > { %v1091_v59 = vpop.f32.mrf.mxu2  ;;  %v1967_v60 = vmul.f32 %v1966_v52, %v3965_v1  ;;  %3171 = vrcp.f32 %v4035_v57  ;;  %v1992_v35 = vand.u32 2147483647, %v4035_v57  ;;  %vm1988_vm5 = vweird.f32 %v4035_v57 }
 0x137   : > { %v1300_v55 = vpop.f32.mrf.mxu3  ;;  %v1092_v63 = vadd.f32 %v1091_v59, %v883_v48  ;;  %v1971_v0 = vmul.f32 %v3166_v21, %v1970_v56  ;;  %v1603_v5 = vsub.f32 0.0, %v4038_v58 }
 0x138   : > { %2815 = vst [vmem:[%s3903_s2 + $0x38] sm:$0xff] %v1967_v60  ;;  %vm1993_vm7 = vcmp.eq.f32.partialorder %v1992_v35, 8.507059e+37  ;;  %v426_v60 = vld [vmem:[%s3759_s13 + $0x3f0] sm:$0xff] }
 0x139   : > { %v1301_v8 = vadd.f32 %v1300_v55, %v1092_v63  ;;  %v1972_v6 = vadd.f32 %v3166_v21, %v1971_v0  ;;  %v3170_v12 = vpop.eup %3169  ;;  %v1678_v15 = vmul.f32 1.442695, %v1603_v5 }
 0x13a   : > { %v676_v1 = vpop.f32.mrf.mxu0  ;;  %v4053_v19 = vadd.f32 1.0, %v3170_v12 }
 0x13b   : > { %v885_v7 = vpop.f32.mrf.mxu1  ;;  %v1472_v16 = vmul.f32 %v3841_v10, %v1301_v8  ;;  %1141 = vmatmul.f32.gmra.mxu2 %v418_v3  ;;  %1350 = vmatmul.f32.gmra.mxu3 %v419_v4  ;;  %v1976_v17 = vsel %vm1975_vm2, %v3166_v21, %v1972_v6  ;;  %3173 = vpow2.f32 %v1678_v15  ;;  %v427_v4 = vld [vmem:[%s3759_s13 + $0x3f8] sm:$0xff] }
 0x13c   : > { %v886_v18 = vadd.f32 %v885_v7, %v676_v1  ;;  %v1981_v20 = vsel %vm1978_vm3, %v1980_v13, %v1976_v17  ;;  %v3172_v22 = vpop.eup %3171  ;;  %3175 = vrcp.f32 %v4053_v19  ;;  %v2007_v59 = vand.u32 2147483647, %v4053_v19  ;;  %v424_v1 = vld [vmem:[%s3759_s13 + $0x3e0] sm:$0xff]  ;;  %v425_v7 = vld [vmem:[%s3759_s13 + $0x3e8] sm:$0xff] }
 0x13d   : > { %v4056_v11 = vadd.f32 %v3845_v14, %v1472_v16  ;;  %723 = vmatmul.f32.gmra.mxu0 %v416_v9  ;;  %932 = vmatmul.f32.gmra.mxu1 %v417_v36  ;;  %v1982_v23 = vmul.f32 %v1981_v20, %v3981_v29  ;;  %v1984_v26 = vmul.f32 %v3172_v22, %v4035_v57  ;;  %v1994_v29 = vand.u32 2147483648, %v4035_v57 }
 0x13e   : > { %v1094_v24 = vpop.f32.mrf.mxu2  ;;  %vm1989_vm4 = vweird.f32 %v3172_v22  ;;  %v2009_v55 = vand.u32 2147483648, %v4053_v19  ;;  %vm2003_vm9 = vweird.f32 %v4053_v19  ;;  %vm2008_vm11 = vcmp.eq.f32.partialorder %v2007_v59, 8.507059e+37 }
 0x13f   : > { %v1303_v25 = vpop.f32.mrf.mxu3  ;;  %v1604_v27 = vsub.f32 0.0, %v4056_v11  ;;  %2816 = vst [vmem:[%s3903_s2 + $0x40] sm:$0xff] %v1982_v23  ;;  %v1095_v28 = vadd.f32 %v1094_v24, %v886_v18  ;;  %v1985_v33 = vsub.f32 1.0, %v1984_v26  ;;  %vm1990_vm6 = vmor %vm1988_vm5, %vm1989_vm4  ;;  %v1995_v45 = vor.u32 1.1754944e-38, %v1994_v29  ;;  %v428_v29 = vld [vmem:[%s3759_s13 + $0x400] sm:$0xff] }
 0x140   : > { %v2010_v15 = vor.u32 1.1754944e-38, %v2009_v55 }
 0x141   : > { %v1680_v34 = vmul.f32 1.442695, %v1604_v27  ;;  %v1304_v37 = vadd.f32 %v1303_v25, %v1095_v28  ;;  %v3174_v41 = vpop.eup %3173  ;;  %v1986_v42 = vmul.f32 %v3172_v22, %v1985_v33  ;;  %v430_v27 = vld [vmem:[%s3759_s13 + $0x410] sm:$0xff] }
 0x142   : > { %v679_v38 = vpop.f32.mrf.mxu0  ;;  %v3176_v44 = vpop.eup %3175  ;;  %v4069_v21 = vadd.f32 1.0, %v3174_v41 }
 0x143   : > { %v888_v39 = vpop.f32.mrf.mxu1  ;;  %3177 = vpow2.f32 %v1680_v34  ;;  %1144 = vmatmul.f32.gmra.mxu2 %v422_v30  ;;  %1353 = vmatmul.f32.gmra.mxu3 %v423_v31  ;;  %v1473_v46 = vmul.f32 %v3841_v10, %v1304_v37  ;;  %v1987_v47 = vadd.f32 %v3172_v22, %v1986_v42  ;;  %v1999_v48 = vmul.f32 %v3176_v44, %v4053_v19  ;;  %v431_v31 = vld [vmem:[%s3759_s13 + $0x418] sm:$0xff]  ;;  %v429_v37 = vld [vmem:[%s3759_s13 + $0x408] sm:$0xff] }
 0x144   : > { %v889_v43 = vadd.f32 %v888_v39, %v679_v38  ;;  %3179 = vrcp.f32 %v4069_v21  ;;  %vm2004_vm8 = vweird.f32 %v3176_v44  ;;  %v2024_v25 = vand.u32 2147483648, %v4069_v21 }
 0x145   : > { %726 = vmatmul.f32.gmra.mxu0 %v420_v40  ;;  %935 = vmatmul.f32.gmra.mxu1 %v421_v53  ;;  %v1991_v51 = vsel %vm1990_vm6, %v3172_v22, %v1987_v47  ;;  %v2000_v54 = vsub.f32 1.0, %v1999_v48  ;;  %v4076_v52 = vadd.f32 %v3845_v14, %v1473_v46  ;;  %vm2005_vm10 = vmor %vm2003_vm9, %vm2004_vm8  ;;  %v2022_v30 = vand.u32 2147483647, %v4069_v21  ;;  %v4108_v53 = vld [vmem:[#allocation7] ss:$0 sm:$0xff] }
 0x146   : > { %v1097_v49 = vpop.f32.mrf.mxu2  ;;  %v1996_v57 = vsel %vm1993_vm7, %v1995_v45, %v1991_v51  ;;  %vm2018_vm13 = vweird.f32 %v4069_v21  ;;  %v2025_v42 = vor.u32 1.1754944e-38, %v2024_v25 }
 0x147   : > { %v1306_v50 = vpop.f32.mrf.mxu3  ;;  %v1098_v56 = vadd.f32 %v1097_v49, %v889_v43  ;;  %v1997_v63 = vmul.f32 %v1996_v57, %v4001_v62  ;;  %v2001_v0 = vmul.f32 %v3176_v44, %v2000_v54  ;;  %v1605_v2 = vsub.f32 0.0, %v4076_v52 }
 0x148   : > { %vm2023_vm15 = vcmp.eq.f32.partialorder %v2022_v30, 8.507059e+37 }
 0x149   : > { %v3178_v61 = vpop.eup %3177  ;;  %v1307_v3 = vadd.f32 %v1306_v50, %v1098_v56  ;;  %2817 = vst [vmem:[%s3903_s2 + $0x48] sm:$0xff] %v1997_v63  ;;  %v2002_v9 = vadd.f32 %v3176_v44, %v2001_v0  ;;  %v1682_v36 = vmul.f32 1.442695, %v1605_v2  ;;  %v435_v0 = vld [vmem:[%s3759_s13 + $0x438] sm:$0xff] }
 0x14a   : > { %v4085_v5 = vadd.f32 1.0, %v3178_v61  ;;  %v682_v8 = vpop.f32.mrf.mxu0  ;;  %v3180_v13 = vpop.eup %3179 }
 0x14b   : > { %v891_v6 = vpop.f32.mrf.mxu1  ;;  %v1474_v12 = vmul.f32 %v3841_v10, %v1307_v3  ;;  %1147 = vmatmul.f32.gmra.mxu2 %v426_v60  ;;  %1356 = vmatmul.f32.gmra.mxu3 %v427_v4  ;;  %v2006_v16 = vsel %vm2005_vm10, %v3176_v44, %v2002_v9  ;;  %v2014_v17 = vmul.f32 %v3180_v13, %v4069_v21  ;;  %vm2019_vm12 = vweird.f32 %v3180_v13  ;;  %v4114_v21 = vld [vmem:[#allocation8] ss:$0 sm:$0xff]  ;;  %v434_v60 = vld [vmem:[%s3759_s13 + $0x430] sm:$0xff] }
 0x14c   : > { %v892_v62 = vadd.f32 %v891_v6, %v682_v8  ;;  %3181 = vrcp.f32 %v4085_v5  ;;  %v2011_v10 = vsel %vm2008_vm11, %v2010_v15, %v2006_v16  ;;  %vm2020_vm14 = vmor %vm2018_vm13, %vm2019_vm12  ;;  %v2037_v49 = vand.u32 2147483647, %v4085_v5  ;;  %v432_v6 = vld [vmem:[%s3759_s13 + $0x420] sm:$0xff] }
 0x14d   : > { %3183 = vpow2.f32 %v1682_v36  ;;  %729 = vmatmul.f32.gmra.mxu0 %v424_v1  ;;  %938 = vmatmul.f32.gmra.mxu1 %v425_v7  ;;  %v4095_v19 = vadd.f32 %v3845_v14, %v1474_v12  ;;  %v2012_v22 = vmul.f32 %v2011_v10, %v4021_v32  ;;  %v2015_v23 = vsub.f32 1.0, %v2014_v17  ;;  %v433_v1 = vld [vmem:[%s3759_s13 + $0x428] sm:$0xff] }
 0x14e   : > { %v1100_v18 = vpop.f32.mrf.mxu2  ;;  %v2039_v50 = vand.u32 2147483648, %v4085_v5  ;;  %vm2033_vm1 = vweird.f32 %v4085_v5  ;;  %vm2038_vm3 = vcmp.eq.f32.partialorder %v2037_v49, 8.507059e+37 }
 0x14f   : > { %v1309_v20 = vpop.f32.mrf.mxu3  ;;  %v1101_v24 = vadd.f32 %v1100_v18, %v892_v62  ;;  %v1606_v26 = vsub.f32 0.0, %v4095_v19  ;;  %2818 = vst [vmem:[%s3903_s2 + $0x50] sm:$0xff] %v2012_v22  ;;  %v2016_v28 = vmul.f32 %v3180_v13, %v2015_v23  ;;  %v438_v23 = vld [vmem:[%s3759_s13 + $0x450] sm:$0xff] }
 0x150   : > { %v2040_v3 = vor.u32 1.1754944e-38, %v2039_v50 }
 0x151   : > { %v1310_v14 = vadd.f32 %v1309_v20, %v1101_v24  ;;  %v1684_v34 = vmul.f32 1.442695, %v1606_v26  ;;  %v2017_v39 = vadd.f32 %v3180_v13, %v2016_v28  ;;  %v439_v28 = vld [vmem:[%s3759_s13 + $0x458] sm:$0xff] }
 0x152   : > { %v3182_v33 = vpop.eup %3181  ;;  %v685_v35 = vpop.f32.mrf.mxu0 }
 0x153   : > { %v894_v32 = vpop.f32.mrf.mxu1  ;;  %v3184_v38 = vpop.eup %3183  ;;  %v2029_v40 = vmul.f32 %v3182_v33, %v4085_v5  ;;  %v1475_v41 = vmul.f32 %v4108_v53, %v1310_v14  ;;  %1150 = vmatmul.f32.gmra.mxu2 %v430_v27  ;;  %3185 = vpow2.f32 %v1684_v34  ;;  %1359 = vmatmul.f32.gmra.mxu3 %v431_v31  ;;  %v2021_v46 = vsel %vm2020_vm14, %v3180_v13, %v2017_v39  ;;  %v436_v34 = vld [vmem:[%s3759_s13 + $0x440] sm:$0xff] }
 0x154   : > { %v4112_v43 = vadd.f32 1.0, %v3184_v38  ;;  %v895_v44 = vadd.f32 %v894_v32, %v685_v35  ;;  %v2026_v45 = vsel %vm2023_vm15, %v2025_v42, %v2021_v46  ;;  %vm2034_vm0 = vweird.f32 %v3182_v33  ;;  %v437_v35 = vld [vmem:[%s3759_s13 + $0x448] sm:$0xff] }
 0x155   : > { %v2030_v47 = vsub.f32 1.0, %v2029_v40  ;;  %v4117_v48 = vadd.f32 %v4114_v21, %v1475_v41  ;;  %732 = vmatmul.f32.gmra.mxu0 %v428_v29  ;;  %941 = vmatmul.f32.gmra.mxu1 %v429_v37  ;;  %v2027_v56 = vmul.f32 %v2026_v45, %v4038_v58  ;;  %vm2035_vm2 = vmor %vm2033_vm1, %vm2034_vm0 }
 0x156   : > { %3187 = vrcp.f32 %v4112_v43  ;;  %v1103_v51 = vpop.f32.mrf.mxu2  ;;  %v2054_v22 = vand.u32 2147483648, %v4112_v43  ;;  %v2052_v26 = vand.u32 2147483647, %v4112_v43  ;;  %vm2048_vm5 = vweird.f32 %v4112_v43 }
 0x157   : > { %v1312_v54 = vpop.f32.mrf.mxu3  ;;  %v2031_v57 = vmul.f32 %v3182_v33, %v2030_v47  ;;  %v1607_v59 = vsub.f32 0.0, %v4117_v48  ;;  %v1104_v55 = vadd.f32 %v1103_v51, %v895_v44  ;;  %2819 = vst [vmem:[%s3903_s2 + $0x58] sm:$0xff] %v2027_v56 }
 0x158   : > { %v2055_v39 = vor.u32 1.1754944e-38, %v2054_v22  ;;  %vm2053_vm7 = vcmp.eq.f32.partialorder %v2052_v26, 8.507059e+37 }
 0x159   : > { %v2032_v61 = vadd.f32 %v3182_v33, %v2031_v57  ;;  %v1686_v63 = vmul.f32 1.442695, %v1607_v59  ;;  %v3186_v2 = vpop.eup %3185  ;;  %v1313_v4 = vadd.f32 %v1312_v54, %v1104_v55  ;;  %v442_v57 = vld [vmem:[%s3759_s13 + $0x470] sm:$0xff]  ;;  %v443_v55 = vld [vmem:[%s3759_s13 + $0x478] sm:$0xff] }
 0x15a   : > { %v688_v58 = vpop.f32.mrf.mxu0  ;;  %v4130_v9 = vadd.f32 1.0, %v3186_v2  ;;  %v440_v2 = vld [vmem:[%s3759_s13 + $0x460] sm:$0xff] }
 0x15b   : > { %v897_v8 = vpop.f32.mrf.mxu1  ;;  %v2036_v7 = vsel %vm2035_vm2, %v3182_v33, %v2032_v61  ;;  %3189 = vpow2.f32 %v1686_v63  ;;  %1153 = vmatmul.f32.gmra.mxu2 %v434_v60  ;;  %v1476_v62 = vmul.f32 %v4108_v53, %v1313_v4  ;;  %1362 = vmatmul.f32.gmra.mxu3 %v435_v0 }
 0x15c   : > { %v898_v36 = vadd.f32 %v897_v8, %v688_v58  ;;  %v3188_v12 = vpop.eup %3187  ;;  %v2041_v5 = vsel %vm2038_vm3, %v2040_v3, %v2036_v7  ;;  %3191 = vrcp.f32 %v4130_v9  ;;  %v2069_v49 = vand.u32 2147483648, %v4130_v9  ;;  %v441_v3 = vld [vmem:[%s3759_s13 + $0x468] sm:$0xff] }
 0x15d   : > { %v2042_v13 = vmul.f32 %v2041_v5, %v4056_v11  ;;  %v2044_v15 = vmul.f32 %v3188_v12, %v4112_v43  ;;  %735 = vmatmul.f32.gmra.mxu0 %v432_v6  ;;  %944 = vmatmul.f32.gmra.mxu1 %v433_v1  ;;  %v4137_v16 = vadd.f32 %v4114_v21, %v1476_v62  ;;  %vm2049_vm4 = vweird.f32 %v3188_v12 }
 0x15e   : > { %v1106_v17 = vpop.f32.mrf.mxu2  ;;  %vm2050_vm6 = vmor %vm2048_vm5, %vm2049_vm4  ;;  %v2067_v54 = vand.u32 2147483647, %v4130_v9  ;;  %vm2063_vm9 = vweird.f32 %v4130_v9  ;;  %v2070_v58 = vor.u32 1.1754944e-38, %v2069_v49 }
 0x15f   : > { %v1315_v10 = vpop.f32.mrf.mxu3  ;;  %2820 = vst [vmem:[%s3903_s2 + $0x60] sm:$0xff] %v2042_v13  ;;  %v2045_v18 = vsub.f32 1.0, %v2044_v15  ;;  %v1107_v20 = vadd.f32 %v1106_v17, %v898_v36  ;;  %v1608_v11 = vsub.f32 0.0, %v4137_v16 }
 0x160   : > { %vm2068_vm11 = vcmp.eq.f32.partialorder %v2067_v54, 8.507059e+37 }
 0x161   : > { %v3190_v24 = vpop.eup %3189  ;;  %v2046_v25 = vmul.f32 %v3188_v12, %v2045_v18  ;;  %v1316_v27 = vadd.f32 %v1315_v10, %v1107_v20  ;;  %v1688_v14 = vmul.f32 1.442695, %v1608_v11  ;;  %v446_v11 = vld [vmem:[%s3759_s13 + $0x490] sm:$0xff] }
 0x162   : > { %v4145_v30 = vadd.f32 1.0, %v3190_v24  ;;  %v691_v31 = vpop.f32.mrf.mxu0  ;;  %v3192_v32 = vpop.eup %3191 }
 0x163   : > { %v900_v33 = vpop.f32.mrf.mxu1  ;;  %v2047_v29 = vadd.f32 %v3188_v12, %v2046_v25  ;;  %v1477_v37 = vmul.f32 %v4108_v53, %v1316_v27  ;;  %1156 = vmatmul.f32.gmra.mxu2 %v438_v23  ;;  %v2059_v40 = vmul.f32 %v3192_v32, %v4130_v9  ;;  %1365 = vmatmul.f32.gmra.mxu3 %v439_v28  ;;  %vm2064_vm8 = vweird.f32 %v3192_v32  ;;  %v447_v25 = vld [vmem:[%s3759_s13 + $0x498] sm:$0xff] }
 0x164   : > { %v901_v38 = vadd.f32 %v900_v33, %v691_v31  ;;  %3193 = vrcp.f32 %v4145_v30  ;;  %vm2065_vm10 = vmor %vm2063_vm9, %vm2064_vm8  ;;  %v2082_v13 = vand.u32 2147483647, %v4145_v30  ;;  %v2084_v15 = vand.u32 2147483648, %v4145_v30  ;;  %v444_v31 = vld [vmem:[%s3759_s13 + $0x480] sm:$0xff]  ;;  %v445_v33 = vld [vmem:[%s3759_s13 + $0x488] sm:$0xff] }
 0x165   : > { %v2051_v41 = vsel %vm2050_vm6, %v3188_v12, %v2047_v29  ;;  %3195 = vpow2.f32 %v1688_v14  ;;  %738 = vmatmul.f32.gmra.mxu0 %v436_v34  ;;  %947 = vmatmul.f32.gmra.mxu1 %v437_v35  ;;  %v2060_v43 = vsub.f32 1.0, %v2059_v40  ;;  %v4155_v44 = vadd.f32 %v4114_v21, %v1477_v37 }
 0x166   : > { %v2056_v42 = vsel %vm2053_vm7, %v2055_v39, %v2051_v41  ;;  %v1109_v46 = vpop.f32.mrf.mxu2  ;;  %vm2078_vm13 = vweird.f32 %v4145_v30  ;;  %vm2083_vm15 = vcmp.eq.f32.partialorder %v2082_v13, 8.507059e+37  ;;  %v2085_v27 = vor.u32 1.1754944e-38, %v2084_v15 }
 0x167   : > { %v1318_v47 = vpop.f32.mrf.mxu3  ;;  %v2057_v45 = vmul.f32 %v2056_v42, %v4076_v52  ;;  %v1110_v50 = vadd.f32 %v1109_v46, %v901_v38  ;;  %v2061_v51 = vmul.f32 %v3192_v32, %v2060_v43  ;;  %v1609_v56 = vsub.f32 0.0, %v4155_v44 }
 0x169   : > { %2821 = vst [vmem:[%s3903_s2 + $0x68] sm:$0xff] %v2057_v45  ;;  %v1319_v59 = vadd.f32 %v1318_v47, %v1110_v50  ;;  %v2062_v61 = vadd.f32 %v3192_v32, %v2061_v51  ;;  %v1690_v52 = vmul.f32 1.442695, %v1609_v56  ;;  %v450_v45 = vld [vmem:[%s3759_s13 + $0x4b0] sm:$0xff]  ;;  %v451_v56 = vld [vmem:[%s3759_s13 + $0x4b8] sm:$0xff] }
 0x16a   : > { %v3194_v60 = vpop.eup %3193  ;;  %v694_v63 = vpop.f32.mrf.mxu0 }
 0x16b   : > { %v903_v0 = vpop.f32.mrf.mxu1  ;;  %v3196_v4 = vpop.eup %3195  ;;  %v2074_v8 = vmul.f32 %v3194_v60, %v4145_v30  ;;  %v1478_v6 = vmul.f32 %v4108_v53, %v1319_v59  ;;  %1159 = vmatmul.f32.gmra.mxu2 %v442_v57  ;;  %v2066_v7 = vsel %vm2065_vm10, %v3192_v32, %v2062_v61  ;;  %3197 = vpow2.f32 %v1690_v52  ;;  %1368 = vmatmul.f32.gmra.mxu3 %v443_v55  ;;  %v448_v61 = vld [vmem:[%s3759_s13 + $0x4a0] sm:$0xff]  ;;  %v449_v52 = vld [vmem:[%s3759_s13 + $0x4a8] sm:$0xff] }
 0x16c   : > { %v904_v1 = vadd.f32 %v903_v0, %v694_v63  ;;  %v4170_v36 = vadd.f32 1.0, %v3196_v4  ;;  %v2071_v9 = vsel %vm2068_vm11, %v2070_v58, %v2066_v7  ;;  %vm2079_vm12 = vweird.f32 %v3194_v60 }
 0x16d   : > { %v2075_v12 = vsub.f32 1.0, %v2074_v8  ;;  %v4173_v5 = vadd.f32 %v4114_v21, %v1478_v6  ;;  %741 = vmatmul.f32.gmra.mxu0 %v440_v2  ;;  %950 = vmatmul.f32.gmra.mxu1 %v441_v3  ;;  %v2072_v62 = vmul.f32 %v2071_v9, %v4095_v19  ;;  %vm2080_vm14 = vmor %vm2078_vm13, %vm2079_vm12 }
 0x16e   : > { %3199 = vrcp.f32 %v4170_v36  ;;  %v1112_v17 = vpop.f32.mrf.mxu2  ;;  %v2099_v47 = vand.u32 2147483648, %v4170_v36  ;;  %v2097_v51 = vand.u32 2147483647, %v4170_v36  ;;  %vm2093_vm1 = vweird.f32 %v4170_v36 }
 0x16f   : > { %v1321_v10 = vpop.f32.mrf.mxu3  ;;  %v2076_v18 = vmul.f32 %v3194_v60, %v2075_v12  ;;  %v1610_v20 = vsub.f32 0.0, %v4173_v5  ;;  %v1113_v22 = vadd.f32 %v1112_v17, %v904_v1  ;;  %2822 = vst [vmem:[%s3903_s2 + $0x70] sm:$0xff] %v2072_v62 }
 0x170   : > { %v2100_v4 = vor.u32 1.1754944e-38, %v2099_v47  ;;  %vm2098_vm3 = vcmp.eq.f32.partialorder %v2097_v51, 8.507059e+37 }
 0x171   : > { %v2077_v23 = vadd.f32 %v3194_v60, %v2076_v18  ;;  %v1692_v19 = vmul.f32 1.442695, %v1610_v20  ;;  %v1322_v24 = vadd.f32 %v1321_v10, %v1113_v22  ;;  %v3198_v26 = vpop.eup %3197  ;;  %v454_v18 = vld [vmem:[%s3759_s13 + $0x4d0] sm:$0xff]  ;;  %v455_v22 = vld [vmem:[%s3759_s13 + $0x4d8] sm:$0xff] }
 0x172   : > { %v697_v28 = vpop.f32.mrf.mxu0  ;;  %v4186_v35 = vadd.f32 1.0, %v3198_v26  ;;  %v453_v26 = vld [vmem:[%s3759_s13 + $0x4c8] sm:$0xff] }
 0x173   : > { %v906_v14 = vpop.f32.mrf.mxu1  ;;  %v2081_v34 = vsel %vm2080_vm14, %v3194_v60, %v2077_v23  ;;  %3201 = vpow2.f32 %v1692_v19  ;;  %v1479_v32 = vmul.f32 %v4108_v53, %v1322_v24  ;;  %1162 = vmatmul.f32.gmra.mxu2 %v446_v11  ;;  %1371 = vmatmul.f32.gmra.mxu3 %v447_v25  ;;  %v452_v25 = vld [vmem:[%s3759_s13 + $0x4c0] sm:$0xff] }
 0x174   : > { %v3200_v30 = vpop.eup %3199  ;;  %v2086_v29 = vsel %vm2083_vm15, %v2085_v27, %v2081_v34  ;;  %v907_v37 = vadd.f32 %v906_v14, %v697_v28  ;;  %3203 = vrcp.f32 %v4186_v35  ;;  %v2114_v62 = vand.u32 2147483648, %v4186_v35 }
 0x175   : > { %v2087_v38 = vmul.f32 %v2086_v29, %v4117_v48  ;;  %v2089_v39 = vmul.f32 %v3200_v30, %v4170_v36  ;;  %744 = vmatmul.f32.gmra.mxu0 %v444_v31  ;;  %953 = vmatmul.f32.gmra.mxu1 %v445_v33  ;;  %v4193_v40 = vadd.f32 %v4114_v21, %v1479_v32  ;;  %vm2094_vm0 = vweird.f32 %v3200_v30 }
 0x176   : > { %v1115_v41 = vpop.f32.mrf.mxu2  ;;  %vm2095_vm2 = vmor %vm2093_vm1, %vm2094_vm0  ;;  %v2112_v17 = vand.u32 2147483647, %v4186_v35  ;;  %vm2108_vm5 = vweird.f32 %v4186_v35  ;;  %v2115_v28 = vor.u32 1.1754944e-38, %v2114_v62 }
 0x177   : > { %v1324_v42 = vpop.f32.mrf.mxu3  ;;  %2823 = vst [vmem:[%s3903_s2 + $0x78] sm:$0xff] %v2087_v38  ;;  %v2090_v43 = vsub.f32 1.0, %v2089_v39  ;;  %v1116_v46 = vadd.f32 %v1115_v41, %v907_v37  ;;  %v1611_v48 = vsub.f32 0.0, %v4193_v40 }
 0x178   : > { %vm2113_vm7 = vcmp.eq.f32.partialorder %v2112_v17, 8.507059e+37 }
 0x179   : > { %v3202_v49 = vpop.eup %3201  ;;  %v2091_v50 = vmul.f32 %v3200_v30, %v2090_v43  ;;  %v1325_v54 = vadd.f32 %v1324_v42, %v1116_v46  ;;  %v1694_v59 = vmul.f32 1.442695, %v1611_v48  ;;  %v458_v48 = vld [vmem:[%s3759_s13 + $0x4f0] sm:$0xff] }
 0x17a   : > { %v4201_v57 = vadd.f32 1.0, %v3202_v49  ;;  %v700_v55 = vpop.f32.mrf.mxu0  ;;  %v3204_v63 = vpop.eup %3203 }
 0x17b   : > { %v909_v60 = vpop.f32.mrf.mxu1  ;;  %v2092_v0 = vadd.f32 %v3200_v30, %v2091_v50  ;;  %v1480_v2 = vmul.f32 %v4108_v53, %v1325_v54  ;;  %1165 = vmatmul.f32.gmra.mxu2 %v450_v45  ;;  %v2104_v58 = vmul.f32 %v3204_v63, %v4186_v35  ;;  %1374 = vmatmul.f32.gmra.mxu3 %v451_v56  ;;  %vm2109_vm4 = vweird.f32 %v3204_v63  ;;  %v459_v50 = vld [vmem:[%s3759_s13 + $0x4f8] sm:$0xff] }
 0x17c   : > { %v910_v3 = vadd.f32 %v909_v60, %v700_v55  ;;  %3205 = vrcp.f32 %v4201_v57  ;;  %vm2110_vm6 = vmor %vm2108_vm5, %vm2109_vm4  ;;  %v2127_v38 = vand.u32 2147483647, %v4201_v57  ;;  %v2129_v39 = vand.u32 2147483648, %v4201_v57  ;;  %v456_v55 = vld [vmem:[%s3759_s13 + $0x4e0] sm:$0xff]  ;;  %v457_v60 = vld [vmem:[%s3759_s13 + $0x4e8] sm:$0xff] }
 0x17d   : > { %v2096_v8 = vsel %vm2095_vm2, %v3200_v30, %v2092_v0  ;;  %3207 = vpow2.f32 %v1694_v59  ;;  %747 = vmatmul.f32.gmra.mxu0 %v448_v61  ;;  %956 = vmatmul.f32.gmra.mxu1 %v449_v52  ;;  %v2105_v1 = vsub.f32 1.0, %v2104_v58  ;;  %v4211_v7 = vadd.f32 %v4114_v21, %v1480_v2 }
 0x17e   : > { %v2101_v6 = vsel %vm2098_vm3, %v2100_v4, %v2096_v8  ;;  %v1118_v36 = vpop.f32.mrf.mxu2  ;;  %vm2123_vm9 = vweird.f32 %v4201_v57  ;;  %vm2128_vm11 = vcmp.eq.f32.partialorder %v2127_v38, 8.507059e+37  ;;  %v2130_v54 = vor.u32 1.1754944e-38, %v2129_v39 }
 0x17f   : > { %v1327_v9 = vpop.f32.mrf.mxu3  ;;  %v2102_v12 = vmul.f32 %v2101_v6, %v4137_v16  ;;  %v1119_v13 = vadd.f32 %v1118_v36, %v910_v3  ;;  %v2106_v15 = vmul.f32 %v3204_v63, %v2105_v1  ;;  %v1612_v10 = vsub.f32 0.0, %v4211_v7 }
 0x181   : > { %2824 = vst [vmem:[%s3903_s2 + $0x80] sm:$0xff] %v2102_v12  ;;  %v1328_v20 = vadd.f32 %v1327_v9, %v1119_v13  ;;  %v2107_v23 = vadd.f32 %v3204_v63, %v2106_v15  ;;  %v1696_v16 = vmul.f32 1.442695, %v1612_v10  ;;  %v462_v12 = vld [vmem:[%s3759_s13 + $0x510] sm:$0xff]  ;;  %v463_v10 = vld [vmem:[%s3759_s13 + $0x518] sm:$0xff] }
 0x182   : > { %v3206_v11 = vpop.eup %3205  ;;  %v703_v19 = vpop.f32.mrf.mxu0 }
 0x183   : > { %v912_v24 = vpop.f32.mrf.mxu1  ;;  %v3208_v27 = vpop.eup %3207  ;;  %v2119_v14 = vmul.f32 %v3206_v11, %v4201_v57  ;;  %v1481_v31 = vmul.f32 %v4108_v53, %v1328_v20  ;;  %1168 = vmatmul.f32.gmra.mxu2 %v454_v18  ;;  %v2111_v34 = vsel %vm2110_vm6, %v3204_v63, %v2107_v23  ;;  %3209 = vpow2.f32 %v1696_v16  ;;  %1377 = vmatmul.f32.gmra.mxu3 %v455_v22  ;;  %v460_v23 = vld [vmem:[%s3759_s13 + $0x500] sm:$0xff]  ;;  %v461_v16 = vld [vmem:[%s3759_s13 + $0x508] sm:$0xff] }
 0x184   : > { %v913_v33 = vadd.f32 %v912_v24, %v703_v19  ;;  %v4226_v32 = vadd.f32 1.0, %v3208_v27  ;;  %v2116_v35 = vsel %vm2113_vm7, %v2115_v28, %v2111_v34  ;;  %vm2124_vm8 = vweird.f32 %v3206_v11 }
 0x185   : > { %v2120_v30 = vsub.f32 1.0, %v2119_v14  ;;  %v4229_v29 = vadd.f32 %v4114_v21, %v1481_v31  ;;  %750 = vmatmul.f32.gmra.mxu0 %v452_v25  ;;  %959 = vmatmul.f32.gmra.mxu1 %v453_v26  ;;  %v2117_v37 = vmul.f32 %v2116_v35, %v4155_v44  ;;  %vm2125_vm10 = vmor %vm2123_vm9, %vm2124_vm8 }
 0x186   : > { %3211 = vrcp.f32 %v4226_v32  ;;  %v1121_v41 = vpop.f32.mrf.mxu2  ;;  %v2144_v9 = vand.u32 2147483648, %v4226_v32  ;;  %v2142_v15 = vand.u32 2147483647, %v4226_v32  ;;  %vm2138_vm13 = vweird.f32 %v4226_v32 }
 0x187   : > { %v1330_v42 = vpop.f32.mrf.mxu3  ;;  %v2121_v43 = vmul.f32 %v3206_v11, %v2120_v30  ;;  %v1613_v46 = vsub.f32 0.0, %v4229_v29  ;;  %v1122_v47 = vadd.f32 %v1121_v41, %v913_v33  ;;  %2825 = vst [vmem:[%s3903_s2 + $0x88] sm:$0xff] %v2117_v37 }
 0x188   : > { %v2145_v27 = vor.u32 1.1754944e-38, %v2144_v9  ;;  %vm2143_vm15 = vcmp.eq.f32.partialorder %v2142_v15, 8.507059e+37 }
 0x189   : > { %v2122_v45 = vadd.f32 %v3206_v11, %v2121_v43  ;;  %v1698_v44 = vmul.f32 1.442695, %v1613_v46  ;;  %v1331_v49 = vadd.f32 %v1330_v42, %v1122_v47  ;;  %v3210_v51 = vpop.eup %3209  ;;  %v466_v43 = vld [vmem:[%s3759_s13 + $0x530] sm:$0xff]  ;;  %v467_v47 = vld [vmem:[%s3759_s13 + $0x538] sm:$0xff] }
 0x18a   : > { %v706_v56 = vpop.f32.mrf.mxu0  ;;  %v4242_v52 = vadd.f32 1.0, %v3210_v51  ;;  %v465_v51 = vld [vmem:[%s3759_s13 + $0x528] sm:$0xff] }
 0x18b   : > { %v915_v59 = vpop.f32.mrf.mxu1  ;;  %v2126_v61 = vsel %vm2125_vm10, %v3206_v11, %v2122_v45  ;;  %3213 = vpow2.f32 %v1698_v44  ;;  %v1482_v63 = vmul.f32 %v4108_v53, %v1331_v49  ;;  %1171 = vmatmul.f32.gmra.mxu2 %v458_v48  ;;  %1380 = vmatmul.f32.gmra.mxu3 %v459_v50  ;;  %v464_v50 = vld [vmem:[%s3759_s13 + $0x520] sm:$0xff] }
 0x18c   : > { %v3212_v57 = vpop.eup %3211  ;;  %v2131_v0 = vsel %vm2128_vm11, %v2130_v54, %v2126_v61  ;;  %v916_v2 = vadd.f32 %v915_v59, %v706_v56  ;;  %3215 = vrcp.f32 %v4242_v52  ;;  %v2159_v37 = vand.u32 2147483648, %v4242_v52 }
 0x18d   : > { %v2132_v3 = vmul.f32 %v2131_v0, %v4173_v5  ;;  %v2134_v4 = vmul.f32 %v3212_v57, %v4226_v32  ;;  %753 = vmatmul.f32.gmra.mxu0 %v456_v55  ;;  %962 = vmatmul.f32.gmra.mxu1 %v457_v60  ;;  %v4249_v58 = vadd.f32 %v4114_v21, %v1482_v63  ;;  %vm2139_vm12 = vweird.f32 %v3212_v57 }
 0x18e   : > { %v1124_v8 = vpop.f32.mrf.mxu2  ;;  %vm2140_vm14 = vmor %vm2138_vm13, %vm2139_vm12  ;;  %v2157_v41 = vand.u32 2147483647, %v4242_v52  ;;  %vm2153_vm1 = vweird.f32 %v4242_v52  ;;  %v2160_v56 = vor.u32 1.1754944e-38, %v2159_v37 }
 0x18f   : > { %v1333_v6 = vpop.f32.mrf.mxu3  ;;  %2826 = vst [vmem:[%s3903_s2 + $0x90] sm:$0xff] %v2132_v3  ;;  %v2135_v1 = vsub.f32 1.0, %v2134_v4  ;;  %v1125_v36 = vadd.f32 %v1124_v8, %v916_v2  ;;  %v1614_v5 = vsub.f32 0.0, %v4249_v58 }
 0x190   : > { %vm2158_vm3 = vcmp.eq.f32.partialorder %v2157_v41, 8.507059e+37 }
 0x191   : > { %v3214_v62 = vpop.eup %3213  ;;  %v2136_v13 = vmul.f32 %v3212_v57, %v2135_v1  ;;  %v1334_v17 = vadd.f32 %v1333_v6, %v1125_v36  ;;  %v1700_v20 = vmul.f32 1.442695, %v1614_v5  ;;  %v470_v5 = vld [vmem:[%s3759_s13 + $0x550] sm:$0xff] }
 0x192   : > { %v4257_v18 = vadd.f32 1.0, %v3214_v62  ;;  %v709_v22 = vpop.f32.mrf.mxu0  ;;  %v3216_v19 = vpop.eup %3215 }
 0x193   : > { %v918_v11 = vpop.f32.mrf.mxu1  ;;  %v2137_v24 = vadd.f32 %v3212_v57, %v2136_v13  ;;  %v1483_v25 = vmul.f32 %v4108_v53, %v1334_v17  ;;  %1174 = vmatmul.f32.gmra.mxu2 %v462_v12  ;;  %v2149_v28 = vmul.f32 %v3216_v19, %v4242_v52  ;;  %1383 = vmatmul.f32.gmra.mxu3 %v463_v10  ;;  %vm2154_vm0 = vweird.f32 %v3216_v19  ;;  %v471_v13 = vld [vmem:[%s3759_s13 + $0x558] sm:$0xff] }
 0x194   : > { %v919_v26 = vadd.f32 %v918_v11, %v709_v22  ;;  %3217 = vrcp.f32 %v4257_v18  ;;  %vm2155_vm2 = vmor %vm2153_vm1, %vm2154_vm0  ;;  %v2172_v3 = vand.u32 2147483647, %v4257_v18  ;;  %v2174_v4 = vand.u32 2147483648, %v4257_v18  ;;  %v468_v22 = vld [vmem:[%s3759_s13 + $0x540] sm:$0xff]  ;;  %v469_v11 = vld [vmem:[%s3759_s13 + $0x548] sm:$0xff] }
 0x195   : > { %v2141_v14 = vsel %vm2140_vm14, %v3212_v57, %v2137_v24  ;;  %3219 = vpow2.f32 %v1700_v20  ;;  %756 = vmatmul.f32.gmra.mxu0 %v460_v23  ;;  %965 = vmatmul.f32.gmra.mxu1 %v461_v16  ;;  %v2150_v33 = vsub.f32 1.0, %v2149_v28  ;;  %v4267_v34 = vadd.f32 %v4114_v21, %v1483_v25 }
 0x196   : > { %v2146_v31 = vsel %vm2143_vm15, %v2145_v27, %v2141_v14  ;;  %v1127_v32 = vpop.f32.mrf.mxu2  ;;  %vm2168_vm5 = vweird.f32 %v4257_v18  ;;  %vm2173_vm7 = vcmp.eq.f32.partialorder %v2172_v3, 8.507059e+37  ;;  %v2175_v17 = vor.u32 1.1754944e-38, %v2174_v4 }
 0x197   : > { %v1336_v35 = vpop.f32.mrf.mxu3  ;;  %v2147_v30 = vmul.f32 %v2146_v31, %v4193_v40  ;;  %v1128_v38 = vadd.f32 %v1127_v32, %v919_v26  ;;  %v2151_v39 = vmul.f32 %v3216_v19, %v2150_v33  ;;  %v1615_v42 = vsub.f32 0.0, %v4267_v34 }
 0x199   : > { %2827 = vst [vmem:[%s3903_s2 + $0x98] sm:$0xff] %v2147_v30  ;;  %v1337_v46 = vadd.f32 %v1336_v35, %v1128_v38  ;;  %v2152_v45 = vadd.f32 %v3216_v19, %v2151_v39  ;;  %v1702_v40 = vmul.f32 1.442695, %v1615_v42  ;;  %v474_v30 = vld [vmem:[%s3759_s13 + $0x570] sm:$0xff]  ;;  %v475_v42 = vld [vmem:[%s3759_s13 + $0x578] sm:$0xff] }
 0x19a   : > { %v3218_v48 = vpop.eup %3217  ;;  %v712_v44 = vpop.f32.mrf.mxu0 }
 0x19b   : > { %v921_v49 = vpop.f32.mrf.mxu1  ;;  %v3220_v54 = vpop.eup %3219  ;;  %v2164_v59 = vmul.f32 %v3218_v48, %v4257_v18  ;;  %v1484_v55 = vmul.f32 %v4108_v53, %v1337_v46  ;;  %1177 = vmatmul.f32.gmra.mxu2 %v466_v43  ;;  %v2156_v61 = vsel %vm2155_vm2, %v3216_v19, %v2152_v45  ;;  %3221 = vpow2.f32 %v1702_v40  ;;  %1386 = vmatmul.f32.gmra.mxu3 %v467_v47  ;;  %v472_v45 = vld [vmem:[%s3759_s13 + $0x560] sm:$0xff]  ;;  %v473_v40 = vld [vmem:[%s3759_s13 + $0x568] sm:$0xff] }
 0x19c   : > { %v922_v60 = vadd.f32 %v921_v49, %v712_v44  ;;  %v4282_v63 = vadd.f32 1.0, %v3220_v54  ;;  %v2161_v52 = vsel %vm2158_vm3, %v2160_v56, %v2156_v61  ;;  %vm2169_vm4 = vweird.f32 %v3218_v48 }
 0x19d   : > { %v2165_v57 = vsub.f32 1.0, %v2164_v59  ;;  %v4285_v0 = vadd.f32 %v4114_v21, %v1484_v55  ;;  %759 = vmatmul.f32.gmra.mxu0 %v464_v50  ;;  %968 = vmatmul.f32.gmra.mxu1 %v465_v51  ;;  %v2162_v2 = vmul.f32 %v2161_v52, %v4211_v7  ;;  %vm2170_vm6 = vmor %vm2168_vm5, %vm2169_vm4 }
 0x19e   : > { %3223 = vrcp.f32 %v4282_v63  ;;  %v1130_v8 = vpop.f32.mrf.mxu2  ;;  %v2189_v35 = vand.u32 2147483648, %v4282_v63  ;;  %v2187_v39 = vand.u32 2147483647, %v4282_v63  ;;  %vm2183_vm9 = vweird.f32 %v4282_v63 }
 0x19f   : > { %v1339_v6 = vpop.f32.mrf.mxu3  ;;  %v2166_v1 = vmul.f32 %v3218_v48, %v2165_v57  ;;  %v1616_v36 = vsub.f32 0.0, %v4285_v0  ;;  %v1131_v9 = vadd.f32 %v1130_v8, %v922_v60  ;;  %2828 = vst [vmem:[%s3903_s2 + $0xa0] sm:$0xff] %v2162_v2 }
 0x1a0   : > { %v2190_v54 = vor.u32 1.1754944e-38, %v2189_v35  ;;  %vm2188_vm11 = vcmp.eq.f32.partialorder %v2187_v39, 8.507059e+37 }
 0x1a1   : > { %v2167_v12 = vadd.f32 %v3218_v48, %v2166_v1  ;;  %v1704_v7 = vmul.f32 1.442695, %v1616_v36  ;;  %v1340_v62 = vadd.f32 %v1339_v6, %v1131_v9  ;;  %v3222_v15 = vpop.eup %3221  ;;  %v478_v1 = vld [vmem:[%s3759_s13 + $0x590] sm:$0xff]  ;;  %v479_v9 = vld [vmem:[%s3759_s13 + $0x598] sm:$0xff] }
 0x1a2   : > { %v715_v10 = vpop.f32.mrf.mxu0  ;;  %v4298_v16 = vadd.f32 1.0, %v3222_v15  ;;  %v477_v15 = vld [vmem:[%s3759_s13 + $0x588] sm:$0xff] }
 0x1a3   : > { %v924_v20 = vpop.f32.mrf.mxu1  ;;  %v2171_v23 = vsel %vm2170_vm6, %v3218_v48, %v2167_v12  ;;  %3225 = vpow2.f32 %v1704_v7  ;;  %v1485_v19 = vmul.f32 %v4108_v53, %v1340_v62  ;;  %1180 = vmatmul.f32.gmra.mxu2 %v470_v5  ;;  %1389 = vmatmul.f32.gmra.mxu3 %v471_v13  ;;  %v476_v13 = vld [vmem:[%s3759_s13 + $0x580] sm:$0xff] }
 0x1a4   : > { %v3224_v18 = vpop.eup %3223  ;;  %v2176_v24 = vsel %vm2173_vm7, %v2175_v17, %v2171_v23  ;;  %v925_v25 = vadd.f32 %v924_v20, %v715_v10  ;;  %3227 = vrcp.f32 %v4298_v16  ;;  %v2204_v2 = vand.u32 2147483648, %v4298_v16 }
 0x1a5   : > { %v2177_v26 = vmul.f32 %v2176_v24, %v4229_v29  ;;  %v2179_v27 = vmul.f32 %v3224_v18, %v4282_v63  ;;  %762 = vmatmul.f32.gmra.mxu0 %v468_v22  ;;  %971 = vmatmul.f32.gmra.mxu1 %v469_v11  ;;  %v4305_v28 = vadd.f32 %v4114_v21, %v1485_v19  ;;  %vm2184_vm8 = vweird.f32 %v3224_v18 }
 0x1a6   : > { %v1133_v14 = vpop.f32.mrf.mxu2  ;;  %vm2185_vm10 = vmor %vm2183_vm9, %vm2184_vm8  ;;  %v2202_v8 = vand.u32 2147483647, %v4298_v16  ;;  %vm2198_vm13 = vweird.f32 %v4298_v16  ;;  %v2205_v10 = vor.u32 1.1754944e-38, %v2204_v2 }
 0x1a7   : > { %v1342_v31 = vpop.f32.mrf.mxu3  ;;  %2829 = vst [vmem:[%s3903_s2 + $0xa8] sm:$0xff] %v2177_v26  ;;  %v2180_v33 = vsub.f32 1.0, %v2179_v27  ;;  %v1134_v32 = vadd.f32 %v1133_v14, %v925_v25  ;;  %v1617_v29 = vsub.f32 0.0, %v4305_v28 }
 0x1a8   : > { %vm2203_vm15 = vcmp.eq.f32.partialorder %v2202_v8, 8.507059e+37 }
 0x1a9   : > { %v3226_v37 = vpop.eup %3225  ;;  %v2181_v38 = vmul.f32 %v3224_v18, %v2180_v33  ;;  %v1343_v41 = vadd.f32 %v1342_v31, %v1134_v32  ;;  %v1706_v46 = vmul.f32 1.442695, %v1617_v29  ;;  %v482_v29 = vld [vmem:[%s3759_s13 + $0x5b0] sm:$0xff] }
 0x1aa   : > { %v4313_v43 = vadd.f32 1.0, %v3226_v37  ;;  %v718_v47 = vpop.f32.mrf.mxu0  ;;  %v3228_v44 = vpop.eup %3227 }
 0x1ab   : > { %v927_v48 = vpop.f32.mrf.mxu1  ;;  %v2182_v49 = vadd.f32 %v3224_v18, %v2181_v38  ;;  %v1486_v50 = vmul.f32 %v4108_v53, %v1343_v41  ;;  %1183 = vmatmul.f32.gmra.mxu2 %v474_v30  ;;  %v2194_v56 = vmul.f32 %v3228_v44, %v4298_v16  ;;  %1392 = vmatmul.f32.gmra.mxu3 %v475_v42  ;;  %vm2199_vm12 = vweird.f32 %v3228_v44  ;;  %v483_v38 = vld [vmem:[%s3759_s13 + $0x5b8] sm:$0xff] }
 0x1ac   : > { %v928_v51 = vadd.f32 %v927_v48, %v718_v47  ;;  %3229 = vrcp.f32 %v4313_v43  ;;  %vm2200_vm14 = vmor %vm2198_vm13, %vm2199_vm12  ;;  %v2217_v26 = vand.u32 2147483647, %v4313_v43  ;;  %v2219_v27 = vand.u32 2147483648, %v4313_v43  ;;  %v480_v47 = vld [vmem:[%s3759_s13 + $0x5a0] sm:$0xff]  ;;  %v481_v48 = vld [vmem:[%s3759_s13 + $0x5a8] sm:$0xff] }
 0x1ad   : > { %v2186_v59 = vsel %vm2185_vm10, %v3224_v18, %v2182_v49  ;;  %3231 = vpow2.f32 %v1706_v46  ;;  %765 = vmatmul.f32.gmra.mxu0 %v472_v45  ;;  %974 = vmatmul.f32.gmra.mxu1 %v473_v40  ;;  %v2195_v60 = vsub.f32 1.0, %v2194_v56  ;;  %v4323_v61 = vadd.f32 %v4114_v21, %v1486_v50 }
 0x1ae   : > { %v2191_v55 = vsel %vm2188_vm11, %v2190_v54, %v2186_v59  ;;  %v1136_v63 = vpop.f32.mrf.mxu2  ;;  %vm2213_vm1 = vweird.f32 %v4313_v43  ;;  %vm2218_vm3 = vcmp.eq.f32.partialorder %v2217_v26, 8.507059e+37  ;;  %v2220_v41 = vor.u32 1.1754944e-38, %v2219_v27 }
 0x1af   : > { %v1345_v52 = vpop.f32.mrf.mxu3  ;;  %v2192_v57 = vmul.f32 %v2191_v55, %v4249_v58  ;;  %v1137_v3 = vadd.f32 %v1136_v63, %v928_v51  ;;  %v2196_v4 = vmul.f32 %v3228_v44, %v2195_v60  ;;  %v1618_v6 = vsub.f32 0.0, %v4323_v61 }
 0x1b1   : > { %2830 = vst [vmem:[%s3903_s2 + $0xb0] sm:$0xff] %v2192_v57  ;;  %v1346_v36 = vadd.f32 %v1345_v52, %v1137_v3  ;;  %v2197_v12 = vadd.f32 %v3228_v44, %v2196_v4  ;;  %v1708_v58 = vmul.f32 1.442695, %v1618_v6  ;;  %v486_v52 = vld [vmem:[%s3759_s13 + $0x5d0] sm:$0xff] }
 0x1b2   : > { %v3230_v5 = vpop.eup %3229  ;;  %v721_v7 = vpop.f32.mrf.mxu0 }
 0x1b3   : > { %v930_v62 = vpop.f32.mrf.mxu1  ;;  %v3232_v17 = vpop.eup %3231  ;;  %v2209_v20 = vmul.f32 %v3230_v5, %v4313_v43  ;;  %v1487_v22 = vmul.f32 %v4108_v53, %v1346_v36  ;;  %1186 = vmatmul.f32.gmra.mxu2 %v478_v1  ;;  %v2201_v23 = vsel %vm2200_vm14, %v3228_v44, %v2197_v12  ;;  %3233 = vpow2.f32 %v1708_v58  ;;  %1395 = vmatmul.f32.gmra.mxu3 %v479_v9  ;;  %v484_v9 = vld [vmem:[%s3759_s13 + $0x5c0] sm:$0xff] }
 0x1b4   : > { %v931_v11 = vadd.f32 %v930_v62, %v721_v7  ;;  %v4338_v19 = vadd.f32 1.0, %v3232_v17  ;;  %v2206_v16 = vsel %vm2203_vm15, %v2205_v10, %v2201_v23  ;;  %vm2214_vm0 = vweird.f32 %v3230_v5  ;;  %v4374_v7 = vld [vmem:[#allocation7] ss:$0 sm:$0xff] }
 0x1b5   : > { %v2210_v18 = vsub.f32 1.0, %v2209_v20  ;;  %v4341_v24 = vadd.f32 %v4114_v21, %v1487_v22  ;;  %768 = vmatmul.f32.gmra.mxu0 %v476_v13  ;;  %977 = vmatmul.f32.gmra.mxu1 %v477_v15  ;;  %v2207_v25 = vmul.f32 %v2206_v16, %v4267_v34  ;;  %vm2215_vm2 = vmor %vm2213_vm1, %vm2214_vm0 }
 0x1b6   : > { %3235 = vrcp.f32 %v4338_v19  ;;  %v1139_v14 = vpop.f32.mrf.mxu2  ;;  %v2234_v63 = vand.u32 2147483648, %v4338_v19  ;;  %v2232_v3 = vand.u32 2147483647, %v4338_v19  ;;  %vm2228_vm5 = vweird.f32 %v4338_v19 }
 0x1b7   : > { %v1348_v31 = vpop.f32.mrf.mxu3  ;;  %v2211_v33 = vmul.f32 %v3230_v5, %v2210_v18  ;;  %v1619_v32 = vsub.f32 0.0, %v4341_v24  ;;  %v1140_v35 = vadd.f32 %v1139_v14, %v931_v11  ;;  %2831 = vst [vmem:[%s3903_s2 + $0xb8] sm:$0xff] %v2207_v25  ;;  %v4380_v11 = vld [vmem:[#allocation8] ss:$0 sm:$0xff] }
 0x1b8   : > { %v2235_v15 = vor.u32 1.1754944e-38, %v2234_v63  ;;  %vm2233_vm7 = vcmp.eq.f32.partialorder %v2232_v3, 8.507059e+37 }
 0x1b9   : > { %v2212_v30 = vadd.f32 %v3230_v5, %v2211_v33  ;;  %v1710_v34 = vmul.f32 1.442695, %v1619_v32  ;;  %v1349_v37 = vadd.f32 %v1348_v31, %v1140_v35  ;;  %v3234_v39 = vpop.eup %3233  ;;  %v490_v33 = vld [vmem:[%s3759_s13 + $0x5f0] sm:$0xff]  ;;  %v491_v35 = vld [vmem:[%s3759_s13 + $0x5f8] sm:$0xff] }
 0x1ba   : > { %v724_v42 = vpop.f32.mrf.mxu0  ;;  %v4354_v40 = vadd.f32 1.0, %v3234_v39  ;;  %v489_v39 = vld [vmem:[%s3759_s13 + $0x5e8] sm:$0xff] }
 0x1bb   : > { %v933_v46 = vpop.f32.mrf.mxu1  ;;  %v2216_v45 = vsel %vm2215_vm2, %v3230_v5, %v2212_v30  ;;  %3237 = vpow2.f32 %v1710_v34  ;;  %v1488_v44 = vmul.f32 %v4108_v53, %v1349_v37  ;;  %1189 = vmatmul.f32.gmra.mxu2 %v482_v29  ;;  %1398 = vmatmul.f32.gmra.mxu3 %v483_v38  ;;  %v485_v5 = vld [vmem:[%s3759_s13 + $0x5c8] sm:$0xff]  ;;  %v488_v38 = vld [vmem:[%s3759_s13 + $0x5e0] sm:$0xff] }
 0x1bc   : > { %v3236_v43 = vpop.eup %3235  ;;  %v2221_v49 = vsel %vm2218_vm3, %v2220_v41, %v2216_v45  ;;  %v934_v50 = vadd.f32 %v933_v46, %v724_v42  ;;  %3239 = vrcp.f32 %v4354_v40  ;;  %v2249_v25 = vand.u32 2147483648, %v4354_v40 }
 0x1bd   : > { %v2222_v51 = vmul.f32 %v2221_v49, %v4285_v0  ;;  %v2224_v54 = vmul.f32 %v3236_v43, %v4338_v19  ;;  %771 = vmatmul.f32.gmra.mxu0 %v480_v47  ;;  %980 = vmatmul.f32.gmra.mxu1 %v481_v48  ;;  %v4361_v56 = vadd.f32 %v4114_v21, %v1488_v44  ;;  %vm2229_vm4 = vweird.f32 %v3236_v43  ;;  %v487_v21 = vld [vmem:[%s3759_s13 + $0x5d8] sm:$0xff] }
 0x1be   : > { %v1142_v59 = vpop.f32.mrf.mxu2  ;;  %vm2230_vm6 = vmor %vm2228_vm5, %vm2229_vm4  ;;  %v2247_v14 = vand.u32 2147483647, %v4354_v40  ;;  %vm2243_vm9 = vweird.f32 %v4354_v40  ;;  %v2250_v42 = vor.u32 1.1754944e-38, %v2249_v25 }
 0x1bf   : > { %v1351_v53 = vpop.f32.mrf.mxu3  ;;  %2832 = vst [vmem:[%s3903_s2 + $0xc0] sm:$0xff] %v2222_v51  ;;  %v2225_v55 = vsub.f32 1.0, %v2224_v54  ;;  %v1143_v60 = vadd.f32 %v1142_v59, %v934_v50  ;;  %v1620_v0 = vsub.f32 0.0, %v4361_v56 }
 0x1c0   : > { %vm2248_vm11 = vcmp.eq.f32.partialorder %v2247_v14, 8.507059e+37 }
 0x1c1   : > { %v3238_v57 = vpop.eup %3237  ;;  %v2226_v2 = vmul.f32 %v3236_v43, %v2225_v55  ;;  %v1352_v4 = vadd.f32 %v1351_v53, %v1143_v60  ;;  %v1712_v6 = vmul.f32 1.442695, %v1620_v0  ;;  %v494_v0 = vld [vmem:[%s3759_s13 + $0x610] sm:$0xff] }
 0x1c2   : > { %v4369_v8 = vadd.f32 1.0, %v3238_v57  ;;  %v727_v1 = vpop.f32.mrf.mxu0  ;;  %v3240_v12 = vpop.eup %3239 }
 0x1c3   : > { %v936_v36 = vpop.f32.mrf.mxu1  ;;  %v2227_v58 = vadd.f32 %v3236_v43, %v2226_v2  ;;  %v1489_v62 = vmul.f32 %v4374_v7, %v1352_v4  ;;  %1192 = vmatmul.f32.gmra.mxu2 %v486_v52  ;;  %v2239_v17 = vmul.f32 %v3240_v12, %v4354_v40  ;;  %1401 = vmatmul.f32.gmra.mxu3 %v487_v21  ;;  %vm2244_vm8 = vweird.f32 %v3240_v12  ;;  %v495_v2 = vld [vmem:[%s3759_s13 + $0x618] sm:$0xff] }
 0x1c4   : > { %v937_v13 = vadd.f32 %v936_v36, %v727_v1  ;;  %3241 = vrcp.f32 %v4369_v8  ;;  %vm2245_vm10 = vmor %vm2243_vm9, %vm2244_vm8  ;;  %v2262_v51 = vand.u32 2147483647, %v4369_v8  ;;  %v2264_v54 = vand.u32 2147483648, %v4369_v8  ;;  %v492_v1 = vld [vmem:[%s3759_s13 + $0x600] sm:$0xff]  ;;  %v493_v36 = vld [vmem:[%s3759_s13 + $0x608] sm:$0xff] }
 0x1c5   : > { %v2231_v10 = vsel %vm2230_vm6, %v3236_v43, %v2227_v58  ;;  %3243 = vpow2.f32 %v1712_v6  ;;  %774 = vmatmul.f32.gmra.mxu0 %v484_v9  ;;  %983 = vmatmul.f32.gmra.mxu1 %v485_v5  ;;  %v2240_v22 = vsub.f32 1.0, %v2239_v17  ;;  %v4383_v23 = vadd.f32 %v4380_v11, %v1489_v62 }
 0x1c6   : > { %v2236_v20 = vsel %vm2233_vm7, %v2235_v15, %v2231_v10  ;;  %v1145_v19 = vpop.f32.mrf.mxu2  ;;  %vm2258_vm13 = vweird.f32 %v4369_v8  ;;  %vm2263_vm15 = vcmp.eq.f32.partialorder %v2262_v51, 8.507059e+37  ;;  %v2265_v4 = vor.u32 1.1754944e-38, %v2264_v54 }
 0x1c7   : > { %v1354_v16 = vpop.f32.mrf.mxu3  ;;  %v2237_v18 = vmul.f32 %v2236_v20, %v4305_v28  ;;  %v1146_v26 = vadd.f32 %v1145_v19, %v937_v13  ;;  %v2241_v27 = vmul.f32 %v3240_v12, %v2240_v22  ;;  %v1621_v31 = vsub.f32 0.0, %v4383_v23 }
 0x1c9   : > { %2833 = vst [vmem:[%s3903_s2 + $0xc8] sm:$0xff] %v2237_v18  ;;  %v1355_v32 = vadd.f32 %v1354_v16, %v1146_v26  ;;  %v2242_v30 = vadd.f32 %v3240_v12, %v2241_v27  ;;  %v1714_v28 = vmul.f32 1.442695, %v1621_v31  ;;  %v498_v18 = vld [vmem:[%s3759_s13 + $0x630] sm:$0xff]  ;;  %v499_v31 = vld [vmem:[%s3759_s13 + $0x638] sm:$0xff] }
 0x1ca   : > { %v3242_v29 = vpop.eup %3241  ;;  %v730_v34 = vpop.f32.mrf.mxu0 }
 0x1cb   : > { %v939_v37 = vpop.f32.mrf.mxu1  ;;  %v3244_v41 = vpop.eup %3243  ;;  %v2254_v46 = vmul.f32 %v3242_v29, %v4369_v8  ;;  %v1490_v47 = vmul.f32 %v4374_v7, %v1355_v32  ;;  %1195 = vmatmul.f32.gmra.mxu2 %v490_v33  ;;  %v2246_v45 = vsel %vm2245_vm10, %v3240_v12, %v2242_v30  ;;  %3245 = vpow2.f32 %v1714_v28  ;;  %1404 = vmatmul.f32.gmra.mxu3 %v491_v35  ;;  %v496_v30 = vld [vmem:[%s3759_s13 + $0x620] sm:$0xff]  ;;  %v497_v28 = vld [vmem:[%s3759_s13 + $0x628] sm:$0xff] }
 0x1cc   : > { %v940_v48 = vadd.f32 %v939_v37, %v730_v34  ;;  %v4398_v44 = vadd.f32 1.0, %v3244_v41  ;;  %v2251_v40 = vsel %vm2248_vm11, %v2250_v42, %v2246_v45  ;;  %vm2259_vm12 = vweird.f32 %v3242_v29 }
 0x1cd   : > { %v2255_v43 = vsub.f32 1.0, %v2254_v46  ;;  %v4401_v49 = vadd.f32 %v4380_v11, %v1490_v47  ;;  %777 = vmatmul.f32.gmra.mxu0 %v488_v38  ;;  %986 = vmatmul.f32.gmra.mxu1 %v489_v39  ;;  %v2252_v50 = vmul.f32 %v2251_v40, %v4323_v61  ;;  %vm2260_vm14 = vmor %vm2258_vm13, %vm2259_vm12 }
 0x1ce   : > { %3247 = vrcp.f32 %v4398_v44  ;;  %v1148_v59 = vpop.f32.mrf.mxu2  ;;  %v2279_v16 = vand.u32 2147483648, %v4398_v44  ;;  %v2277_v27 = vand.u32 2147483647, %v4398_v44  ;;  %vm2273_vm1 = vweird.f32 %v4398_v44 }
 0x1cf   : > { %v2256_v53 = vmul.f32 %v3242_v29, %v2255_v43  ;;  %v1622_v55 = vsub.f32 0.0, %v4401_v49  ;;  %v1149_v60 = vadd.f32 %v1148_v59, %v940_v48  ;;  %v1357_v63 = vpop.f32.mrf.mxu3  ;;  %2834 = vst [vmem:[%s3903_s2 + $0xd0] sm:$0xff] %v2252_v50 }
 0x1d0   : > { %v2280_v41 = vor.u32 1.1754944e-38, %v2279_v16  ;;  %vm2278_vm3 = vcmp.eq.f32.partialorder %v2277_v27, 8.507059e+37 }
 0x1d1   : > { %v2257_v52 = vadd.f32 %v3242_v29, %v2256_v53  ;;  %v1716_v61 = vmul.f32 1.442695, %v1622_v55  ;;  %v1358_v57 = vadd.f32 %v1357_v63, %v1149_v60  ;;  %v3246_v3 = vpop.eup %3245  ;;  %v502_v55 = vld [vmem:[%s3759_s13 + $0x650] sm:$0xff]  ;;  %v503_v63 = vld [vmem:[%s3759_s13 + $0x658] sm:$0xff] }
 0x1d2   : > { %v733_v21 = vpop.f32.mrf.mxu0  ;;  %v4414_v5 = vadd.f32 1.0, %v3246_v3  ;;  %v501_v3 = vld [vmem:[%s3759_s13 + $0x648] sm:$0xff] }
 0x1d3   : > { %v942_v6 = vpop.f32.mrf.mxu1  ;;  %v2261_v9 = vsel %vm2260_vm14, %v3242_v29, %v2257_v52  ;;  %3249 = vpow2.f32 %v1716_v61  ;;  %v1491_v12 = vmul.f32 %v4374_v7, %v1358_v57  ;;  %1198 = vmatmul.f32.gmra.mxu2 %v494_v0  ;;  %1407 = vmatmul.f32.gmra.mxu3 %v495_v2  ;;  %v500_v2 = vld [vmem:[%s3759_s13 + $0x640] sm:$0xff] }
 0x1d4   : > { %v3248_v8 = vpop.eup %3247  ;;  %v2266_v58 = vsel %vm2263_vm15, %v2265_v4, %v2261_v9  ;;  %v943_v62 = vadd.f32 %v942_v6, %v733_v21  ;;  %3251 = vrcp.f32 %v4414_v5  ;;  %v2294_v43 = vand.u32 2147483648, %v4414_v5 }
 0x1d5   : > { %v2267_v13 = vmul.f32 %v2266_v58, %v4341_v24  ;;  %v2269_v15 = vmul.f32 %v3248_v8, %v4398_v44  ;;  %780 = vmatmul.f32.gmra.mxu0 %v492_v1  ;;  %989 = vmatmul.f32.gmra.mxu1 %v493_v36  ;;  %v4421_v17 = vadd.f32 %v4380_v11, %v1491_v12  ;;  %vm2274_vm0 = vweird.f32 %v3248_v8 }
 0x1d6   : > { %v1151_v10 = vpop.f32.mrf.mxu2  ;;  %vm2275_vm2 = vmor %vm2273_vm1, %vm2274_vm0  ;;  %v2292_v59 = vand.u32 2147483647, %v4414_v5  ;;  %vm2288_vm5 = vweird.f32 %v4414_v5  ;;  %v2295_v21 = vor.u32 1.1754944e-38, %v2294_v43  ;;  %v510_v43 = vld [vmem:[%s3759_s13 + $0x690] sm:$0xff] }
 0x1d7   : > { %2835 = vst [vmem:[%s3903_s2 + $0xd8] sm:$0xff] %v2267_v13  ;;  %v2270_v20 = vsub.f32 1.0, %v2269_v15  ;;  %v1152_v22 = vadd.f32 %v1151_v10, %v943_v62  ;;  %v1360_v19 = vpop.f32.mrf.mxu3  ;;  %v1623_v24 = vsub.f32 0.0, %v4421_v17 }
 0x1d8   : > { %vm2293_vm7 = vcmp.eq.f32.partialorder %v2292_v59, 8.507059e+37 }
 0x1d9   : > { %v3250_v25 = vpop.eup %3249  ;;  %v2271_v26 = vmul.f32 %v3248_v8, %v2270_v20  ;;  %v1361_v14 = vadd.f32 %v1360_v19, %v1152_v22  ;;  %v1718_v32 = vmul.f32 1.442695, %v1623_v24  ;;  %v506_v24 = vld [vmem:[%s3759_s13 + $0x670] sm:$0xff] }
 0x1da   : > { %v4429_v33 = vadd.f32 1.0, %v3250_v25  ;;  %v736_v35 = vpop.f32.mrf.mxu0  ;;  %v3252_v34 = vpop.eup %3251 }
 0x1db   : > { %v945_v29 = vpop.f32.mrf.mxu1  ;;  %v2272_v37 = vadd.f32 %v3248_v8, %v2271_v26  ;;  %v1492_v38 = vmul.f32 %v4374_v7, %v1361_v14  ;;  %1201 = vmatmul.f32.gmra.mxu2 %v498_v18  ;;  %v2284_v42 = vmul.f32 %v3252_v34, %v4414_v5  ;;  %1410 = vmatmul.f32.gmra.mxu3 %v499_v31  ;;  %vm2289_vm4 = vweird.f32 %v3252_v34  ;;  %v507_v26 = vld [vmem:[%s3759_s13 + $0x678] sm:$0xff] }
 0x1dc   : > { %v946_v39 = vadd.f32 %v945_v29, %v736_v35  ;;  %3253 = vrcp.f32 %v4429_v33  ;;  %vm2290_vm6 = vmor %vm2288_vm5, %vm2289_vm4  ;;  %v2307_v13 = vand.u32 2147483647, %v4429_v33  ;;  %v2309_v15 = vand.u32 2147483648, %v4429_v33  ;;  %v504_v35 = vld [vmem:[%s3759_s13 + $0x660] sm:$0xff]  ;;  %v505_v29 = vld [vmem:[%s3759_s13 + $0x668] sm:$0xff] }
 0x1dd   : > { %v2276_v46 = vsel %vm2275_vm2, %v3248_v8, %v2272_v37  ;;  %3255 = vpow2.f32 %v1718_v32  ;;  %783 = vmatmul.f32.gmra.mxu0 %v496_v30  ;;  %992 = vmatmul.f32.gmra.mxu1 %v497_v28  ;;  %v2285_v48 = vsub.f32 1.0, %v2284_v42  ;;  %v4439_v45 = vadd.f32 %v4380_v11, %v1492_v38 }
 0x1de   : > { %v2281_v47 = vsel %vm2278_vm3, %v2280_v41, %v2276_v46  ;;  %v1154_v44 = vpop.f32.mrf.mxu2  ;;  %vm2303_vm9 = vweird.f32 %v4429_v33  ;;  %vm2308_vm11 = vcmp.eq.f32.partialorder %v2307_v13, 8.507059e+37  ;;  %v2310_v14 = vor.u32 1.1754944e-38, %v2309_v15 }
 0x1df   : > { %v2282_v40 = vmul.f32 %v2281_v47, %v4361_v56  ;;  %v1155_v50 = vadd.f32 %v1154_v44, %v946_v39  ;;  %v1363_v51 = vpop.f32.mrf.mxu3  ;;  %v2286_v54 = vmul.f32 %v3252_v34, %v2285_v48  ;;  %v1624_v53 = vsub.f32 0.0, %v4439_v45 }
 0x1e1   : > { %2836 = vst [vmem:[%s3903_s2 + $0xe0] sm:$0xff] %v2282_v40  ;;  %v1364_v60 = vadd.f32 %v1363_v51, %v1155_v50  ;;  %v2287_v52 = vadd.f32 %v3252_v34, %v2286_v54  ;;  %v1720_v56 = vmul.f32 1.442695, %v1624_v53  ;;  %v511_v53 = vld [vmem:[%s3759_s13 + $0x698] sm:$0xff] }
 0x1e2   : > { %v3254_v0 = vpop.eup %3253  ;;  %v739_v61 = vpop.f32.mrf.mxu0 }
 0x1e3   : > { %v948_v57 = vpop.f32.mrf.mxu1  ;;  %v3256_v4 = vpop.eup %3255  ;;  %v2299_v6 = vmul.f32 %v3254_v0, %v4429_v33  ;;  %v1493_v1 = vmul.f32 %v4374_v7, %v1364_v60  ;;  %1204 = vmatmul.f32.gmra.mxu2 %v502_v55  ;;  %v2291_v9 = vsel %vm2290_vm6, %v3252_v34, %v2287_v52  ;;  %3257 = vpow2.f32 %v1720_v56  ;;  %1413 = vmatmul.f32.gmra.mxu3 %v503_v63  ;;  %v508_v52 = vld [vmem:[%s3759_s13 + $0x680] sm:$0xff]  ;;  %v509_v56 = vld [vmem:[%s3759_s13 + $0x688] sm:$0xff] }
 0x1e4   : > { %v949_v36 = vadd.f32 %v948_v57, %v739_v61  ;;  %v4454_v12 = vadd.f32 1.0, %v3256_v4  ;;  %v2296_v5 = vsel %vm2293_vm7, %v2295_v21, %v2291_v9  ;;  %vm2304_vm8 = vweird.f32 %v3254_v0 }
 0x1e5   : > { %v2300_v8 = vsub.f32 1.0, %v2299_v6  ;;  %v4457_v58 = vadd.f32 %v4380_v11, %v1493_v1  ;;  %786 = vmatmul.f32.gmra.mxu0 %v500_v2  ;;  %995 = vmatmul.f32.gmra.mxu1 %v501_v3  ;;  %v2297_v62 = vmul.f32 %v2296_v5, %v4383_v23  ;;  %vm2305_vm10 = vmor %vm2303_vm9, %vm2304_vm8 }
 0x1e6   : > { %3259 = vrcp.f32 %v4454_v12  ;;  %v1157_v10 = vpop.f32.mrf.mxu2  ;;  %v2324_v40 = vand.u32 2147483648, %v4454_v12  ;;  %v2322_v54 = vand.u32 2147483647, %v4454_v12  ;;  %vm2318_vm13 = vweird.f32 %v4454_v12 }
 0x1e7   : > { %v2301_v20 = vmul.f32 %v3254_v0, %v2300_v8  ;;  %v1625_v22 = vsub.f32 0.0, %v4457_v58  ;;  %v1158_v19 = vadd.f32 %v1157_v10, %v949_v36  ;;  %v1366_v16 = vpop.f32.mrf.mxu3  ;;  %2837 = vst [vmem:[%s3903_s2 + $0xe8] sm:$0xff] %v2297_v62 }
 0x1e8   : > { %v2325_v4 = vor.u32 1.1754944e-38, %v2324_v40  ;;  %vm2323_vm15 = vcmp.eq.f32.partialorder %v2322_v54, 8.507059e+37 }
 0x1e9   : > { %v2302_v18 = vadd.f32 %v3254_v0, %v2301_v20  ;;  %v1722_v23 = vmul.f32 1.442695, %v1625_v22  ;;  %v1367_v25 = vadd.f32 %v1366_v16, %v1158_v19  ;;  %v3258_v27 = vpop.eup %3257  ;;  %v514_v22 = vld [vmem:[%s3759_s13 + $0x6b0] sm:$0xff]  ;;  %v515_v16 = vld [vmem:[%s3759_s13 + $0x6b8] sm:$0xff] }
 0x1ea   : > { %v742_v31 = vpop.f32.mrf.mxu0  ;;  %v4470_v28 = vadd.f32 1.0, %v3258_v27  ;;  %v513_v27 = vld [vmem:[%s3759_s13 + $0x6a8] sm:$0xff] }
 0x1eb   : > { %v951_v32 = vpop.f32.mrf.mxu1  ;;  %v2306_v30 = vsel %vm2305_vm10, %v3254_v0, %v2302_v18  ;;  %3261 = vpow2.f32 %v1722_v23  ;;  %v1494_v34 = vmul.f32 %v4374_v7, %v1367_v25  ;;  %1207 = vmatmul.f32.gmra.mxu2 %v506_v24  ;;  %1416 = vmatmul.f32.gmra.mxu3 %v507_v26  ;;  %v512_v26 = vld [vmem:[%s3759_s13 + $0x6a0] sm:$0xff] }
 0x1ec   : > { %v3260_v33 = vpop.eup %3259  ;;  %v2311_v37 = vsel %vm2308_vm11, %v2310_v14, %v2306_v30  ;;  %v952_v38 = vadd.f32 %v951_v32, %v742_v31  ;;  %3263 = vrcp.f32 %v4470_v28  ;;  %v2339_v8 = vand.u32 2147483648, %v4470_v28 }
 0x1ed   : > { %v2312_v39 = vmul.f32 %v2311_v37, %v4401_v49  ;;  %v2314_v41 = vmul.f32 %v3260_v33, %v4454_v12  ;;  %789 = vmatmul.f32.gmra.mxu0 %v504_v35  ;;  %998 = vmatmul.f32.gmra.mxu1 %v505_v29  ;;  %v4477_v42 = vadd.f32 %v4380_v11, %v1494_v34  ;;  %vm2319_vm12 = vweird.f32 %v3260_v33 }
 0x1ee   : > { %v1160_v46 = vpop.f32.mrf.mxu2  ;;  %vm2320_vm14 = vmor %vm2318_vm13, %vm2319_vm12  ;;  %v2337_v10 = vand.u32 2147483647, %v4470_v28  ;;  %vm2333_vm1 = vweird.f32 %v4470_v28  ;;  %v2340_v31 = vor.u32 1.1754944e-38, %v2339_v8  ;;  %v522_v8 = vld [vmem:[%s3759_s13 + $0x6f0] sm:$0xff] }
 0x1ef   : > { %2838 = vst [vmem:[%s3903_s2 + $0xf0] sm:$0xff] %v2312_v39  ;;  %v2315_v47 = vsub.f32 1.0, %v2314_v41  ;;  %v1161_v48 = vadd.f32 %v1160_v46, %v952_v38  ;;  %v1369_v44 = vpop.f32.mrf.mxu3  ;;  %v1626_v49 = vsub.f32 0.0, %v4477_v42 }
 0x1f0   : > { %vm2338_vm3 = vcmp.eq.f32.partialorder %v2337_v10, 8.507059e+37 }
 0x1f1   : > { %v3262_v50 = vpop.eup %3261  ;;  %v2316_v51 = vmul.f32 %v3260_v33, %v2315_v47  ;;  %v1370_v59 = vadd.f32 %v1369_v44, %v1161_v48  ;;  %v1724_v60 = vmul.f32 1.442695, %v1626_v49  ;;  %v518_v49 = vld [vmem:[%s3759_s13 + $0x6d0] sm:$0xff] }
 0x1f2   : > { %v4485_v55 = vadd.f32 1.0, %v3262_v50  ;;  %v745_v63 = vpop.f32.mrf.mxu0  ;;  %v3264_v61 = vpop.eup %3263 }
 0x1f3   : > { %v954_v0 = vpop.f32.mrf.mxu1  ;;  %v2317_v57 = vadd.f32 %v3260_v33, %v2316_v51  ;;  %v1495_v2 = vmul.f32 %v4374_v7, %v1370_v59  ;;  %1210 = vmatmul.f32.gmra.mxu2 %v510_v43  ;;  %v2329_v21 = vmul.f32 %v3264_v61, %v4470_v28  ;;  %1419 = vmatmul.f32.gmra.mxu3 %v511_v53  ;;  %vm2334_vm0 = vweird.f32 %v3264_v61  ;;  %v519_v51 = vld [vmem:[%s3759_s13 + $0x6d8] sm:$0xff] }
 0x1f4   : > { %v955_v3 = vadd.f32 %v954_v0, %v745_v63  ;;  %3265 = vrcp.f32 %v4485_v55  ;;  %vm2335_vm2 = vmor %vm2333_vm1, %vm2334_vm0  ;;  %v2352_v39 = vand.u32 2147483647, %v4485_v55  ;;  %v2354_v41 = vand.u32 2147483648, %v4485_v55  ;;  %v516_v63 = vld [vmem:[%s3759_s13 + $0x6c0] sm:$0xff]  ;;  %v517_v0 = vld [vmem:[%s3759_s13 + $0x6c8] sm:$0xff] }
 0x1f5   : > { %v2321_v6 = vsel %vm2320_vm14, %v3260_v33, %v2317_v57  ;;  %3267 = vpow2.f32 %v1724_v60  ;;  %792 = vmatmul.f32.gmra.mxu0 %v508_v52  ;;  %1001 = vmatmul.f32.gmra.mxu1 %v509_v56  ;;  %v2330_v36 = vsub.f32 1.0, %v2329_v21  ;;  %v4495_v9 = vadd.f32 %v4380_v11, %v1495_v2 }
 0x1f6   : > { %v2326_v1 = vsel %vm2323_vm15, %v2325_v4, %v2321_v6  ;;  %v1163_v12 = vpop.f32.mrf.mxu2  ;;  %vm2348_vm5 = vweird.f32 %v4485_v55  ;;  %vm2353_vm7 = vcmp.eq.f32.partialorder %v2352_v39, 8.507059e+37  ;;  %v2355_v59 = vor.u32 1.1754944e-38, %v2354_v41 }
 0x1f7   : > { %v2327_v5 = vmul.f32 %v2326_v1, %v4421_v17  ;;  %v1164_v62 = vadd.f32 %v1163_v12, %v955_v3  ;;  %v1372_v13 = vpop.f32.mrf.mxu3  ;;  %v2331_v15 = vmul.f32 %v3264_v61, %v2330_v36  ;;  %v1627_v20 = vsub.f32 0.0, %v4495_v9 }
 0x1f9   : > { %2839 = vst [vmem:[%s3903_s2 + $0xf8] sm:$0xff] %v2327_v5  ;;  %v1373_v19 = vadd.f32 %v1372_v13, %v1164_v62  ;;  %v2332_v18 = vadd.f32 %v3264_v61, %v2331_v15  ;;  %v1726_v17 = vmul.f32 1.442695, %v1627_v20  ;;  %v523_v20 = vld [vmem:[%s3759_s13 + $0x6f8] sm:$0xff] }
 0x1fa   : > { %v3266_v24 = vpop.eup %3265  ;;  %v748_v23 = vpop.f32.mrf.mxu0 }
 0x1fb   : > { %v957_v25 = vpop.f32.mrf.mxu1  ;;  %v3268_v14 = vpop.eup %3267  ;;  %v2344_v32 = vmul.f32 %v3266_v24, %v4485_v55  ;;  %v1496_v35 = vmul.f32 %v4374_v7, %v1373_v19  ;;  %1213 = vmatmul.f32.gmra.mxu2 %v514_v22  ;;  %v2336_v30 = vsel %vm2335_vm2, %v3264_v61, %v2332_v18  ;;  %3269 = vpow2.f32 %v1726_v17  ;;  %1422 = vmatmul.f32.gmra.mxu3 %v515_v16  ;;  %v520_v18 = vld [vmem:[%s3759_s13 + $0x6e0] sm:$0xff]  ;;  %v521_v17 = vld [vmem:[%s3759_s13 + $0x6e8] sm:$0xff] }
 0x1fc   : > { %v958_v29 = vadd.f32 %v957_v25, %v748_v23  ;;  %v4510_v34 = vadd.f32 1.0, %v3268_v14  ;;  %v2341_v28 = vsel %vm2338_vm3, %v2340_v31, %v2336_v30  ;;  %vm2349_vm4 = vweird.f32 %v3266_v24 }
 0x1fd   : > { %v2345_v33 = vsub.f32 1.0, %v2344_v32  ;;  %v4513_v37 = vadd.f32 %v4380_v11, %v1496_v35  ;;  %795 = vmatmul.f32.gmra.mxu0 %v512_v26  ;;  %1004 = vmatmul.f32.gmra.mxu1 %v513_v27  ;;  %v2342_v38 = vmul.f32 %v2341_v28, %v4439_v45  ;;  %vm2350_vm6 = vmor %vm2348_vm5, %vm2349_vm4 }
 0x1fe   : > { %3271 = vrcp.f32 %v4510_v34  ;;  %v1166_v46 = vpop.f32.mrf.mxu2  ;;  %v2369_v5 = vand.u32 2147483648, %v4510_v34  ;;  %v2367_v15 = vand.u32 2147483647, %v4510_v34  ;;  %vm2363_vm9 = vweird.f32 %v4510_v34 }
 0x1ff   : > { %v2346_v47 = vmul.f32 %v3266_v24, %v2345_v33  ;;  %v1628_v48 = vsub.f32 0.0, %v4513_v37  ;;  %v1167_v44 = vadd.f32 %v1166_v46, %v958_v29  ;;  %v1375_v40 = vpop.f32.mrf.mxu3  ;;  %2840 = vst [vmem:[%s3903_s2 + $0x100] sm:$0xff] %v2342_v38 }
 0x200   : > { %v2370_v14 = vor.u32 1.1754944e-38, %v2369_v5  ;;  %vm2368_vm11 = vcmp.eq.f32.partialorder %v2367_v15, 8.507059e+37 }
 0x201   : > { %v2347_v43 = vadd.f32 %v3266_v24, %v2346_v47  ;;  %v1728_v45 = vmul.f32 1.442695, %v1628_v48  ;;  %v1376_v50 = vadd.f32 %v1375_v40, %v1167_v44  ;;  %v3270_v54 = vpop.eup %3269  ;;  %v526_v48 = vld [vmem:[%s3759_s13 + $0x710] sm:$0xff]  ;;  %v527_v40 = vld [vmem:[%s3759_s13 + $0x718] sm:$0xff] }
 0x202   : > { %v751_v53 = vpop.f32.mrf.mxu0  ;;  %v4526_v56 = vadd.f32 1.0, %v3270_v54  ;;  %v525_v54 = vld [vmem:[%s3759_s13 + $0x708] sm:$0xff] }
 0x203   : > { %v960_v60 = vpop.f32.mrf.mxu1  ;;  %v2351_v52 = vsel %vm2350_vm6, %v3266_v24, %v2347_v43  ;;  %3273 = vpow2.f32 %v1728_v45  ;;  %v1497_v61 = vmul.f32 %v4374_v7, %v1376_v50  ;;  %1216 = vmatmul.f32.gmra.mxu2 %v518_v49  ;;  %1425 = vmatmul.f32.gmra.mxu3 %v519_v51  ;;  %v524_v51 = vld [vmem:[%s3759_s13 + $0x700] sm:$0xff] }
 0x204   : > { %v3272_v55 = vpop.eup %3271  ;;  %v2356_v57 = vsel %vm2353_vm7, %v2355_v59, %v2351_v52  ;;  %v961_v2 = vadd.f32 %v960_v60, %v751_v53  ;;  %3275 = vrcp.f32 %v4526_v56  ;;  %v2384_v33 = vand.u32 2147483648, %v4526_v56 }
 0x205   : > { %v2357_v3 = vmul.f32 %v2356_v57, %v4457_v58  ;;  %v2359_v4 = vmul.f32 %v3272_v55, %v4510_v34  ;;  %798 = vmatmul.f32.gmra.mxu0 %v516_v63  ;;  %1007 = vmatmul.f32.gmra.mxu1 %v517_v0  ;;  %v4533_v21 = vadd.f32 %v4380_v11, %v1497_v61  ;;  %vm2364_vm8 = vweird.f32 %v3272_v55 }
 0x206   : > { %v1169_v6 = vpop.f32.mrf.mxu2  ;;  %vm2365_vm10 = vmor %vm2363_vm9, %vm2364_vm8  ;;  %v2382_v46 = vand.u32 2147483647, %v4526_v56  ;;  %vm2378_vm13 = vweird.f32 %v4526_v56  ;;  %v2385_v53 = vor.u32 1.1754944e-38, %v2384_v33  ;;  %v534_v33 = vld [vmem:[%s3759_s13 + $0x750] sm:$0xff] }
 0x207   : > { %2841 = vst [vmem:[%s3903_s2 + $0x108] sm:$0xff] %v2357_v3  ;;  %v2360_v1 = vsub.f32 1.0, %v2359_v4  ;;  %v1170_v36 = vadd.f32 %v1169_v6, %v961_v2  ;;  %v1378_v12 = vpop.f32.mrf.mxu3  ;;  %v1629_v58 = vsub.f32 0.0, %v4533_v21 }
 0x208   : > { %vm2383_vm15 = vcmp.eq.f32.partialorder %v2382_v46, 8.507059e+37 }
 0x209   : > { %v3274_v62 = vpop.eup %3273  ;;  %v2361_v13 = vmul.f32 %v3272_v55, %v2360_v1  ;;  %v1379_v10 = vadd.f32 %v1378_v12, %v1170_v36  ;;  %v1730_v19 = vmul.f32 1.442695, %v1629_v58  ;;  %v530_v58 = vld [vmem:[%s3759_s13 + $0x730] sm:$0xff] }
 0x20a   : > { %v4541_v22 = vadd.f32 1.0, %v3274_v62  ;;  %v754_v16 = vpop.f32.mrf.mxu0  ;;  %v3276_v23 = vpop.eup %3275 }
 0x20b   : > { %v963_v24 = vpop.f32.mrf.mxu1  ;;  %v2362_v25 = vadd.f32 %v3272_v55, %v2361_v13  ;;  %v1498_v26 = vmul.f32 %v4374_v7, %v1379_v10  ;;  %1219 = vmatmul.f32.gmra.mxu2 %v522_v8  ;;  %v2374_v31 = vmul.f32 %v3276_v23, %v4526_v56  ;;  %1428 = vmatmul.f32.gmra.mxu3 %v523_v20  ;;  %vm2379_vm12 = vweird.f32 %v3276_v23  ;;  %v531_v13 = vld [vmem:[%s3759_s13 + $0x738] sm:$0xff] }
 0x20c   : > { %v964_v27 = vadd.f32 %v963_v24, %v754_v16  ;;  %3277 = vrcp.f32 %v4541_v22  ;;  %vm2380_vm14 = vmor %vm2378_vm13, %vm2379_vm12  ;;  %v2397_v3 = vand.u32 2147483647, %v4541_v22  ;;  %v2399_v4 = vand.u32 2147483648, %v4541_v22  ;;  %v528_v16 = vld [vmem:[%s3759_s13 + $0x720] sm:$0xff]  ;;  %v529_v24 = vld [vmem:[%s3759_s13 + $0x728] sm:$0xff] }
 0x20d   : > { %v2366_v32 = vsel %vm2365_vm10, %v3272_v55, %v2362_v25  ;;  %3279 = vpow2.f32 %v1730_v19  ;;  %801 = vmatmul.f32.gmra.mxu0 %v520_v18  ;;  %1010 = vmatmul.f32.gmra.mxu1 %v521_v17  ;;  %v2375_v29 = vsub.f32 1.0, %v2374_v31  ;;  %v4551_v30 = vadd.f32 %v4380_v11, %v1498_v26 }
 0x20e   : > { %v2371_v35 = vsel %vm2368_vm11, %v2370_v14, %v2366_v32  ;;  %v1172_v34 = vpop.f32.mrf.mxu2  ;;  %vm2393_vm1 = vweird.f32 %v4541_v22  ;;  %vm2398_vm3 = vcmp.eq.f32.partialorder %v2397_v3, 8.507059e+37  ;;  %v2400_v10 = vor.u32 1.1754944e-38, %v2399_v4 }
 0x20f   : > { %v2372_v28 = vmul.f32 %v2371_v35, %v4477_v42  ;;  %v1173_v38 = vadd.f32 %v1172_v34, %v964_v27  ;;  %v1381_v39 = vpop.f32.mrf.mxu3  ;;  %v2376_v41 = vmul.f32 %v3276_v23, %v2375_v29  ;;  %v1630_v47 = vsub.f32 0.0, %v4551_v30 }
 0x211   : > { %2842 = vst [vmem:[%s3903_s2 + $0x110] sm:$0xff] %v2372_v28  ;;  %v1382_v44 = vadd.f32 %v1381_v39, %v1173_v38  ;;  %v2377_v43 = vadd.f32 %v3276_v23, %v2376_v41  ;;  %v1732_v42 = vmul.f32 1.442695, %v1630_v47  ;;  %v535_v47 = vld [vmem:[%s3759_s13 + $0x758] sm:$0xff] }
 0x212   : > { %v3278_v49 = vpop.eup %3277  ;;  %v757_v45 = vpop.f32.mrf.mxu0 }
 0x213   : > { %v966_v50 = vpop.f32.mrf.mxu1  ;;  %v3280_v59 = vpop.eup %3279  ;;  %v2389_v60 = vmul.f32 %v3278_v49, %v4541_v22  ;;  %v1499_v63 = vmul.f32 %v4374_v7, %v1382_v44  ;;  %1222 = vmatmul.f32.gmra.mxu2 %v526_v48  ;;  %v2381_v52 = vsel %vm2380_vm14, %v3276_v23, %v2377_v43  ;;  %3281 = vpow2.f32 %v1732_v42  ;;  %1431 = vmatmul.f32.gmra.mxu3 %v527_v40  ;;  %v532_v43 = vld [vmem:[%s3759_s13 + $0x740] sm:$0xff]  ;;  %v533_v42 = vld [vmem:[%s3759_s13 + $0x748] sm:$0xff] }
 0x214   : > { %v967_v0 = vadd.f32 %v966_v50, %v757_v45  ;;  %v4566_v61 = vadd.f32 1.0, %v3280_v59  ;;  %v2386_v56 = vsel %vm2383_vm15, %v2385_v53, %v2381_v52  ;;  %vm2394_vm0 = vweird.f32 %v3278_v49 }
 0x215   : > { %v2390_v55 = vsub.f32 1.0, %v2389_v60  ;;  %v4569_v57 = vadd.f32 %v4380_v11, %v1499_v63  ;;  %804 = vmatmul.f32.gmra.mxu0 %v524_v51  ;;  %1013 = vmatmul.f32.gmra.mxu1 %v525_v54  ;;  %v2387_v2 = vmul.f32 %v2386_v56, %v4495_v9  ;;  %vm2395_vm2 = vmor %vm2393_vm1, %vm2394_vm0 }
 0x216   : > { %3283 = vrcp.f32 %v4566_v61  ;;  %v1175_v6 = vpop.f32.mrf.mxu2  ;;  %v2414_v28 = vand.u32 2147483648, %v4566_v61  ;;  %v2412_v41 = vand.u32 2147483647, %v4566_v61  ;;  %vm2408_vm5 = vweird.f32 %v4566_v61 }
 0x217   : > { %v2391_v1 = vmul.f32 %v3278_v49, %v2390_v55  ;;  %v1631_v36 = vsub.f32 0.0, %v4569_v57  ;;  %v1176_v12 = vadd.f32 %v1175_v6, %v967_v0  ;;  %v1384_v5 = vpop.f32.mrf.mxu3  ;;  %2843 = vst [vmem:[%s3903_s2 + $0x118] sm:$0xff] %v2387_v2 }
 0x218   : > { %v2415_v59 = vor.u32 1.1754944e-38, %v2414_v28  ;;  %vm2413_vm7 = vcmp.eq.f32.partialorder %v2412_v41, 8.507059e+37 }
 0x219   : > { %v2392_v8 = vadd.f32 %v3278_v49, %v2391_v1  ;;  %v1734_v9 = vmul.f32 1.442695, %v1631_v36  ;;  %v1385_v62 = vadd.f32 %v1384_v5, %v1176_v12  ;;  %v3282_v15 = vpop.eup %3281  ;;  %v538_v36 = vld [vmem:[%s3759_s13 + $0x770] sm:$0xff]  ;;  %v539_v5 = vld [vmem:[%s3759_s13 + $0x778] sm:$0xff] }
 0x21a   : > { %v760_v20 = vpop.f32.mrf.mxu0  ;;  %v4582_v17 = vadd.f32 1.0, %v3282_v15  ;;  %v537_v15 = vld [vmem:[%s3759_s13 + $0x768] sm:$0xff] }
 0x21b   : > { %v969_v19 = vpop.f32.mrf.mxu1  ;;  %v2396_v18 = vsel %vm2395_vm2, %v3278_v49, %v2392_v8  ;;  %3285 = vpow2.f32 %v1734_v9  ;;  %v1500_v23 = vmul.f32 %v4374_v7, %v1385_v62  ;;  %1225 = vmatmul.f32.gmra.mxu2 %v530_v58  ;;  %1434 = vmatmul.f32.gmra.mxu3 %v531_v13  ;;  %v536_v13 = vld [vmem:[%s3759_s13 + $0x760] sm:$0xff] }
 0x21c   : > { %v3284_v22 = vpop.eup %3283  ;;  %v2401_v25 = vsel %vm2398_vm3, %v2400_v10, %v2396_v18  ;;  %v970_v26 = vadd.f32 %v969_v19, %v760_v20  ;;  %3287 = vrcp.f32 %v4582_v17  ;;  %v2429_v55 = vand.u32 2147483648, %v4582_v17 }
 0x21d   : > { %v2402_v27 = vmul.f32 %v2401_v25, %v4513_v37  ;;  %v2404_v14 = vmul.f32 %v3284_v22, %v4566_v61  ;;  %807 = vmatmul.f32.gmra.mxu0 %v528_v16  ;;  %1016 = vmatmul.f32.gmra.mxu1 %v529_v24  ;;  %v4589_v31 = vadd.f32 %v4380_v11, %v1500_v23  ;;  %vm2409_vm4 = vweird.f32 %v3284_v22 }
 0x21e   : > { %v1178_v32 = vpop.f32.mrf.mxu2  ;;  %vm2410_vm6 = vmor %vm2408_vm5, %vm2409_vm4  ;;  %v2427_v6 = vand.u32 2147483647, %v4582_v17  ;;  %vm2423_vm9 = vweird.f32 %v4582_v17  ;;  %v2430_v20 = vor.u32 1.1754944e-38, %v2429_v55  ;;  %v546_v55 = vld [vmem:[%s3759_s13 + $0x7b0] sm:$0xff] }
 0x21f   : > { %2844 = vst [vmem:[%s3903_s2 + $0x120] sm:$0xff] %v2402_v27  ;;  %v2405_v35 = vsub.f32 1.0, %v2404_v14  ;;  %v1179_v29 = vadd.f32 %v1178_v32, %v970_v26  ;;  %v1387_v34 = vpop.f32.mrf.mxu3  ;;  %v1632_v37 = vsub.f32 0.0, %v4589_v31 }
 0x220   : > { %vm2428_vm11 = vcmp.eq.f32.partialorder %v2427_v6, 8.507059e+37 }
 0x221   : > { %v3286_v38 = vpop.eup %3285  ;;  %v2406_v39 = vmul.f32 %v3284_v22, %v2405_v35  ;;  %v1388_v46 = vadd.f32 %v1387_v34, %v1179_v29  ;;  %v1736_v44 = vmul.f32 1.442695, %v1632_v37  ;;  %v542_v34 = vld [vmem:[%s3759_s13 + $0x790] sm:$0xff] }
 0x222   : > { %v4597_v48 = vadd.f32 1.0, %v3286_v38  ;;  %v763_v40 = vpop.f32.mrf.mxu0  ;;  %v3288_v45 = vpop.eup %3287 }
 0x223   : > { %v972_v49 = vpop.f32.mrf.mxu1  ;;  %v2407_v50 = vadd.f32 %v3284_v22, %v2406_v39  ;;  %v1501_v51 = vmul.f32 %v4374_v7, %v1388_v46  ;;  %1228 = vmatmul.f32.gmra.mxu2 %v534_v33  ;;  %v2419_v53 = vmul.f32 %v3288_v45, %v4582_v17  ;;  %1437 = vmatmul.f32.gmra.mxu3 %v535_v47  ;;  %vm2424_vm8 = vweird.f32 %v3288_v45  ;;  %v543_v33 = vld [vmem:[%s3759_s13 + $0x798] sm:$0xff]  ;;  %v540_v47 = vld [vmem:[%s3759_s13 + $0x780] sm:$0xff] }
 0x224   : > { %v973_v54 = vadd.f32 %v972_v49, %v763_v40  ;;  %3289 = vrcp.f32 %v4597_v48  ;;  %vm2425_vm10 = vmor %vm2423_vm9, %vm2424_vm8  ;;  %v2444_v27 = vand.u32 2147483648, %v4597_v48  ;;  %vm2438_vm13 = vweird.f32 %v4597_v48 }
 0x225   : > { %v2411_v60 = vsel %vm2410_vm6, %v3284_v22, %v2407_v50  ;;  %3291 = vpow2.f32 %v1736_v44  ;;  %810 = vmatmul.f32.gmra.mxu0 %v532_v43  ;;  %1019 = vmatmul.f32.gmra.mxu1 %v533_v42  ;;  %v2420_v0 = vsub.f32 1.0, %v2419_v53  ;;  %v4607_v52 = vadd.f32 %v4380_v11, %v1501_v51  ;;  %v541_v44 = vld [vmem:[%s3759_s13 + $0x788] sm:$0xff]  ;;  %v4640_v43 = vld [vmem:[#allocation7] ss:$0 sm:$0xff] }
 0x226   : > { %v2416_v63 = vsel %vm2413_vm7, %v2415_v59, %v2411_v60  ;;  %v1181_v61 = vpop.f32.mrf.mxu2  ;;  %v2445_v39 = vor.u32 1.1754944e-38, %v2444_v27  ;;  %v4646_v59 = vld [vmem:[#allocation8] ss:$0 sm:$0xff] }
 0x227   : > { %v2417_v56 = vmul.f32 %v2416_v63, %v4533_v21  ;;  %v1182_v2 = vadd.f32 %v1181_v61, %v973_v54  ;;  %v1390_v3 = vpop.f32.mrf.mxu3  ;;  %v2421_v4 = vmul.f32 %v3288_v45, %v2420_v0  ;;  %v1633_v1 = vsub.f32 0.0, %v4607_v52 }
 0x229   : > { %2845 = vst [vmem:[%s3903_s2 + $0x128] sm:$0xff] %v2417_v56  ;;  %v1391_v12 = vadd.f32 %v1390_v3, %v1182_v2  ;;  %v2422_v8 = vadd.f32 %v3288_v45, %v2421_v4  ;;  %v1738_v21 = vmul.f32 1.442695, %v1633_v1  ;;  %v547_v1 = vld [vmem:[%s3759_s13 + $0x7b8] sm:$0xff] }
 0x22a   : > { %v3290_v58 = vpop.eup %3289  ;;  %v766_v9 = vpop.f32.mrf.mxu0 }
 0x22b   : > { %v975_v62 = vpop.f32.mrf.mxu1  ;;  %v3292_v10 = vpop.eup %3291  ;;  %v2434_v19 = vmul.f32 %v3290_v58, %v4597_v48  ;;  %v1502_v16 = vmul.f32 %v4374_v7, %v1391_v12  ;;  %1231 = vmatmul.f32.gmra.mxu2 %v538_v36  ;;  %v2426_v18 = vsel %vm2425_vm10, %v3288_v45, %v2422_v8  ;;  %3293 = vpow2.f32 %v1738_v21  ;;  %1440 = vmatmul.f32.gmra.mxu3 %v539_v5  ;;  %v544_v8 = vld [vmem:[%s3759_s13 + $0x7a0] sm:$0xff]  ;;  %v545_v21 = vld [vmem:[%s3759_s13 + $0x7a8] sm:$0xff] }
 0x22c   : > { %v976_v24 = vadd.f32 %v975_v62, %v766_v9  ;;  %v4622_v23 = vadd.f32 1.0, %v3292_v10  ;;  %v2431_v17 = vsel %vm2428_vm11, %v2430_v20, %v2426_v18  ;;  %v2442_v7 = vand.u32 2147483647, %v4597_v48 }
 0x22d   : > { %v2435_v22 = vsub.f32 1.0, %v2434_v19  ;;  %v4625_v25 = vadd.f32 %v4380_v11, %v1502_v16  ;;  %813 = vmatmul.f32.gmra.mxu0 %v536_v13  ;;  %1022 = vmatmul.f32.gmra.mxu1 %v537_v15  ;;  %v2432_v26 = vmul.f32 %v2431_v17, %v4551_v30  ;;  %vm2439_vm12 = vweird.f32 %v3290_v58 }
 0x22e   : > { %3295 = vrcp.f32 %v4622_v23  ;;  %v1184_v14 = vpop.f32.mrf.mxu2  ;;  %vm2440_vm14 = vmor %vm2438_vm13, %vm2439_vm12  ;;  %vm2443_vm15 = vcmp.eq.f32.partialorder %v2442_v7, 8.507059e+37  ;;  %v2457_v4 = vand.u32 2147483647, %v4622_v23  ;;  %vm2453_vm1 = vweird.f32 %v4622_v23 }
 0x22f   : > { %v2436_v32 = vmul.f32 %v3290_v58, %v2435_v22  ;;  %v1634_v35 = vsub.f32 0.0, %v4625_v25  ;;  %v1185_v29 = vadd.f32 %v1184_v14, %v976_v24  ;;  %v1393_v11 = vpop.f32.mrf.mxu3  ;;  %2846 = vst [vmem:[%s3903_s2 + $0x130] sm:$0xff] %v2432_v26 }
 0x230   : > { %vm2458_vm3 = vcmp.eq.f32.partialorder %v2457_v4, 8.507059e+37 }
 0x231   : > { %v2437_v28 = vadd.f32 %v3290_v58, %v2436_v32  ;;  %v1740_v30 = vmul.f32 1.442695, %v1634_v35  ;;  %v1394_v37 = vadd.f32 %v1393_v11, %v1185_v29  ;;  %v3294_v38 = vpop.eup %3293  ;;  %v550_v35 = vld [vmem:[%s3759_s13 + $0x7d0] sm:$0xff]  ;;  %v551_v11 = vld [vmem:[%s3759_s13 + $0x7d8] sm:$0xff] }
 0x232   : > { %v769_v41 = vpop.f32.mrf.mxu0  ;;  %v4638_v49 = vadd.f32 1.0, %v3294_v38  ;;  %v549_v38 = vld [vmem:[%s3759_s13 + $0x7c8] sm:$0xff] }
 0x233   : > { %v978_v46 = vpop.f32.mrf.mxu1  ;;  %v2441_v40 = vsel %vm2440_vm14, %v3290_v58, %v2437_v28  ;;  %3297 = vpow2.f32 %v1740_v30  ;;  %v1503_v48 = vmul.f32 %v4640_v43, %v1394_v37  ;;  %1234 = vmatmul.f32.gmra.mxu2 %v542_v34  ;;  %1443 = vmatmul.f32.gmra.mxu3 %v543_v33  ;;  %v548_v33 = vld [vmem:[%s3759_s13 + $0x7c0] sm:$0xff] }
 0x234   : > { %v3296_v42 = vpop.eup %3295  ;;  %v2446_v45 = vsel %vm2443_vm15, %v2445_v39, %v2441_v40  ;;  %v979_v50 = vadd.f32 %v978_v46, %v769_v41  ;;  %3299 = vrcp.f32 %v4638_v49  ;;  %v2474_v22 = vand.u32 2147483648, %v4638_v49 }
 0x235   : > { %v2447_v51 = vmul.f32 %v2446_v45, %v4569_v57  ;;  %v2449_v54 = vmul.f32 %v3296_v42, %v4622_v23  ;;  %816 = vmatmul.f32.gmra.mxu0 %v540_v47  ;;  %1025 = vmatmul.f32.gmra.mxu1 %v541_v44  ;;  %v4649_v53 = vadd.f32 %v4646_v59, %v1503_v48  ;;  %v2459_v57 = vand.u32 2147483648, %v4622_v23 }
 0x236   : > { %v1187_v60 = vpop.f32.mrf.mxu2  ;;  %vm2454_vm0 = vweird.f32 %v3296_v42  ;;  %v2472_v14 = vand.u32 2147483647, %v4638_v49  ;;  %vm2468_vm5 = vweird.f32 %v4638_v49  ;;  %v2475_v41 = vor.u32 1.1754944e-38, %v2474_v22 }
 0x237   : > { %2847 = vst [vmem:[%s3903_s2 + $0x138] sm:$0xff] %v2447_v51  ;;  %v2450_v63 = vsub.f32 1.0, %v2449_v54  ;;  %v1188_v0 = vadd.f32 %v1187_v60, %v979_v50  ;;  %v1396_v61 = vpop.f32.mrf.mxu3  ;;  %v1635_v56 = vsub.f32 0.0, %v4649_v53  ;;  %vm2455_vm2 = vmor %vm2453_vm1, %vm2454_vm0  ;;  %v2460_v10 = vor.u32 1.1754944e-38, %v2459_v57 }
 0x238   : > { %vm2473_vm7 = vcmp.eq.f32.partialorder %v2472_v14, 8.507059e+37 }
 0x239   : > { %v3298_v2 = vpop.eup %3297  ;;  %v2451_v3 = vmul.f32 %v3296_v42, %v2450_v63  ;;  %v1397_v6 = vadd.f32 %v1396_v61, %v1188_v0  ;;  %v1742_v12 = vmul.f32 1.442695, %v1635_v56  ;;  %v554_v56 = vld [vmem:[%s3759_s13 + $0x7f0] sm:$0xff] }
 0x23a   : > { %v4657_v36 = vadd.f32 1.0, %v3298_v2  ;;  %v772_v5 = vpop.f32.mrf.mxu0  ;;  %v3300_v9 = vpop.eup %3299 }
 0x23b   : > { %v981_v58 = vpop.f32.mrf.mxu1  ;;  %v2452_v62 = vadd.f32 %v3296_v42, %v2451_v3  ;;  %v1504_v13 = vmul.f32 %v4640_v43, %v1397_v6  ;;  %1237 = vmatmul.f32.gmra.mxu2 %v546_v55  ;;  %v2464_v20 = vmul.f32 %v3300_v9, %v4638_v49  ;;  %1446 = vmatmul.f32.gmra.mxu3 %v547_v1  ;;  %vm2469_vm4 = vweird.f32 %v3300_v9  ;;  %v555_v3 = vld [vmem:[%s3759_s13 + $0x7f8] sm:$0xff] }
 0x23c   : > { %v982_v15 = vadd.f32 %v981_v58, %v772_v5  ;;  %3301 = vrcp.f32 %v4657_v36  ;;  %vm2470_vm6 = vmor %vm2468_vm5, %vm2469_vm4  ;;  %v2487_v51 = vand.u32 2147483647, %v4657_v36  ;;  %v2489_v54 = vand.u32 2147483648, %v4657_v36  ;;  %v552_v5 = vld [vmem:[%s3759_s13 + $0x7e0] sm:$0xff]  ;;  %v553_v58 = vld [vmem:[%s3759_s13 + $0x7e8] sm:$0xff] }
 0x23d   : > { %v2456_v19 = vsel %vm2455_vm2, %v3296_v42, %v2452_v62  ;;  %3303 = vpow2.f32 %v1742_v12  ;;  %819 = vmatmul.f32.gmra.mxu0 %v544_v8  ;;  %1028 = vmatmul.f32.gmra.mxu1 %v545_v21  ;;  %v2465_v24 = vsub.f32 1.0, %v2464_v20  ;;  %v4667_v18 = vadd.f32 %v4646_v59, %v1504_v13 }
 0x23e   : > { %v2461_v16 = vsel %vm2458_vm3, %v2460_v10, %v2456_v19  ;;  %v1190_v23 = vpop.f32.mrf.mxu2  ;;  %vm2483_vm9 = vweird.f32 %v4657_v36  ;;  %vm2488_vm11 = vcmp.eq.f32.partialorder %v2487_v51, 8.507059e+37  ;;  %v2490_v6 = vor.u32 1.1754944e-38, %v2489_v54 }
 0x23f   : > { %v2462_v17 = vmul.f32 %v2461_v16, %v4589_v31  ;;  %v1191_v26 = vadd.f32 %v1190_v23, %v982_v15  ;;  %v1399_v7 = vpop.f32.mrf.mxu3  ;;  %v2466_v27 = vmul.f32 %v3300_v9, %v2465_v24  ;;  %v1636_v32 = vsub.f32 0.0, %v4667_v18 }
 0x241   : > { %2848 = vst [vmem:[%s3903_s2 + $0x140] sm:$0xff] %v2462_v17  ;;  %v1400_v29 = vadd.f32 %v1399_v7, %v1191_v26  ;;  %v2467_v28 = vadd.f32 %v3300_v9, %v2466_v27  ;;  %v1744_v31 = vmul.f32 1.442695, %v1636_v32 }
 0x242   : > { %v3302_v34 = vpop.eup %3301  ;;  %v775_v30 = vpop.f32.mrf.mxu0 }
 0x243   : > { %v984_v37 = vpop.f32.mrf.mxu1  ;;  %v3304_v39 = vpop.eup %3303  ;;  %v2479_v46 = vmul.f32 %v3302_v34, %v4657_v36  ;;  %v1505_v47 = vmul.f32 %v4640_v43, %v1400_v29  ;;  %1240 = vmatmul.f32.gmra.mxu2 %v550_v35  ;;  %v2471_v40 = vsel %vm2470_vm6, %v3300_v9, %v2467_v28  ;;  %3305 = vpow2.f32 %v1744_v31  ;;  %1449 = vmatmul.f32.gmra.mxu3 %v551_v11 }
 0x244   : > { %v985_v44 = vadd.f32 %v984_v37, %v775_v30  ;;  %v4682_v48 = vadd.f32 1.0, %v3304_v39  ;;  %v2476_v49 = vsel %vm2473_vm7, %v2475_v41, %v2471_v40  ;;  %vm2484_vm8 = vweird.f32 %v3302_v34 }
 0x245   : > { %v2480_v42 = vsub.f32 1.0, %v2479_v46  ;;  %v4685_v45 = vadd.f32 %v4646_v59, %v1505_v47  ;;  %822 = vmatmul.f32.gmra.mxu0 %v548_v33  ;;  %1031 = vmatmul.f32.gmra.mxu1 %v549_v38  ;;  %v2477_v50 = vmul.f32 %v2476_v49, %v4607_v52  ;;  %vm2485_vm10 = vmor %vm2483_vm9, %vm2484_vm8 }
 0x246   : > { %3307 = vrcp.f32 %v4682_v48  ;;  %v1193_v60 = vpop.f32.mrf.mxu2  ;;  %v2504_v17 = vand.u32 2147483648, %v4682_v48  ;;  %v2502_v7 = vand.u32 2147483647, %v4682_v48  ;;  %vm2498_vm13 = vweird.f32 %v4682_v48 }
 0x247   : > { %v2481_v63 = vmul.f32 %v3302_v34, %v2480_v42  ;;  %v1637_v0 = vsub.f32 0.0, %v4685_v45  ;;  %v1194_v61 = vadd.f32 %v1193_v60, %v985_v44  ;;  %v1402_v57 = vpop.f32.mrf.mxu3  ;;  %2849 = vst [vmem:[%s3903_s2 + $0x148] sm:$0xff] %v2477_v50 }
 0x248   : > { %v2505_v30 = vor.u32 1.1754944e-38, %v2504_v17  ;;  %vm2503_vm15 = vcmp.eq.f32.partialorder %v2502_v7, 8.507059e+37 }
 0x249   : > { %v2482_v55 = vadd.f32 %v3302_v34, %v2481_v63  ;;  %v1746_v52 = vmul.f32 1.442695, %v1637_v0  ;;  %v1403_v2 = vadd.f32 %v1402_v57, %v1194_v61  ;;  %v3306_v4 = vpop.eup %3305 }
 0x24a   : > { %v778_v1 = vpop.f32.mrf.mxu0  ;;  %v4698_v21 = vadd.f32 1.0, %v3306_v4 }
 0x24b   : > { %v987_v12 = vpop.f32.mrf.mxu1  ;;  %v2486_v8 = vsel %vm2485_vm10, %v3302_v34, %v2482_v55  ;;  %3309 = vpow2.f32 %v1746_v52  ;;  %v1506_v9 = vmul.f32 %v4640_v43, %v1403_v2  ;;  %1243 = vmatmul.f32.gmra.mxu2 %v554_v56  ;;  %1452 = vmatmul.f32.gmra.mxu3 %v555_v3 }
 0x24c   : > { %v3308_v36 = vpop.eup %3307  ;;  %v2491_v62 = vsel %vm2488_vm11, %v2490_v6, %v2486_v8  ;;  %v988_v13 = vadd.f32 %v987_v12, %v778_v1  ;;  %3311 = vrcp.f32 %v4698_v21  ;;  %v2519_v44 = vand.u32 2147483648, %v4698_v21 }
 0x24d   : > { %v2492_v15 = vmul.f32 %v2491_v62, %v4625_v25  ;;  %v2494_v10 = vmul.f32 %v3308_v36, %v4682_v48  ;;  %825 = vmatmul.f32.gmra.mxu0 %v552_v5  ;;  %1034 = vmatmul.f32.gmra.mxu1 %v553_v58  ;;  %v4705_v20 = vadd.f32 %v4646_v59, %v1506_v9  ;;  %vm2499_vm12 = vweird.f32 %v3308_v36 }
 0x24e   : > { %v1196_v19 = vpop.f32.mrf.mxu2  ;;  %vm2500_vm14 = vmor %vm2498_vm13, %vm2499_vm12  ;;  %v2517_v42 = vand.u32 2147483647, %v4698_v21  ;;  %vm2513_vm1 = vweird.f32 %v4698_v21  ;;  %v2520_v57 = vor.u32 1.1754944e-38, %v2519_v44 }
 0x24f   : > { %2850 = vst [vmem:[%s3903_s2 + $0x150] sm:$0xff] %v2492_v15  ;;  %v2495_v16 = vsub.f32 1.0, %v2494_v10  ;;  %v1197_v24 = vadd.f32 %v1196_v19, %v988_v13  ;;  %v1405_v23 = vpop.f32.mrf.mxu3  ;;  %v1638_v22 = vsub.f32 0.0, %v4705_v20 }
 0x250   : > { %vm2518_vm3 = vcmp.eq.f32.partialorder %v2517_v42, 8.507059e+37 }
 0x251   : > { %v3310_v26 = vpop.eup %3309  ;;  %v2496_v25 = vmul.f32 %v3308_v36, %v2495_v16  ;;  %v1406_v27 = vadd.f32 %v1405_v23, %v1197_v24  ;;  %v1748_v32 = vmul.f32 1.442695, %v1638_v22 }
 0x252   : > { %v4711_v14 = vadd.f32 1.0, %v3310_v26  ;;  %v781_v35 = vpop.f32.mrf.mxu0  ;;  %v3312_v11 = vpop.eup %3311 }
 0x253   : > { %v990_v29 = vpop.f32.mrf.mxu1  ;;  %v2497_v34 = vadd.f32 %v3308_v36, %v2496_v25  ;;  %v1507_v28 = vmul.f32 %v4640_v43, %v1406_v27  ;;  %v2509_v37 = vmul.f32 %v3312_v11, %v4698_v21  ;;  %vm2514_vm0 = vweird.f32 %v3312_v11 }
 0x254   : > { %v991_v31 = vadd.f32 %v990_v29, %v781_v35  ;;  %3313 = vrcp.f32 %v4711_v14  ;;  %vm2515_vm2 = vmor %vm2513_vm1, %vm2514_vm0  ;;  %v2532_v5 = vand.u32 2147483647, %v4711_v14  ;;  %v2534_v58 = vand.u32 2147483648, %v4711_v14 }
 0x255   : > { %v2501_v33 = vsel %vm2500_vm14, %v3308_v36, %v2497_v34  ;;  %3315 = vpow2.f32 %v1748_v32  ;;  %v2510_v39 = vsub.f32 1.0, %v2509_v37  ;;  %v4718_v41 = vadd.f32 %v4646_v59, %v1507_v28 }
 0x256   : > { %v2506_v38 = vsel %vm2503_vm15, %v2505_v30, %v2501_v33  ;;  %v1199_v46 = vpop.f32.mrf.mxu2  ;;  %vm2528_vm5 = vweird.f32 %v4711_v14  ;;  %vm2533_vm7 = vcmp.eq.f32.partialorder %v2532_v5, 8.507059e+37  ;;  %v2535_v19 = vor.u32 1.1754944e-38, %v2534_v58 }
 0x257   : > { %v2507_v47 = vmul.f32 %v2506_v38, %v4649_v53  ;;  %v1200_v40 = vadd.f32 %v1199_v46, %v991_v31  ;;  %v1408_v48 = vpop.f32.mrf.mxu3  ;;  %v2511_v49 = vmul.f32 %v3312_v11, %v2510_v39  ;;  %v1639_v50 = vsub.f32 0.0, %v4718_v41 }
 0x259   : > { %2851 = vst [vmem:[%s3903_s2 + $0x158] sm:$0xff] %v2507_v47  ;;  %v1409_v51 = vadd.f32 %v1408_v48, %v1200_v40  ;;  %v2512_v60 = vadd.f32 %v3312_v11, %v2511_v49  ;;  %v1750_v63 = vmul.f32 1.442695, %v1639_v50 }
 0x25a   : > { %v3314_v54 = vpop.eup %3313  ;;  %v784_v0 = vpop.f32.mrf.mxu0 }
 0x25b   : > { %v993_v61 = vpop.f32.mrf.mxu1  ;;  %v3316_v53 = vpop.eup %3315  ;;  %v2524_v56 = vmul.f32 %v3314_v54, %v4711_v14  ;;  %v1508_v55 = vmul.f32 %v4640_v43, %v1409_v51  ;;  %v2516_v2 = vsel %vm2515_vm2, %v3312_v11, %v2512_v60  ;;  %3317 = vpow2.f32 %v1750_v63 }
 0x25c   : > { %v994_v52 = vadd.f32 %v993_v61, %v784_v0  ;;  %v4728_v3 = vadd.f32 1.0, %v3316_v53  ;;  %v2521_v4 = vsel %vm2518_vm3, %v2520_v57, %v2516_v2  ;;  %vm2529_vm4 = vweird.f32 %v3314_v54 }
 0x25d   : > { %v2525_v6 = vsub.f32 1.0, %v2524_v56  ;;  %v4731_v1 = vadd.f32 %v4646_v59, %v1508_v55  ;;  %v2522_v12 = vmul.f32 %v2521_v4, %v4667_v18  ;;  %vm2530_vm6 = vmor %vm2528_vm5, %vm2529_vm4 }
 0x25e   : > { %3319 = vrcp.f32 %v4728_v3  ;;  %v1202_v8 = vpop.f32.mrf.mxu2  ;;  %v2549_v28 = vand.u32 2147483648, %v4728_v3  ;;  %vm2543_vm9 = vweird.f32 %v4728_v3 }
 0x25f   : > { %v2526_v21 = vmul.f32 %v3314_v54, %v2525_v6  ;;  %v1640_v9 = vsub.f32 0.0, %v4731_v1  ;;  %v1203_v36 = vadd.f32 %v1202_v8, %v994_v52  ;;  %v1411_v62 = vpop.f32.mrf.mxu3  ;;  %2852 = vst [vmem:[%s3903_s2 + $0x160] sm:$0xff] %v2522_v12 }
 0x260   : > { %v2550_v42 = vor.u32 1.1754944e-38, %v2549_v28 }
 0x261   : > { %v2527_v13 = vadd.f32 %v3314_v54, %v2526_v21  ;;  %v1752_v15 = vmul.f32 1.442695, %v1640_v9  ;;  %v1412_v10 = vadd.f32 %v1411_v62, %v1203_v36  ;;  %v3318_v18 = vpop.eup %3317 }
 0x262   : > { %v787_v16 = vpop.f32.mrf.mxu0  ;;  %v4740_v17 = vadd.f32 1.0, %v3318_v18 }
 0x263   : > { %v996_v24 = vpop.f32.mrf.mxu1  ;;  %v2531_v23 = vsel %vm2530_vm6, %v3314_v54, %v2527_v13  ;;  %3321 = vpow2.f32 %v1752_v15  ;;  %v1509_v22 = vmul.f32 %v4640_v43, %v1412_v10 }
 0x264   : > { %v3320_v26 = vpop.eup %3319  ;;  %v2536_v25 = vsel %vm2533_vm7, %v2535_v19, %v2531_v23  ;;  %v997_v7 = vadd.f32 %v996_v24, %v787_v16  ;;  %3323 = vrcp.f32 %v4740_v17  ;;  %v2564_v53 = vand.u32 2147483648, %v4740_v17 }
 0x265   : > { %v2537_v27 = vmul.f32 %v2536_v25, %v4685_v45  ;;  %v2539_v14 = vmul.f32 %v3320_v26, %v4728_v3  ;;  %v4747_v32 = vadd.f32 %v4646_v59, %v1509_v22  ;;  %vm2544_vm8 = vweird.f32 %v3320_v26 }
 0x266   : > { %v1205_v35 = vpop.f32.mrf.mxu2  ;;  %v2547_v45 = vand.u32 2147483647, %v4728_v3  ;;  %vm2545_vm10 = vmor %vm2543_vm9, %vm2544_vm8  ;;  %v2562_v52 = vand.u32 2147483647, %v4740_v17  ;;  %vm2558_vm13 = vweird.f32 %v4740_v17  ;;  %v2565_v8 = vor.u32 1.1754944e-38, %v2564_v53 }
 0x267   : > { %2853 = vst [vmem:[%s3903_s2 + $0x168] sm:$0xff] %v2537_v27  ;;  %v2540_v29 = vsub.f32 1.0, %v2539_v14  ;;  %v1206_v11 = vadd.f32 %v1205_v35, %v997_v7  ;;  %v1414_v34 = vpop.f32.mrf.mxu3  ;;  %v1641_v31 = vsub.f32 0.0, %v4747_v32 }
 0x268   : > { %vm2548_vm11 = vcmp.eq.f32.partialorder %v2547_v45, 8.507059e+37  ;;  %vm2563_vm15 = vcmp.eq.f32.partialorder %v2562_v52, 8.507059e+37 }
 0x269   : > { %v3322_v30 = vpop.eup %3321  ;;  %v2541_v37 = vmul.f32 %v3320_v26, %v2540_v29  ;;  %v1415_v33 = vadd.f32 %v1414_v34, %v1206_v11  ;;  %v1754_v39 = vmul.f32 1.442695, %v1641_v31 }
 0x26a   : > { %v4753_v38 = vadd.f32 1.0, %v3322_v30  ;;  %v790_v46 = vpop.f32.mrf.mxu0  ;;  %v3324_v44 = vpop.eup %3323 }
 0x26b   : > { %v999_v47 = vpop.f32.mrf.mxu1  ;;  %v2542_v40 = vadd.f32 %v3320_v26, %v2541_v37  ;;  %v1510_v48 = vmul.f32 %v4640_v43, %v1415_v33  ;;  %v2554_v50 = vmul.f32 %v3324_v44, %v4740_v17  ;;  %vm2559_vm12 = vweird.f32 %v3324_v44 }
 0x26c   : > { %v1000_v49 = vadd.f32 %v999_v47, %v790_v46  ;;  %3325 = vrcp.f32 %v4753_v38  ;;  %vm2560_vm14 = vmor %vm2558_vm13, %vm2559_vm12  ;;  %v2577_v16 = vand.u32 2147483647, %v4753_v38  ;;  %v2579_v24 = vand.u32 2147483648, %v4753_v38 }
 0x26d   : > { %v2546_v51 = vsel %vm2545_vm10, %v3320_v26, %v2542_v40  ;;  %3327 = vpow2.f32 %v1754_v39  ;;  %v2555_v60 = vsub.f32 1.0, %v2554_v50  ;;  %v4760_v63 = vadd.f32 %v4646_v59, %v1510_v48 }
 0x26e   : > { %v2551_v54 = vsel %vm2548_vm11, %v2550_v42, %v2546_v51  ;;  %v1208_v0 = vpop.f32.mrf.mxu2  ;;  %vm2573_vm1 = vweird.f32 %v4753_v38  ;;  %vm2578_vm3 = vcmp.eq.f32.partialorder %v2577_v16, 8.507059e+37  ;;  %v2580_v35 = vor.u32 1.1754944e-38, %v2579_v24 }
 0x26f   : > { %v2552_v61 = vmul.f32 %v2551_v54, %v4705_v20  ;;  %v1209_v57 = vadd.f32 %v1208_v0, %v1000_v49  ;;  %v1417_v56 = vpop.f32.mrf.mxu3  ;;  %v2556_v55 = vmul.f32 %v3324_v44, %v2555_v60  ;;  %v1642_v2 = vsub.f32 0.0, %v4760_v63 }
 0x271   : > { %2854 = vst [vmem:[%s3903_s2 + $0x170] sm:$0xff] %v2552_v61  ;;  %v1418_v3 = vadd.f32 %v1417_v56, %v1209_v57  ;;  %v2557_v6 = vadd.f32 %v3324_v44, %v2556_v55  ;;  %v1756_v12 = vmul.f32 1.442695, %v1642_v2 }
 0x272   : > { %v3326_v4 = vpop.eup %3325  ;;  %v793_v5 = vpop.f32.mrf.mxu0 }
 0x273   : > { %v1002_v58 = vpop.f32.mrf.mxu1  ;;  %v3328_v20 = vpop.eup %3327  ;;  %v2569_v21 = vmul.f32 %v3326_v4, %v4753_v38  ;;  %v1511_v9 = vmul.f32 %v4640_v43, %v1418_v3  ;;  %v2561_v62 = vsel %vm2560_vm14, %v3324_v44, %v2557_v6  ;;  %3329 = vpow2.f32 %v1756_v12 }
 0x274   : > { %v1003_v36 = vadd.f32 %v1002_v58, %v793_v5  ;;  %v4770_v13 = vadd.f32 1.0, %v3328_v20  ;;  %v2566_v15 = vsel %vm2563_vm15, %v2565_v8, %v2561_v62  ;;  %vm2574_vm0 = vweird.f32 %v3326_v4 }
 0x275   : > { %v2570_v10 = vsub.f32 1.0, %v2569_v21  ;;  %v4773_v18 = vadd.f32 %v4646_v59, %v1511_v9  ;;  %v2567_v19 = vmul.f32 %v2566_v15, %v4718_v41  ;;  %vm2575_vm2 = vmor %vm2573_vm1, %vm2574_vm0 }
 0x276   : > { %3331 = vrcp.f32 %v4770_v13  ;;  %v1211_v23 = vpop.f32.mrf.mxu2  ;;  %v2594_v48 = vand.u32 2147483648, %v4770_v13  ;;  %vm2588_vm5 = vweird.f32 %v4770_v13 }
 0x277   : > { %v2571_v17 = vmul.f32 %v3326_v4, %v2570_v10  ;;  %v1643_v22 = vsub.f32 0.0, %v4773_v18  ;;  %v1212_v26 = vadd.f32 %v1211_v23, %v1003_v36  ;;  %v1420_v25 = vpop.f32.mrf.mxu3  ;;  %2855 = vst [vmem:[%s3903_s2 + $0x178] sm:$0xff] %v2567_v19 }
 0x278   : > { %v2595_v52 = vor.u32 1.1754944e-38, %v2594_v48 }
 0x279   : > { %v2572_v7 = vadd.f32 %v3326_v4, %v2571_v17  ;;  %v1758_v27 = vmul.f32 1.442695, %v1643_v22  ;;  %v1421_v14 = vadd.f32 %v1420_v25, %v1212_v26  ;;  %v3330_v41 = vpop.eup %3329 }
 0x27a   : > { %v796_v29 = vpop.f32.mrf.mxu0  ;;  %v4782_v28 = vadd.f32 1.0, %v3330_v41 }
 0x27b   : > { %v1005_v11 = vpop.f32.mrf.mxu1  ;;  %v2576_v34 = vsel %vm2575_vm2, %v3326_v4, %v2572_v7  ;;  %3333 = vpow2.f32 %v1758_v27  ;;  %v1512_v31 = vmul.f32 %v4640_v43, %v1421_v14 }
 0x27c   : > { %v3332_v30 = vpop.eup %3331  ;;  %v2581_v37 = vsel %vm2578_vm3, %v2580_v35, %v2576_v34  ;;  %v1006_v45 = vadd.f32 %v1005_v11, %v796_v29  ;;  %3335 = vrcp.f32 %v4782_v28  ;;  %v2609_v20 = vand.u32 2147483648, %v4782_v28 }
 0x27d   : > { %v2582_v33 = vmul.f32 %v2581_v37, %v4731_v1  ;;  %v2584_v38 = vmul.f32 %v3332_v30, %v4770_v13  ;;  %v4789_v39 = vadd.f32 %v4646_v59, %v1512_v31  ;;  %vm2589_vm4 = vweird.f32 %v3332_v30 }
 0x27e   : > { %v1214_v46 = vpop.f32.mrf.mxu2  ;;  %v2592_v1 = vand.u32 2147483647, %v4770_v13  ;;  %vm2590_vm6 = vmor %vm2588_vm5, %vm2589_vm4  ;;  %v2607_v36 = vand.u32 2147483647, %v4782_v28  ;;  %vm2603_vm9 = vweird.f32 %v4782_v28  ;;  %v2610_v23 = vor.u32 1.1754944e-38, %v2609_v20 }
 0x27f   : > { %2856 = vst [vmem:[%s3903_s2 + $0x180] sm:$0xff] %v2582_v33  ;;  %v2585_v47 = vsub.f32 1.0, %v2584_v38  ;;  %v1215_v44 = vadd.f32 %v1214_v46, %v1006_v45  ;;  %v1423_v40 = vpop.f32.mrf.mxu3  ;;  %v1644_v49 = vsub.f32 0.0, %v4789_v39 }
 0x280   : > { %vm2593_vm7 = vcmp.eq.f32.partialorder %v2592_v1, 8.507059e+37  ;;  %vm2608_vm11 = vcmp.eq.f32.partialorder %v2607_v36, 8.507059e+37 }
 0x281   : > { %v3334_v42 = vpop.eup %3333  ;;  %v2586_v50 = vmul.f32 %v3332_v30, %v2585_v47  ;;  %v1424_v51 = vadd.f32 %v1423_v40, %v1215_v44  ;;  %v1760_v60 = vmul.f32 1.442695, %v1644_v49 }
 0x282   : > { %v4795_v54 = vadd.f32 1.0, %v3334_v42  ;;  %v799_v0 = vpop.f32.mrf.mxu0  ;;  %v3336_v53 = vpop.eup %3335 }
 0x283   : > { %v1008_v61 = vpop.f32.mrf.mxu1  ;;  %v2587_v57 = vadd.f32 %v3332_v30, %v2586_v50  ;;  %v1513_v56 = vmul.f32 %v4640_v43, %v1424_v51  ;;  %v2599_v2 = vmul.f32 %v3336_v53, %v4782_v28  ;;  %vm2604_vm8 = vweird.f32 %v3336_v53 }
 0x284   : > { %v1009_v55 = vadd.f32 %v1008_v61, %v799_v0  ;;  %3337 = vrcp.f32 %v4795_v54  ;;  %vm2605_vm10 = vmor %vm2603_vm9, %vm2604_vm8  ;;  %v2622_v29 = vand.u32 2147483647, %v4795_v54  ;;  %v2624_v11 = vand.u32 2147483648, %v4795_v54 }
 0x285   : > { %v2591_v3 = vsel %vm2590_vm6, %v3332_v30, %v2587_v57  ;;  %3339 = vpow2.f32 %v1760_v60  ;;  %v2600_v6 = vsub.f32 1.0, %v2599_v2  ;;  %v4802_v12 = vadd.f32 %v4646_v59, %v1513_v56 }
 0x286   : > { %v2596_v4 = vsel %vm2593_vm7, %v2595_v52, %v2591_v3  ;;  %v1217_v5 = vpop.f32.mrf.mxu2  ;;  %vm2618_vm13 = vweird.f32 %v4795_v54  ;;  %vm2623_vm15 = vcmp.eq.f32.partialorder %v2622_v29, 8.507059e+37  ;;  %v2625_v46 = vor.u32 1.1754944e-38, %v2624_v11 }
 0x287   : > { %v2597_v58 = vmul.f32 %v2596_v4, %v4747_v32  ;;  %v1218_v8 = vadd.f32 %v1217_v5, %v1009_v55  ;;  %v1426_v21 = vpop.f32.mrf.mxu3  ;;  %v2601_v9 = vmul.f32 %v3336_v53, %v2600_v6  ;;  %v1645_v62 = vsub.f32 0.0, %v4802_v12 }
 0x289   : > { %2857 = vst [vmem:[%s3903_s2 + $0x188] sm:$0xff] %v2597_v58  ;;  %v1427_v13 = vadd.f32 %v1426_v21, %v1218_v8  ;;  %v2602_v10 = vadd.f32 %v3336_v53, %v2601_v9  ;;  %v1762_v19 = vmul.f32 1.442695, %v1645_v62 }
 0x28a   : > { %v3338_v15 = vpop.eup %3337  ;;  %v802_v16 = vpop.f32.mrf.mxu0 }
 0x28b   : > { %v1011_v24 = vpop.f32.mrf.mxu1  ;;  %v3340_v32 = vpop.eup %3339  ;;  %v2614_v17 = vmul.f32 %v3338_v15, %v4795_v54  ;;  %v1514_v22 = vmul.f32 %v4640_v43, %v1427_v13  ;;  %v2606_v25 = vsel %vm2605_vm10, %v3336_v53, %v2602_v10  ;;  %3341 = vpow2.f32 %v1762_v19 }
 0x28c   : > { %v1012_v26 = vadd.f32 %v1011_v24, %v802_v16  ;;  %v4812_v7 = vadd.f32 1.0, %v3340_v32  ;;  %v2611_v27 = vsel %vm2608_vm11, %v2610_v23, %v2606_v25  ;;  %vm2619_vm12 = vweird.f32 %v3338_v15 }
 0x28d   : > { %v2615_v14 = vsub.f32 1.0, %v2614_v17  ;;  %v4815_v41 = vadd.f32 %v4646_v59, %v1514_v22  ;;  %v2612_v35 = vmul.f32 %v2611_v27, %v4760_v63  ;;  %vm2620_vm14 = vmor %vm2618_vm13, %vm2619_vm12 }
 0x28e   : > { %3343 = vrcp.f32 %v4812_v7  ;;  %v1220_v34 = vpop.f32.mrf.mxu2  ;;  %v2639_v56 = vand.u32 2147483648, %v4812_v7  ;;  %vm2633_vm1 = vweird.f32 %v4812_v7 }
 0x28f   : > { %v2616_v28 = vmul.f32 %v3338_v15, %v2615_v14  ;;  %v1646_v31 = vsub.f32 0.0, %v4815_v41  ;;  %v1221_v30 = vadd.f32 %v1220_v34, %v1012_v26  ;;  %v1429_v37 = vpop.f32.mrf.mxu3  ;;  %2858 = vst [vmem:[%s3903_s2 + $0x190] sm:$0xff] %v2612_v35 }
 0x290   : > { %v2640_v36 = vor.u32 1.1754944e-38, %v2639_v56 }
 0x291   : > { %v2617_v45 = vadd.f32 %v3338_v15, %v2616_v28  ;;  %v1764_v33 = vmul.f32 1.442695, %v1646_v31  ;;  %v1430_v38 = vadd.f32 %v1429_v37, %v1221_v30  ;;  %v3342_v63 = vpop.eup %3341 }
 0x292   : > { %v805_v47 = vpop.f32.mrf.mxu0  ;;  %v4824_v48 = vadd.f32 1.0, %v3342_v63 }
 0x293   : > { %v1014_v44 = vpop.f32.mrf.mxu1  ;;  %v2621_v40 = vsel %vm2620_vm14, %v3338_v15, %v2617_v45  ;;  %3345 = vpow2.f32 %v1764_v33  ;;  %v1515_v49 = vmul.f32 %v4640_v43, %v1430_v38 }
 0x294   : > { %v3344_v42 = vpop.eup %3343  ;;  %v2626_v50 = vsel %vm2623_vm15, %v2625_v46, %v2621_v40  ;;  %v1015_v1 = vadd.f32 %v1014_v44, %v805_v47  ;;  %3347 = vrcp.f32 %v4824_v48  ;;  %v2654_v32 = vand.u32 2147483648, %v4824_v48 }
 0x295   : > { %v2627_v51 = vmul.f32 %v2626_v50, %v4773_v18  ;;  %v2629_v54 = vmul.f32 %v3344_v42, %v4812_v7  ;;  %v4831_v60 = vadd.f32 %v4646_v59, %v1515_v49  ;;  %vm2634_vm0 = vweird.f32 %v3344_v42 }
 0x296   : > { %v1223_v0 = vpop.f32.mrf.mxu2  ;;  %v2637_v18 = vand.u32 2147483647, %v4812_v7  ;;  %vm2635_vm2 = vmor %vm2633_vm1, %vm2634_vm0  ;;  %v2652_v26 = vand.u32 2147483647, %v4824_v48  ;;  %vm2648_vm5 = vweird.f32 %v4824_v48  ;;  %v2655_v34 = vor.u32 1.1754944e-38, %v2654_v32 }
 0x297   : > { %2859 = vst [vmem:[%s3903_s2 + $0x198] sm:$0xff] %v2627_v51  ;;  %v2630_v61 = vsub.f32 1.0, %v2629_v54  ;;  %v1224_v53 = vadd.f32 %v1223_v0, %v1015_v1  ;;  %v1432_v57 = vpop.f32.mrf.mxu3  ;;  %v1647_v55 = vsub.f32 0.0, %v4831_v60  ;;  %v4882_v32 = vld [vmem:[#allocation7] ss:$0 sm:$0xff] }
 0x298   : > { %vm2638_vm3 = vcmp.eq.f32.partialorder %v2637_v18, 8.507059e+37  ;;  %vm2653_vm7 = vcmp.eq.f32.partialorder %v2652_v26, 8.507059e+37 }
 0x299   : > { %v3346_v52 = vpop.eup %3345  ;;  %v2631_v2 = vmul.f32 %v3344_v42, %v2630_v61  ;;  %v1433_v3 = vadd.f32 %v1432_v57, %v1224_v53  ;;  %v1766_v6 = vmul.f32 1.442695, %v1647_v55 }
 0x29a   : > { %v4837_v4 = vadd.f32 1.0, %v3346_v52  ;;  %v808_v5 = vpop.f32.mrf.mxu0  ;;  %v3348_v20 = vpop.eup %3347 }
 0x29b   : > { %v1017_v58 = vpop.f32.mrf.mxu1  ;;  %v2632_v8 = vadd.f32 %v3344_v42, %v2631_v2  ;;  %v1516_v21 = vmul.f32 %v4640_v43, %v1433_v3  ;;  %v2644_v62 = vmul.f32 %v3348_v20, %v4824_v48  ;;  %vm2649_vm4 = vweird.f32 %v3348_v20 }
 0x29c   : > { %v1018_v9 = vadd.f32 %v1017_v58, %v808_v5  ;;  %3349 = vrcp.f32 %v4837_v4  ;;  %vm2650_vm6 = vmor %vm2648_vm5, %vm2649_vm4  ;;  %v2667_v47 = vand.u32 2147483647, %v4837_v4  ;;  %v2669_v44 = vand.u32 2147483648, %v4837_v4 }
 0x29d   : > { %v2636_v13 = vsel %vm2635_vm2, %v3344_v42, %v2632_v8  ;;  %3351 = vpow2.f32 %v1766_v6  ;;  %v2645_v10 = vsub.f32 1.0, %v2644_v62  ;;  %v4844_v19 = vadd.f32 %v4646_v59, %v1516_v21 }
 0x29e   : > { %v2641_v15 = vsel %vm2638_vm3, %v2640_v36, %v2636_v13  ;;  %v1226_v16 = vpop.f32.mrf.mxu2  ;;  %vm2663_vm9 = vweird.f32 %v4837_v4  ;;  %vm2668_vm11 = vcmp.eq.f32.partialorder %v2667_v47, 8.507059e+37  ;;  %v2670_v0 = vor.u32 1.1754944e-38, %v2669_v44 }
 0x29f   : > { %v2642_v24 = vmul.f32 %v2641_v15, %v4789_v39  ;;  %v1227_v23 = vadd.f32 %v1226_v16, %v1018_v9  ;;  %v1435_v17 = vpop.f32.mrf.mxu3  ;;  %v2646_v22 = vmul.f32 %v3348_v20, %v2645_v10  ;;  %v1648_v25 = vsub.f32 0.0, %v4844_v19 }
 0x2a1   : > { %2860 = vst [vmem:[%s3903_s2 + $0x1a0] sm:$0xff] %v2642_v24  ;;  %v1436_v7 = vadd.f32 %v1435_v17, %v1227_v23  ;;  %v2647_v14 = vadd.f32 %v3348_v20, %v2646_v22  ;;  %v1768_v35 = vmul.f32 1.442695, %v1648_v25 }
 0x2a2   : > { %v3350_v27 = vpop.eup %3349  ;;  %v811_v29 = vpop.f32.mrf.mxu0 }
 0x2a3   : > { %v1020_v11 = vpop.f32.mrf.mxu1  ;;  %v3352_v39 = vpop.eup %3351  ;;  %v2659_v28 = vmul.f32 %v3350_v27, %v4837_v4  ;;  %v1517_v31 = vmul.f32 %v4640_v43, %v1436_v7  ;;  %v2651_v37 = vsel %vm2650_vm6, %v3348_v20, %v2647_v14  ;;  %3353 = vpow2.f32 %v1768_v35  ;;  %v4887_v14 = vld [vmem:[#allocation8] ss:$0 sm:$0xff] }
 0x2a4   : > { %v1021_v30 = vadd.f32 %v1020_v11, %v811_v29  ;;  %v4854_v45 = vadd.f32 1.0, %v3352_v39  ;;  %v2656_v33 = vsel %vm2653_vm7, %v2655_v34, %v2651_v37  ;;  %vm2664_vm8 = vweird.f32 %v3350_v27 }
 0x2a5   : > { %v2660_v38 = vsub.f32 1.0, %v2659_v28  ;;  %v4857_v63 = vadd.f32 %v4646_v59, %v1517_v31  ;;  %v2657_v46 = vmul.f32 %v2656_v33, %v4802_v12  ;;  %vm2665_vm10 = vmor %vm2663_vm9, %vm2664_vm8 }
 0x2a6   : > { %3355 = vrcp.f32 %v4854_v45  ;;  %v1229_v40 = vpop.f32.mrf.mxu2  ;;  %v2684_v21 = vand.u32 2147483648, %v4854_v45  ;;  %vm2678_vm13 = vweird.f32 %v4854_v45 }
 0x2a7   : > { %v2661_v48 = vmul.f32 %v3350_v27, %v2660_v38  ;;  %v1649_v49 = vsub.f32 0.0, %v4857_v63  ;;  %v1230_v42 = vadd.f32 %v1229_v40, %v1021_v30  ;;  %v1438_v50 = vpop.f32.mrf.mxu3  ;;  %2861 = vst [vmem:[%s3903_s2 + $0x1a8] sm:$0xff] %v2657_v46 }
 0x2a8   : > { %v2685_v22 = vor.u32 1.1754944e-38, %v2684_v21 }
 0x2a9   : > { %v2662_v1 = vadd.f32 %v3350_v27, %v2661_v48  ;;  %v1770_v51 = vmul.f32 1.442695, %v1649_v49  ;;  %v1439_v54 = vadd.f32 %v1438_v50, %v1230_v42  ;;  %v3354_v12 = vpop.eup %3353 }
 0x2aa   : > { %v814_v61 = vpop.f32.mrf.mxu0  ;;  %v4866_v56 = vadd.f32 1.0, %v3354_v12 }
 0x2ab   : > { %v1023_v53 = vpop.f32.mrf.mxu1  ;;  %v2666_v57 = vsel %vm2665_vm10, %v3350_v27, %v2662_v1  ;;  %3357 = vpow2.f32 %v1770_v51  ;;  %v1518_v55 = vmul.f32 %v4640_v43, %v1439_v54 }
 0x2ac   : > { %v3356_v52 = vpop.eup %3355  ;;  %v2671_v2 = vsel %vm2668_vm11, %v2670_v0, %v2666_v57  ;;  %v1024_v18 = vadd.f32 %v1023_v53, %v814_v61  ;;  %3359 = vrcp.f32 %v4866_v56  ;;  %v2699_v39 = vand.u32 2147483648, %v4866_v56 }
 0x2ad   : > { %v2672_v3 = vmul.f32 %v2671_v2, %v4815_v41  ;;  %v2674_v4 = vmul.f32 %v3356_v52, %v4854_v45  ;;  %v4873_v6 = vadd.f32 %v4646_v59, %v1518_v55  ;;  %vm2679_vm12 = vweird.f32 %v3356_v52 }
 0x2ae   : > { %v1232_v5 = vpop.f32.mrf.mxu2  ;;  %v2682_v41 = vand.u32 2147483647, %v4854_v45  ;;  %vm2680_vm14 = vmor %vm2678_vm13, %vm2679_vm12  ;;  %v2697_v30 = vand.u32 2147483647, %v4866_v56  ;;  %vm2693_vm1 = vweird.f32 %v4866_v56  ;;  %v2700_v40 = vor.u32 1.1754944e-38, %v2699_v39 }
 0x2af   : > { %2862 = vst [vmem:[%s3903_s2 + $0x1b0] sm:$0xff] %v2672_v3  ;;  %v2675_v58 = vsub.f32 1.0, %v2674_v4  ;;  %v1233_v20 = vadd.f32 %v1232_v5, %v1024_v18  ;;  %v1441_v8 = vpop.f32.mrf.mxu3  ;;  %v1650_v43 = vsub.f32 0.0, %v4873_v6 }
 0x2b0   : > { %vm2683_vm15 = vcmp.eq.f32.partialorder %v2682_v41, 8.507059e+37  ;;  %vm2698_vm3 = vcmp.eq.f32.partialorder %v2697_v30, 8.507059e+37 }
 0x2b1   : > { %v3358_v9 = vpop.eup %3357  ;;  %v2676_v36 = vmul.f32 %v3356_v52, %v2675_v58  ;;  %v1442_v62 = vadd.f32 %v1441_v8, %v1233_v20  ;;  %v1772_v15 = vmul.f32 1.442695, %v1650_v43 }
 0x2b2   : > { %v4879_v13 = vadd.f32 1.0, %v3358_v9  ;;  %v817_v59 = vpop.f32.mrf.mxu0  ;;  %v3360_v16 = vpop.eup %3359 }
 0x2b3   : > { %v1026_v10 = vpop.f32.mrf.mxu1  ;;  %v2677_v24 = vadd.f32 %v3356_v52, %v2676_v36  ;;  %v1519_v23 = vmul.f32 %v4882_v32, %v1442_v62  ;;  %v2689_v26 = vmul.f32 %v3360_v16, %v4866_v56  ;;  %vm2694_vm0 = vweird.f32 %v3360_v16 }
 0x2b4   : > { %v1027_v17 = vadd.f32 %v1026_v10, %v817_v59  ;;  %3361 = vrcp.f32 %v4879_v13  ;;  %vm2695_vm2 = vmor %vm2693_vm1, %vm2694_vm0  ;;  %v2712_v61 = vand.u32 2147483647, %v4879_v13  ;;  %v2714_v53 = vand.u32 2147483648, %v4879_v13 }
 0x2b5   : > { %v2681_v25 = vsel %vm2680_vm14, %v3356_v52, %v2677_v24  ;;  %3363 = vpow2.f32 %v1772_v15  ;;  %v2690_v27 = vsub.f32 1.0, %v2689_v26  ;;  %v4890_v35 = vadd.f32 %v4887_v14, %v1519_v23 }
 0x2b6   : > { %v2686_v7 = vsel %vm2683_vm15, %v2685_v22, %v2681_v25  ;;  %v1235_v29 = vpop.f32.mrf.mxu2  ;;  %vm2708_vm5 = vweird.f32 %v4879_v13  ;;  %vm2713_vm7 = vcmp.eq.f32.partialorder %v2712_v61, 8.507059e+37  ;;  %v2715_v5 = vor.u32 1.1754944e-38, %v2714_v53 }
 0x2b7   : > { %v2687_v11 = vmul.f32 %v2686_v7, %v4831_v60  ;;  %v1236_v34 = vadd.f32 %v1235_v29, %v1027_v17  ;;  %v1444_v28 = vpop.f32.mrf.mxu3  ;;  %v2691_v31 = vmul.f32 %v3360_v16, %v2690_v27  ;;  %v1651_v37 = vsub.f32 0.0, %v4890_v35 }
 0x2b9   : > { %2863 = vst [vmem:[%s3903_s2 + $0x1b8] sm:$0xff] %v2687_v11  ;;  %v1445_v45 = vadd.f32 %v1444_v28, %v1236_v34  ;;  %v2692_v38 = vadd.f32 %v3360_v16, %v2691_v31  ;;  %v1774_v46 = vmul.f32 1.442695, %v1651_v37 }
 0x2ba   : > { %v3362_v33 = vpop.eup %3361  ;;  %v820_v47 = vpop.f32.mrf.mxu0 }
 0x2bb   : > { %v1029_v44 = vpop.f32.mrf.mxu1  ;;  %v3364_v60 = vpop.eup %3363  ;;  %v2704_v48 = vmul.f32 %v3362_v33, %v4879_v13  ;;  %v1520_v49 = vmul.f32 %v4882_v32, %v1445_v45  ;;  %v2696_v50 = vsel %vm2695_vm2, %v3360_v16, %v2692_v38  ;;  %3365 = vpow2.f32 %v1774_v46 }
 0x2bc   : > { %v1030_v42 = vadd.f32 %v1029_v44, %v820_v47  ;;  %v4900_v1 = vadd.f32 1.0, %v3364_v60  ;;  %v2701_v51 = vsel %vm2698_vm3, %v2700_v40, %v2696_v50  ;;  %vm2709_vm4 = vweird.f32 %v3362_v33 }
 0x2bd   : > { %v2705_v54 = vsub.f32 1.0, %v2704_v48  ;;  %v4903_v12 = vadd.f32 %v4887_v14, %v1520_v49  ;;  %v2702_v0 = vmul.f32 %v2701_v51, %v4844_v19  ;;  %vm2710_vm6 = vmor %vm2708_vm5, %vm2709_vm4 }
 0x2be   : > { %3367 = vrcp.f32 %v4900_v1  ;;  %v1238_v57 = vpop.f32.mrf.mxu2  ;;  %v2729_v23 = vand.u32 2147483648, %v4900_v1  ;;  %vm2723_vm9 = vweird.f32 %v4900_v1 }
 0x2bf   : > { %v2706_v56 = vmul.f32 %v3362_v33, %v2705_v54  ;;  %v1652_v55 = vsub.f32 0.0, %v4903_v12  ;;  %v1239_v52 = vadd.f32 %v1238_v57, %v1030_v42  ;;  %v1447_v2 = vpop.f32.mrf.mxu3  ;;  %2864 = vst [vmem:[%s3903_s2 + $0x1c0] sm:$0xff] %v2702_v0 }
 0x2c0   : > { %v2730_v30 = vor.u32 1.1754944e-38, %v2729_v23 }
 0x2c1   : > { %v2707_v18 = vadd.f32 %v3362_v33, %v2706_v56  ;;  %v1776_v3 = vmul.f32 1.442695, %v1652_v55  ;;  %v1448_v4 = vadd.f32 %v1447_v2, %v1239_v52  ;;  %v3366_v19 = vpop.eup %3365 }
 0x2c2   : > { %v823_v58 = vpop.f32.mrf.mxu0  ;;  %v4912_v21 = vadd.f32 1.0, %v3366_v19 }
 0x2c3   : > { %v1032_v20 = vpop.f32.mrf.mxu1  ;;  %v2711_v8 = vsel %vm2710_vm6, %v3362_v33, %v2707_v18  ;;  %3369 = vpow2.f32 %v1776_v3  ;;  %v1521_v43 = vmul.f32 %v4882_v32, %v1448_v4 }
 0x2c4   : > { %v3368_v9 = vpop.eup %3367  ;;  %v2716_v36 = vsel %vm2713_vm7, %v2715_v5, %v2711_v8  ;;  %v1033_v41 = vadd.f32 %v1032_v20, %v823_v58  ;;  %3371 = vrcp.f32 %v4912_v21  ;;  %v2744_v60 = vand.u32 2147483648, %v4912_v21 }
 0x2c5   : > { %v2717_v62 = vmul.f32 %v2716_v36, %v4857_v63  ;;  %v2719_v13 = vmul.f32 %v3368_v9, %v4900_v1  ;;  %v4919_v15 = vadd.f32 %v4887_v14, %v1521_v43  ;;  %vm2724_vm8 = vweird.f32 %v3368_v9 }
 0x2c6   : > { %v1241_v59 = vpop.f32.mrf.mxu2  ;;  %v2727_v63 = vand.u32 2147483647, %v4900_v1  ;;  %vm2725_vm10 = vmor %vm2723_vm9, %vm2724_vm8  ;;  %v2742_v42 = vand.u32 2147483647, %v4912_v21  ;;  %vm2738_vm13 = vweird.f32 %v4912_v21 }
 0x2c7   : > { %2865 = vst [vmem:[%s3903_s2 + $0x1c8] sm:$0xff] %v2717_v62  ;;  %v2720_v10 = vsub.f32 1.0, %v2719_v13  ;;  %v1242_v16 = vadd.f32 %v1241_v59, %v1033_v41  ;;  %v1450_v24 = vpop.f32.mrf.mxu3  ;;  %v1653_v17 = vsub.f32 0.0, %v4919_v15 }
 0x2c8   : > { %vm2728_vm11 = vcmp.eq.f32.partialorder %v2727_v63, 8.507059e+37  ;;  %vm2743_vm15 = vcmp.eq.f32.partialorder %v2742_v42, 8.507059e+37 }
 0x2c9   : > { %v3370_v22 = vpop.eup %3369  ;;  %v2721_v26 = vmul.f32 %v3368_v9, %v2720_v10  ;;  %v1451_v25 = vadd.f32 %v1450_v24, %v1242_v16  ;;  %v1778_v27 = vmul.f32 1.442695, %v1653_v17 }
 0x2ca   : > { %v1844_v7 = vadd.f32 1.0, %v3370_v22  ;;  %v826_v29 = vpop.f32.mrf.mxu0  ;;  %v3372_v39 = vpop.eup %3371 }
 0x2cb   : > { %v1035_v11 = vpop.f32.mrf.mxu1  ;;  %v2722_v34 = vadd.f32 %v3368_v9, %v2721_v26  ;;  %v1522_v28 = vmul.f32 %v4882_v32, %v1451_v25  ;;  %v2734_v37 = vmul.f32 %v3372_v39, %v4912_v21  ;;  %vm2739_vm12 = vweird.f32 %v3372_v39 }
 0x2cc   : > { %v1036_v31 = vadd.f32 %v1035_v11, %v826_v29  ;;  %3373 = vrcp.f32 %v1844_v7  ;;  %vm2740_vm14 = vmor %vm2738_vm13, %vm2739_vm12  ;;  %v2759_v4 = vand.u32 2147483648, %v1844_v7  ;;  %v2757_v5 = vand.u32 2147483647, %v1844_v7 }
 0x2cd   : > { %v2726_v45 = vsel %vm2725_vm10, %v3368_v9, %v2722_v34  ;;  %3375 = vpow2.f32 %v1778_v27  ;;  %v2735_v38 = vsub.f32 1.0, %v2734_v37  ;;  %v4929_v46 = vadd.f32 %v4887_v14, %v1522_v28 }
 0x2ce   : > { %v2731_v33 = vsel %vm2728_vm11, %v2730_v30, %v2726_v45  ;;  %v1244_v47 = vpop.f32.mrf.mxu2  ;;  %vm2753_vm1 = vweird.f32 %v1844_v7  ;;  %v2760_v21 = vor.u32 1.1754944e-38, %v2759_v4  ;;  %vm2758_vm3 = vcmp.eq.f32.partialorder %v2757_v5, 8.507059e+37 }
 0x2cf   : > { %v2732_v44 = vmul.f32 %v2731_v33, %v4873_v6  ;;  %v1245_v40 = vadd.f32 %v1244_v47, %v1036_v31  ;;  %v1453_v48 = vpop.f32.mrf.mxu3  ;;  %v2736_v49 = vmul.f32 %v3372_v39, %v2735_v38  ;;  %v1654_v50 = vsub.f32 0.0, %v4929_v46 }
 0x2d0   : > { %v2745_v6 = vor.u32 1.1754944e-38, %v2744_v60 }
 0x2d1   : > { %2866 = vst [vmem:[%s3903_s2 + $0x1d0] sm:$0xff] %v2732_v44  ;;  %v1454_v1 = vadd.f32 %v1453_v48, %v1245_v40  ;;  %v2737_v54 = vadd.f32 %v3372_v39, %v2736_v49  ;;  %v1780_v0 = vmul.f32 1.442695, %v1654_v50 }
 0x2d2   : > { %v3374_v51 = vpop.eup %3373 }
 0x2d3   : > { %v3376_v61 = vpop.eup %3375  ;;  %v2749_v53 = vmul.f32 %v3374_v51, %v1844_v7  ;;  %v1523_v57 = vmul.f32 %v4882_v32, %v1454_v1  ;;  %v2741_v56 = vsel %vm2740_vm14, %v3372_v39, %v2737_v54  ;;  %3377 = vpow2.f32 %v1780_v0 }
 0x2d4   : > { %v1845_v55 = vadd.f32 1.0, %v3376_v61  ;;  %v2746_v52 = vsel %vm2743_vm15, %v2745_v6, %v2741_v56  ;;  %vm2754_vm0 = vweird.f32 %v3374_v51 }
 0x2d5   : > { %v2750_v2 = vsub.f32 1.0, %v2749_v53  ;;  %v4939_v18 = vadd.f32 %v4887_v14, %v1523_v57  ;;  %v2747_v3 = vmul.f32 %v2746_v52, %v4890_v35  ;;  %vm2755_vm2 = vmor %vm2753_vm1, %vm2754_vm0 }
 0x2d6   : > { %3379 = vrcp.f32 %v1845_v55  ;;  %v2774_v13 = vand.u32 2147483648, %v1845_v55  ;;  %v2772_v16 = vand.u32 2147483647, %v1845_v55  ;;  %vm2768_vm5 = vweird.f32 %v1845_v55 }
 0x2d7   : > { %v2751_v19 = vmul.f32 %v3374_v51, %v2750_v2  ;;  %v1655_v58 = vsub.f32 0.0, %v4939_v18  ;;  %2867 = vst [vmem:[%s3903_s2 + $0x1d8] sm:$0xff] %v2747_v3 }
 0x2d8   : > { %v2775_v22 = vor.u32 1.1754944e-38, %v2774_v13  ;;  %vm2773_vm7 = vcmp.eq.f32.partialorder %v2772_v16, 8.507059e+37 }
 0x2d9   : > { %v2752_v32 = vadd.f32 %v3374_v51, %v2751_v19  ;;  %v1782_v20 = vmul.f32 1.442695, %v1655_v58  ;;  %v3378_v8 = vpop.eup %3377 }
 0x2da   : > { %v1846_v14 = vadd.f32 1.0, %v3378_v8 }
 0x2db   : > { %v2756_v43 = vsel %vm2755_vm2, %v3374_v51, %v2752_v32  ;;  %3381 = vpow2.f32 %v1782_v20 }
 0x2dc   : > { %v3380_v35 = vpop.eup %3379  ;;  %v2761_v9 = vsel %vm2758_vm3, %v2760_v21, %v2756_v43  ;;  %3383 = vrcp.f32 %v1846_v14  ;;  %v2789_v27 = vand.u32 2147483648, %v1846_v14  ;;  %v2787_v11 = vand.u32 2147483647, %v1846_v14 }
 0x2dd   : > { %v2762_v36 = vmul.f32 %v2761_v9, %v4903_v12  ;;  %v2764_v41 = vmul.f32 %v3380_v35, %v1845_v55  ;;  %vm2769_vm4 = vweird.f32 %v3380_v35  ;;  %vm2783_vm9 = vweird.f32 %v1846_v14 }
 0x2de   : > { %vm2770_vm6 = vmor %vm2768_vm5, %vm2769_vm4  ;;  %v2790_v28 = vor.u32 1.1754944e-38, %v2789_v27  ;;  %vm2788_vm11 = vcmp.eq.f32.partialorder %v2787_v11, 8.507059e+37 }
 0x2df   : > { %2868 = vst [vmem:[%s3903_s2 + $0x1e0] sm:$0xff] %v2762_v36  ;;  %v2765_v62 = vsub.f32 1.0, %v2764_v41 }
 0x2e1   : > { %v3382_v59 = vpop.eup %3381  ;;  %v2766_v10 = vmul.f32 %v3380_v35, %v2765_v62 }
 0x2e2   : > { %v1847_v24 = vadd.f32 1.0, %v3382_v59  ;;  %v3384_v23 = vpop.eup %3383 }
 0x2e3   : > { %v2767_v17 = vadd.f32 %v3380_v35, %v2766_v10  ;;  %v2779_v26 = vmul.f32 %v3384_v23, %v1846_v14  ;;  %vm2784_vm8 = vweird.f32 %v3384_v23 }
 0x2e4   : > { %3385 = vrcp.f32 %v1847_v24  ;;  %vm2785_vm10 = vmor %vm2783_vm9, %vm2784_vm8  ;;  %v2804_v33 = vand.u32 2147483648, %v1847_v24  ;;  %v2802_v47 = vand.u32 2147483647, %v1847_v24  ;;  %vm2798_vm13 = vweird.f32 %v1847_v24 }
 0x2e5   : > { %v2771_v63 = vsel %vm2770_vm6, %v3380_v35, %v2767_v17  ;;  %v2780_v25 = vsub.f32 1.0, %v2779_v26 }
 0x2e6   : > { %v2776_v12 = vsel %vm2773_vm7, %v2775_v22, %v2771_v63  ;;  %v2805_v60 = vor.u32 1.1754944e-38, %v2804_v33  ;;  %vm2803_vm15 = vcmp.eq.f32.partialorder %v2802_v47, 8.507059e+37 }
 0x2e7   : > { %v2777_v7 = vmul.f32 %v2776_v12, %v4919_v15  ;;  %v2781_v29 = vmul.f32 %v3384_v23, %v2780_v25 }
 0x2e9   : > { %2869 = vst [vmem:[%s3903_s2 + $0x1e8] sm:$0xff] %v2777_v7  ;;  %v2782_v34 = vadd.f32 %v3384_v23, %v2781_v29 }
 0x2ea   : > { %v3386_v39 = vpop.eup %3385 }
 0x2eb   : > { %v2794_v31 = vmul.f32 %v3386_v39, %v1847_v24  ;;  %v2786_v30 = vsel %vm2785_vm10, %v3384_v23, %v2782_v34  ;;  %vm2799_vm12 = vweird.f32 %v3386_v39 }
 0x2ec   : > { %v2791_v37 = vsel %vm2788_vm11, %v2790_v28, %v2786_v30  ;;  %vm2800_vm14 = vmor %vm2798_vm13, %vm2799_vm12 }
 0x2ed   : > { %v2795_v45 = vsub.f32 1.0, %v2794_v31  ;;  %v2792_v15 = vmul.f32 %v2791_v37, %v4929_v46 }
 0x2ef   : > { %v2796_v38 = vmul.f32 %v3386_v39, %v2795_v45  ;;  %2870 = vst [vmem:[%s3903_s2 + $0x1f0] sm:$0xff] %v2792_v15 }
 0x2f1   : > { %v2797_v44 = vadd.f32 %v3386_v39, %v2796_v38 }
 0x2f3   : > { %v2801_v40 = vsel %vm2800_vm14, %v3386_v39, %v2797_v44 }
 0x2f4   : > { %v2806_v46 = vsel %vm2803_vm15, %v2805_v60, %v2801_v40 }
 0x2f5   : > { %v2807_v48 = vmul.f32 %v2806_v46, %v4939_v18 }
 0x2f7   : > { %2871 = vst [vmem:[%s3903_s2 + $0x1f8] sm:$0xff] %v2807_v48 }
 0x2f8   : > { %3542 = shalt.err (!%p3539_p12)
}
 0x2f9   : > { %s3614_s6 = smov 128   ;;  %s3615_s11 = smov 8  }
 0x2fa   : > { %3044 = dma.vmem_to_hbm [thread:$0]  (%p3735_p3), %s2887_s18, 8192, %s2889_s10, %s2873_s14, %s3614_s6, %s3614_s6, %s3615_s11  }
 0x2fb PF: > { %p3071_p13 = scmp.ge.s32.totalorder %s3605_s20, 2  ;;  %s2903_s13 = sand.u32 1, %s3585_s15  }
 0x2fc   : > { %s2904_s1 = scalar_lea.sflag [#allocation4], %s2903_s13 }
 0x2fd   : > { %p3061_p0 = pnand %p3071_p13, %p3690_p6 }
 0x2ff   : > { %p3062_p5 = pneg %p3061_p0 }
 0x301   : > { %3580 = dma.done.wait (%p3062_p5), %s2904_s1, 8192  }
 0x302   : > { %3582 = vsyncadd (%p3062_p5), %s2904_s1, 4294959104  ;;  %s22_s20 = sadd.s32 1, %s3605_s20   ;;  %s5009_s15 = smov %s3589_s16 }
 0x303   : > { %p19_p7 = scmp.ge.s32.totalorder %s22_s20, 6   ;;  %s5010_s16 = smov %s3593_s17 }
 0x304   : > { %s5011_s17 = smov %s3744_s12  ;;  %s5012_s18 = smov %s3601_s19 }
 0x305   : > { %s5013_s19 = smov %s5015_s29  ;;  %21 = sbr.rel (!%p19_p7) target bundleno = 11 (0xb), region = 96 }
 0x30a   :  { %2910 = vsyncpa [#allocation3], 1 }
 0x30b   :  { %2912 = vsyncpa [#allocation3 + $0x1], 1 }
 0x30c   :  { %2913 = vsyncpa [#allocation6], 1 }
 0x30d   :  { %2914 = vsyncpa [#allocation9], 1 }
 0x30e   :  { %2915 = vsyncpa [#allocation4], 1 }
 0x30f   :  { %2917 = vsyncpa [#allocation4 + $0x1], 1 }

</bundles_post_ra>
